<compile_context>
chip_gen: v7x
topology: tpu7x:2x2x1
jax: 0.10.0
libtpu: 0.0.40
codegen_flags: <defaults>
</compile_context>

<pallas_src>
import functools

import jax
import jax.numpy as jnp
from jax import lax
from jax.experimental import pallas as pl
from jax.experimental.pallas import tpu as pltpu


def _round_up(x, m):
    return (x + m - 1) // m * m


# ----------------------------------------------------------------------------
# Kernel: whole T-step decode in one invocation (single grid point).
# ----------------------------------------------------------------------------
def _attn_decoder_kernel(
    tok_ref,          # scalar prefetch: (T,) int32 token ids (SMEM)
    emb_ref,          # (V, HP)      f32  embedding table (VMEM-resident)
    enccomb_ref,      # (LP, HP)     bf16 encoder_outputs @ Wc_attn_applied
    h0_ref,           # (1, HP)      f32  initial hidden
    wec_ref,          # (HP, LP+HP)  bf16 emb-side [attn | combine] weights
    wah_ref,          # (HP, LP)     bf16 hid-side attention weights
    battn_ref,        # (1, LP)      f32  attention bias (-1e9 pad lanes)
    bcomb_ref,        # (1, HP)      f32  combine bias
    wgru_ref,         # (2HP, 4HP)   bf16 fused GRU weights [r | z | ni | nh]
    bgru_ref,         # (1, 4HP)     f32  fused GRU bias (pad lanes MUST be 0)
    wout_ref,         # (HP, VP)     bf16 output projection
    bout_ref,         # (1, VP)      f32  output bias (-1e9 pad lanes)
    logp_ref,         # out (TP, VP) f32  log-probs
    hidseq_ref,       # out (TP, HP) f32  per-step hidden states
    attnw_ref,        # out (TP, LP) f32  per-step attention weights
):
    T = tok_ref.shape[0]
    HP = h0_ref.shape[1]
    LP = battn_ref.shape[1]
    bf16 = jnp.bfloat16

    # Defined values in the TP > T pad rows (sliced off by the wrapper).
    hidseq_ref[...] = jnp.zeros_like(hidseq_ref)
    attnw_ref[...] = jnp.zeros_like(attnw_ref)

    b_attn = battn_ref[...]
    b_comb = bcomb_ref[...]
    b_gru = bgru_ref[...]

    def step(t, hid):                                  # hid: (1, HP) f32
        tok = tok_ref[t]
        emb = emb_ref[pl.ds(tok, 1), :]                # (1, HP) f32, pad lanes 0

        # emb-side contributions to [attn logits | combine pre-activation];
        # independent of the recurrent state -> off the serial chain.
        ec = jnp.dot(emb.astype(bf16), wec_ref[...],
                     preferred_element_type=jnp.float32)          # (1, LP+HP)

        # hid-side attention logits (on the recurrent chain).
        ah = jnp.dot(hid.astype(bf16), wah_ref[...],
                     preferred_element_type=jnp.float32)          # (1, LP)

        logits = ec[:, :LP] + ah + b_attn              # pad lanes -> -1e9
        m = jnp.max(logits, axis=-1, keepdims=True)
        e = jnp.exp(logits - m)
        attn_w = e / jnp.sum(e, axis=-1, keepdims=True)           # exact softmax

        # attn_combine with pre-multiplied encoder outputs, then ReLU.
        xa = jnp.dot(attn_w.astype(bf16), enccomb_ref[...],
                     preferred_element_type=jnp.float32)          # (1, HP)
        x = jnp.maximum(ec[:, LP:LP + HP] + xa + b_comb, 0.0)     # (1, HP)

        # One GRU step = ONE fused matmul; gate column blocks [r | z | ni | nh].
        xh = jnp.concatenate([x, hid], axis=-1).astype(bf16)      # (1, 2HP)
        g = jnp.dot(xh, wgru_ref[...],
                    preferred_element_type=jnp.float32) + b_gru   # (1, 4HP)
        r = jax.nn.sigmoid(g[:, 0:HP])
        z = jax.nn.sigmoid(g[:, HP:2 * HP])
        n = jnp.tanh(g[:, 2 * HP:3 * HP] + r * g[:, 3 * HP:4 * HP])
        h_new = (1.0 - z) * n + z * hid                           # (1, HP)

        hidseq_ref[pl.ds(t, 1), :] = h_new
        attnw_ref[pl.ds(t, 1), :] = attn_w
        return h_new

    # Short fixed trip-count recurrence: fully unrolled for LLO visibility.
    lax.fori_loop(0, T, step, h0_ref[...], unroll=True)

    # Batched output projection + log_softmax for all T steps at once
    # (hoisted out of the recurrent critical path; M=T instead of M=1).
    h_seq = hidseq_ref[...].astype(bf16)                          # (TP, HP)
    o = jnp.dot(h_seq, wout_ref[...],
                preferred_element_type=jnp.float32) + bout_ref[...]
    om = jnp.max(o, axis=-1, keepdims=True)
    s = o - om
    lse = jnp.log(jnp.sum(jnp.exp(s), axis=-1, keepdims=True))
    logp_ref[...] = s - lse


# ----------------------------------------------------------------------------
# Wrappers
# ----------------------------------------------------------------------------
def attn_decoder_decode(tokens, hidden, encoder_outputs, *, packed,
                        hidden_size, max_length, output_size):
    """Teacher-forced T-step decode in one pallas_call.

    tokens: int32 (T,); hidden: (1,1,H); encoder_outputs: (L,H).
    Returns (logp (T,V), hidden_seq (T,H), attn_weights (T,L))."""
    H, L, V = hidden_size, max_length, output_size
    HP, LP, VP = _round_up(H, 128), _round_up(L, 128), _round_up(V, 128)
    T = int(tokens.shape[0])
    TP = _round_up(T, 8)
    Vocab = packed["embedding"].shape[0]

    h0_p = jnp.zeros((1, HP), jnp.float32).at[:, :H].set(
        hidden.reshape(1, H).astype(jnp.float32))

    # Chain-shortening: pre-multiply encoder outputs by the attn_applied half
    # of the combine weight (tiny XLA matmul, once per call).
    enc_comb = encoder_outputs.astype(jnp.float32) @ packed["w_comb_att"]
    enc_comb_p = jnp.zeros((LP, HP), jnp.float32).at[:L, :H].set(enc_comb)
    enc_comb_p = enc_comb_p.astype(jnp.bfloat16)

    grid_spec = pltpu.PrefetchScalarGridSpec(
        num_scalar_prefetch=1,
        grid=(1,),
        in_specs=[
            pl.BlockSpec((Vocab, HP), lambda i, tok: (0, 0)),       # emb table
            pl.BlockSpec((LP, HP), lambda i, tok: (0, 0)),          # enc_comb
            pl.BlockSpec((1, HP), lambda i, tok: (0, 0)),           # h0
            pl.BlockSpec((HP, LP + HP), lambda i, tok: (0, 0)),     # w_ec fused
            pl.BlockSpec((HP, LP), lambda i, tok: (0, 0)),          # w_ah
            pl.BlockSpec((1, LP), lambda i, tok: (0, 0)),           # b_attn
            pl.BlockSpec((1, HP), lambda i, tok: (0, 0)),           # b_comb
            pl.BlockSpec((2 * HP, 4 * HP), lambda i, tok: (0, 0)),  # w_gru
            pl.BlockSpec((1, 4 * HP), lambda i, tok: (0, 0)),       # b_gru
            pl.BlockSpec((HP, VP), lambda i, tok: (0, 0)),          # w_out
            pl.BlockSpec((1, VP), lambda i, tok: (0, 0)),           # b_out
        ],
        out_specs=[
            pl.BlockSpec((TP, VP), lambda i, tok: (0, 0)),          # log-probs
            pl.BlockSpec((TP, HP), lambda i, tok: (0, 0)),          # hidden seq
            pl.BlockSpec((TP, LP), lambda i, tok: (0, 0)),          # attn weights
        ],
    )

    logp_p, hid_p, attn_p = pl.pallas_call(
        _attn_decoder_kernel,
        out_shape=(
            jax.ShapeDtypeStruct((TP, VP), jnp.float32),
            jax.ShapeDtypeStruct((TP, HP), jnp.float32),
            jax.ShapeDtypeStruct((TP, LP), jnp.float32),
        ),
        grid_spec=grid_spec,
        compiler_params=pltpu.CompilerParams(
            dimension_semantics=("arbitrary",)),                    # recurrence
    )(
        tokens.astype(jnp.int32),
        packed["embedding"], enc_comb_p, h0_p,
        packed["w_ec"], packed["w_ah"], packed["b_attn"], packed["b_comb"],
        packed["w_gru"], packed["b_gru"], packed["w_out"], packed["b_out"],
    )

    return logp_p[:T, :V], hid_p[:T, :H], attn_p[:T, :L]


def attn_decoder_forward(decoder_input, hidden, encoder_outputs, *, packed,
                         hidden_size, max_length, output_size):
    """Single-step forward matching the PyTorch module signature/outputs."""
    tokens = decoder_input.reshape((1,)).astype(jnp.int32)
    logp, hid_seq, attn = attn_decoder_decode(
        tokens, hidden, encoder_outputs, packed=packed,
        hidden_size=hidden_size, max_length=max_length,
        output_size=output_size)
    return logp, hid_seq.reshape(1, 1, hidden_size), attn


# ----------------------------------------------------------------------------
# Parameters: logical (PyTorch-equivalent) init + packing into the fused,
# lane-padded, bf16 kernel layout.
# ----------------------------------------------------------------------------
def init_params(key, output_size, embedding_dim, hidden_size, max_length):
    """Deterministic parameter init (uniform +-1/sqrt(fan_in), PyTorch-style)."""
    assert embedding_dim == hidden_size, "module's cat() requires E == H"
    H, E, L, V = hidden_size, embedding_dim, max_length, output_size
    keys = jax.random.split(key, 12)

    def unif(k, shape, fan_in):
        bound = 1.0 / jnp.sqrt(jnp.float32(fan_in))
        return jax.random.uniform(k, shape, jnp.float32, -bound, bound)

    return {
        "embedding": jax.random.normal(keys[0], (V, E), jnp.float32),
        "w_attn": unif(keys[1], (2 * H, L), 2 * H),   # Linear(2H->L), (in,out)
        "b_attn": unif(keys[2], (L,), 2 * H),
        "w_comb": unif(keys[3], (2 * H, H), 2 * H),   # Linear(2H->H)
        "b_comb": unif(keys[4], (H,), 2 * H),
        "w_ih": unif(keys[5], (E, 3 * H), H),         # GRU, gate order r,z,n
        "w_hh": unif(keys[6], (H, 3 * H), H),
        "b_ih": unif(keys[7], (3 * H,), H),
        "b_hh": unif(keys[8], (3 * H,), H),
        "w_out": unif(keys[9], (H, V), H),            # Linear(H->V)
        "b_out": unif(keys[10], (V,), H),
    }


def pack_params(params, output_size, embedding_dim, hidden_size, max_length):
    """Pad / fuse logical params into the lane-aligned bf16 kernel layout."""
    H, E, L, V = hidden_size, embedding_dim, max_length, output_size
    HP, LP, VP = _round_up(H, 128), _round_up(L, 128), _round_up(V, 128)
    NEG = jnp.float32(-1e9)   # softmax mask value for padded lanes
    f32, bf16 = jnp.float32, jnp.bfloat16

    # Embedding table stays f32: it is tiny and its rows are gathered with a
    # dynamic sublane slice (bf16 packing would only complicate the gather).
    emb = jnp.zeros((V, HP), f32).at[:, :E].set(params["embedding"])

    wa, wc = params["w_attn"], params["w_comb"]       # (2H, L), (2H, H)

    # Fused emb-side weights: one (HP, LP+HP) matmul yields the emb
    # contribution to BOTH the attention logits and the combine pre-activation.
    w_ec = jnp.zeros((HP, LP + HP), f32)
    w_ec = w_ec.at[:E, :L].set(wa[:E])
    w_ec = w_ec.at[:E, LP:LP + H].set(wc[:E])

    # Hidden-side attention weights.
    w_ah = jnp.zeros((HP, LP), f32).at[:H, :L].set(wa[E:])

    b_attn = jnp.full((1, LP), NEG).at[0, :L].set(params["b_attn"])
    b_comb = jnp.zeros((1, HP), f32).at[0, :H].set(params["b_comb"])

    # attn_applied-side combine weights kept logical (f32, (H,H)):
    # the wrapper computes enc_comb = encoder_outputs @ w_comb_att per call.
    w_comb_att = wc[E:].astype(f32)

    # GRU fused into one (2HP, 4HP) matmul over cat(x, hid).
    # Gate column blocks (each HP wide): [r | z | n_input | n_hidden].
    wi, wh = params["w_ih"], params["w_hh"]
    bi, bh = params["b_ih"], params["b_hh"]
    w_gru = jnp.zeros((2 * HP, 4 * HP), f32)
    w_gru = w_gru.at[:E, 0:H].set(wi[:, 0:H])                          # r (in)
    w_gru = w_gru.at[HP:HP + H, 0:H].set(wh[:, 0:H])                   # r (hid)
    w_gru = w_gru.at[:E, HP:HP + H].set(wi[:, H:2 * H])                # z (in)
    w_gru = w_gru.at[HP:HP + H, HP:HP + H].set(wh[:, H:2 * H])         # z (hid)
    w_gru = w_gru.at[:E, 2 * HP:2 * HP + H].set(wi[:, 2 * H:])         # n (in)
    w_gru = w_gru.at[HP:HP + H, 3 * HP:3 * HP + H].set(wh[:, 2 * H:])  # n (hid)
    # NOTE: b_gru pad lanes MUST stay 0 so padded hidden lanes decay to 0.
    b_gru = jnp.zeros((1, 4 * HP), f32)
    b_gru = b_gru.at[0, 0:H].set(bi[0:H] + bh[0:H])                    # folded
    b_gru = b_gru.at[0, HP:HP + H].set(bi[H:2 * H] + bh[H:2 * H])      # folded
    b_gru = b_gru.at[0, 2 * HP:2 * HP + H].set(bi[2 * H:])
    b_gru = b_gru.at[0, 3 * HP:3 * HP + H].set(bh[2 * H:])

    # output Linear(H -> V); padded vocab lanes masked for log_softmax.
    w_out = jnp.zeros((HP, VP), f32).at[:H, :V].set(params["w_out"])
    b_out = jnp.full((1, VP), NEG).at[0, :V].set(params["b_out"])

    return {
        "embedding": emb,
        "w_ec": w_ec.astype(bf16), "w_ah": w_ah.astype(bf16),
        "b_attn": b_attn, "b_comb": b_comb,
        "w_comb_att": w_comb_att,
        "w_gru": w_gru.astype(bf16), "b_gru": b_gru,
        "w_out": w_out.astype(bf16), "b_out": b_out,
    }


# ----------------------------------------------------------------------------
# Pure-JAX reference (faithful re-implementation of the PyTorch forward).
# ----------------------------------------------------------------------------
def reference_decode(tokens, hidden, encoder_outputs, params):
    H = hidden.shape[-1]
    h = hidden.reshape(1, H)
    logps, hids, attns = [], [], []
    for t in range(int(tokens.shape[0])):
        emb = params["embedding"][tokens[t]][None, :]                  # (1, E)
        cat1 = jnp.concatenate([emb, h], axis=1)
        attn_w = jax.nn.softmax(cat1 @ params["w_attn"] + params["b_attn"], axis=1)
        attn_applied = attn_w @ encoder_outputs
        cat2 = jnp.concatenate([emb, attn_applied], axis=1)
        x = jax.nn.relu(cat2 @ params["w_comb"] + params["b_comb"])
        gi = x @ params["w_ih"] + params["b_ih"]
        gh = h @ params["w_hh"] + params["b_hh"]
        r = jax.nn.sigmoid(gi[:, :H] + gh[:, :H])
        z = jax.nn.sigmoid(gi[:, H:2 * H] + gh[:, H:2 * H])
        n = jnp.tanh(gi[:, 2 * H:] + r * gh[:, 2 * H:])
        h = (1.0 - z) * n + z * h
        logp = jax.nn.log_softmax(h @ params["w_out"] + params["b_out"], axis=1)
        logps.append(logp); hids.append(h); attns.append(attn_w)
    return (jnp.concatenate(logps, 0), jnp.concatenate(hids, 0),
            jnp.concatenate(attns, 0))


# ----------------------------------------------------------------------------
if __name__ == "__main__":
    OUTPUT_SIZE = 64     # vocab size
    EMBED_DIM = 32
    HIDDEN = 32
    MAX_LEN = 16
    T_STEPS = 6          # decode timesteps folded into one kernel call
    DROPOUT_P = 0.1      # eval mode -> identity

    key = jax.random.PRNGKey(0)
    k_par, k_enc, k_tok = jax.random.split(key, 3)

    params = init_params(k_par, OUTPUT_SIZE, EMBED_DIM, HIDDEN, MAX_LEN)
    packed = pack_params(params, OUTPUT_SIZE, EMBED_DIM, HIDDEN, MAX_LEN)

    tokens = jax.random.randint(k_tok, (T_STEPS,), 0, OUTPUT_SIZE, dtype=jnp.int32)
    hidden0 = jnp.zeros((1, 1, HIDDEN), jnp.float32)                   # initHidden
    encoder_outputs = jax.random.normal(k_enc, (MAX_LEN, HIDDEN), jnp.float32)

    decode = jax.jit(functools.partial(
        attn_decoder_decode, packed=packed, hidden_size=HIDDEN,
        max_length=MAX_LEN, output_size=OUTPUT_SIZE))
    logp_seq, hid_seq, attn_seq = decode(tokens, hidden0, encoder_outputs)
    jax.block_until_ready((logp_seq, hid_seq, attn_seq))

    assert logp_seq.shape == (T_STEPS, OUTPUT_SIZE)
    assert hid_seq.shape == (T_STEPS, HIDDEN)
    assert attn_seq.shape == (T_STEPS, MAX_LEN)

    # Validate against the pure-JAX (f32) reference of the PyTorch semantics.
    # bf16 weights (with f32 accumulation / activations) -> small drift.
    ref_logp, ref_hid, ref_attn = reference_decode(
        tokens, hidden0, encoder_outputs, params)
    assert float(jnp.max(jnp.abs(logp_seq - ref_logp))) < 5e-2
    assert float(jnp.max(jnp.abs(hid_seq - ref_hid))) < 3e-2
    assert float(jnp.max(jnp.abs(attn_seq - ref_attn))) < 1.5e-2

    # Exact (non-approx) softmax / log_softmax normalization in-kernel.
    assert float(jnp.max(jnp.abs(jnp.exp(logp_seq).sum(-1) - 1.0))) < 1e-3
    assert float(jnp.max(jnp.abs(attn_seq.sum(-1) - 1.0))) < 1e-3

    # Single-step call matching the original module signature.
    step = jax.jit(functools.partial(
        attn_decoder_forward, packed=packed, hidden_size=HIDDEN,
        max_length=MAX_LEN, output_size=OUTPUT_SIZE))
    dec_in = tokens[:1].reshape(1, 1)
    logp1, new_hidden, attn1 = step(dec_in, hidden0, encoder_outputs)
    jax.block_until_ready((logp1, new_hidden, attn1))
    assert logp1.shape == (1, OUTPUT_SIZE)
    assert new_hidden.shape == (1, 1, HIDDEN)
    assert attn1.shape == (1, MAX_LEN)
    assert float(jnp.max(jnp.abs(logp1[0] - ref_logp[0]))) < 5e-2

    print("KERNEL_OK")
</pallas_src>

<mosaic_0001>
module attributes {stable_mosaic.version = 11 : i64} {
  func.func @_attn_decoder_kernel(%arg0: i32, %arg1: memref<6xi32, #tpu.memory_space<smem>>, %arg2: memref<64x128xf32, #tpu.memory_space<vmem>>, %arg3: memref<128x128xbf16, #tpu.memory_space<vmem>>, %arg4: memref<1x128xf32, #tpu.memory_space<vmem>>, %arg5: memref<128x256xbf16, #tpu.memory_space<vmem>>, %arg6: memref<128x128xbf16, #tpu.memory_space<vmem>>, %arg7: memref<1x128xf32, #tpu.memory_space<vmem>>, %arg8: memref<1x128xf32, #tpu.memory_space<vmem>>, %arg9: memref<256x512xbf16, #tpu.memory_space<vmem>>, %arg10: memref<1x512xf32, #tpu.memory_space<vmem>>, %arg11: memref<128x128xbf16, #tpu.memory_space<vmem>>, %arg12: memref<1x128xf32, #tpu.memory_space<vmem>>, %arg13: memref<8x128xf32, #tpu.memory_space<vmem>>, %arg14: memref<8x128xf32, #tpu.memory_space<vmem>>, %arg15: memref<8x128xf32, #tpu.memory_space<vmem>>) attributes {dimension_semantics = [#tpu.dimension_semantics<arbitrary>], iteration_bounds = array<i64: 1>, scalar_prefetch = 1 : i64, scratch_operands = 0 : i64, tpu.core_type = #tpu.core_type<tc>, window_params = [{pipeline_mode = #tpu.pipeline_mode<synchronous>, transform_indices = @transform_0, window_bounds = array<i64: 64, 128>}, {pipeline_mode = #tpu.pipeline_mode<synchronous>, transform_indices = @transform_1, window_bounds = array<i64: 128, 128>}, {pipeline_mode = #tpu.pipeline_mode<synchronous>, transform_indices = @transform_2, window_bounds = array<i64: 1, 128>}, {pipeline_mode = #tpu.pipeline_mode<synchronous>, transform_indices = @transform_3, window_bounds = array<i64: 128, 256>}, {pipeline_mode = #tpu.pipeline_mode<synchronous>, transform_indices = @transform_4, window_bounds = array<i64: 128, 128>}, {pipeline_mode = #tpu.pipeline_mode<synchronous>, transform_indices = @transform_5, window_bounds = array<i64: 1, 128>}, {pipeline_mode = #tpu.pipeline_mode<synchronous>, transform_indices = @transform_6, window_bounds = array<i64: 1, 128>}, {pipeline_mode = #tpu.pipeline_mode<synchronous>, transform_indices = @transform_7, window_bounds = array<i64: 256, 512>}, {pipeline_mode = #tpu.pipeline_mode<synchronous>, transform_indices = @transform_8, window_bounds = array<i64: 1, 512>}, {pipeline_mode = #tpu.pipeline_mode<synchronous>, transform_indices = @transform_9, window_bounds = array<i64: 128, 128>}, {pipeline_mode = #tpu.pipeline_mode<synchronous>, transform_indices = @transform_10, window_bounds = array<i64: 1, 128>}, {pipeline_mode = #tpu.pipeline_mode<synchronous>, transform_indices = @transform_11, window_bounds = array<i64: 8, 128>}, {pipeline_mode = #tpu.pipeline_mode<synchronous>, transform_indices = @transform_12, window_bounds = array<i64: 8, 128>}, {pipeline_mode = #tpu.pipeline_mode<synchronous>, transform_indices = @transform_13, window_bounds = array<i64: 8, 128>}]} {
    %cst = arith.constant 0.000000e+00 : f32
    %0 = vector.broadcast %cst : f32 to vector<8x128xf32>
    %c0 = arith.constant 0 : index
    %c0_0 = arith.constant 0 : index
    %1 = vector.load %arg14[%c0, %c0_0] : memref<8x128xf32, #tpu.memory_space<vmem>>, vector<8x128xf32>
    tpu.vector_store %arg14[%c0, %c0_0], %0 {strides = array<i32>} : memref<8x128xf32, #tpu.memory_space<vmem>>, vector<8x128xf32>,
    %cst_1 = arith.constant 0.000000e+00 : f32
    %2 = vector.broadcast %cst_1 : f32 to vector<8x128xf32>
    %c0_2 = arith.constant 0 : index
    %c0_3 = arith.constant 0 : index
    %3 = vector.load %arg15[%c0_2, %c0_3] : memref<8x128xf32, #tpu.memory_space<vmem>>, vector<8x128xf32>
    tpu.vector_store %arg15[%c0_2, %c0_3], %2 {strides = array<i32>} : memref<8x128xf32, #tpu.memory_space<vmem>>, vector<8x128xf32>,
    %c0_4 = arith.constant 0 : index
    %c0_5 = arith.constant 0 : index
    %4 = vector.load %arg7[%c0_4, %c0_5] : memref<1x128xf32, #tpu.memory_space<vmem>>, vector<1x128xf32>
    %c0_6 = arith.constant 0 : index
    %c0_7 = arith.constant 0 : index
    %5 = vector.load %arg8[%c0_6, %c0_7] : memref<1x128xf32, #tpu.memory_space<vmem>>, vector<1x128xf32>
    %c0_8 = arith.constant 0 : index
    %c0_9 = arith.constant 0 : index
    %6 = vector.load %arg10[%c0_8, %c0_9] : memref<1x512xf32, #tpu.memory_space<vmem>>, vector<1x512xf32>
    %c0_10 = arith.constant 0 : index
    %c0_11 = arith.constant 0 : index
    %7 = vector.load %arg4[%c0_10, %c0_11] : memref<1x128xf32, #tpu.memory_space<vmem>>, vector<1x128xf32>
    %c0_i32 = arith.constant 0 : i32
    %8 = arith.index_cast %c0_i32 : i32 to index
    %9 = memref.load %arg1[%8] : memref<6xi32, #tpu.memory_space<smem>>
    %10 = arith.index_cast %9 : i32 to index
    %c0_12 = arith.constant 0 : index
    %11 = vector.load %arg2[%10, %c0_12] : memref<64x128xf32, #tpu.memory_space<vmem>>, vector<1x128xf32>
    %12 = arith.truncf %11 : vector<1x128xf32> to vector<1x128xbf16>
    %c0_13 = arith.constant 0 : index
    %c0_14 = arith.constant 0 : index
    %13 = vector.load %arg5[%c0_13, %c0_14] : memref<128x256xbf16, #tpu.memory_space<vmem>>, vector<128x256xbf16>
    %cst_15 = arith.constant dense<0.000000e+00> : vector<1x256xf32>
    %14 = tpu.matmul %12, %13, %cst_15 {dimension_numbers = #tpu.dot_dimension_numbers<[1], [0], [0], [1], [0, 0, 1, 1], [], []>} : vector<1x128xbf16>, vector<128x256xbf16>, vector<1x256xf32> -> vector<1x256xf32>
    %15 = arith.truncf %7 : vector<1x128xf32> to vector<1x128xbf16>
    %c0_16 = arith.constant 0 : index
    %c0_17 = arith.constant 0 : index
    %16 = vector.load %arg6[%c0_16, %c0_17] : memref<128x128xbf16, #tpu.memory_space<vmem>>, vector<128x128xbf16>
    %cst_18 = arith.constant dense<0.000000e+00> : vector<1x128xf32>
    %17 = tpu.matmul %15, %16, %cst_18 {dimension_numbers = #tpu.dot_dimension_numbers<[1], [0], [0], [1], [0, 0, 1, 1], [], []>} : vector<1x128xbf16>, vector<128x128xbf16>, vector<1x128xf32> -> vector<1x128xf32>
    %18 = vector.extract_strided_slice %14 {offsets = [0, 0], sizes = [1, 128], strides = [1, 1]} : vector<1x256xf32> to vector<1x128xf32>
    %19 = arith.addf %18, %17 : vector<1x128xf32>
    %20 = arith.addf %19, %4 : vector<1x128xf32>
    %cst_19 = arith.constant dense<0xFF800000> : vector<1xf32>
    %21 = vector.multi_reduction <maximumf>, %20, %cst_19 [1] : vector<1x128xf32> to vector<1xf32>
    %22 = vector.shape_cast %21 : vector<1xf32> to vector<1x1xf32>
    %23 = vector.broadcast %22 : vector<1x1xf32> to vector<1x128xf32>
    %24 = arith.subf %20, %23 : vector<1x128xf32>
    %25 = math.exp %24 : vector<1x128xf32>
    %cst_20 = arith.constant dense<0.000000e+00> : vector<1xf32>
    %26 = vector.multi_reduction <add>, %25, %cst_20 [1] : vector<1x128xf32> to vector<1xf32>
    %27 = vector.shape_cast %26 : vector<1xf32> to vector<1x1xf32>
    %28 = vector.broadcast %27 : vector<1x1xf32> to vector<1x128xf32>
    %29 = arith.divf %25, %28 : vector<1x128xf32>
    %30 = arith.truncf %29 : vector<1x128xf32> to vector<1x128xbf16>
    %c0_21 = arith.constant 0 : index
    %c0_22 = arith.constant 0 : index
    %31 = vector.load %arg3[%c0_21, %c0_22] : memref<128x128xbf16, #tpu.memory_space<vmem>>, vector<128x128xbf16>
    %cst_23 = arith.constant dense<0.000000e+00> : vector<1x128xf32>
    %32 = tpu.matmul %30, %31, %cst_23 {dimension_numbers = #tpu.dot_dimension_numbers<[1], [0], [0], [1], [0, 0, 1, 1], [], []>} : vector<1x128xbf16>, vector<128x128xbf16>, vector<1x128xf32> -> vector<1x128xf32>
    %33 = vector.extract_strided_slice %14 {offsets = [0, 128], sizes = [1, 128], strides = [1, 1]} : vector<1x256xf32> to vector<1x128xf32>
    %34 = arith.addf %33, %32 : vector<1x128xf32>
    %35 = arith.addf %34, %5 : vector<1x128xf32>
    %cst_24 = arith.constant 0.000000e+00 : f32
    %36 = vector.broadcast %cst_24 : f32 to vector<1x128xf32>
    %37 = arith.maximumf %35, %36 : vector<1x128xf32>
    %38 = tpu.concatenate %37, %7 in 1 : vector<1x128xf32>, vector<1x128xf32> -> vector<1x256xf32>
    %39 = arith.truncf %38 : vector<1x256xf32> to vector<1x256xbf16>
    %c0_25 = arith.constant 0 : index
    %c0_26 = arith.constant 0 : index
    %40 = vector.load %arg9[%c0_25, %c0_26] : memref<256x512xbf16, #tpu.memory_space<vmem>>, vector<256x512xbf16>
    %cst_27 = arith.constant dense<0.000000e+00> : vector<1x512xf32>
    %41 = tpu.matmul %39, %40, %cst_27 {dimension_numbers = #tpu.dot_dimension_numbers<[1], [0], [0], [1], [0, 0, 1, 1], [], []>} : vector<1x256xbf16>, vector<256x512xbf16>, vector<1x512xf32> -> vector<1x512xf32>
    %42 = arith.addf %41, %6 : vector<1x512xf32>
    %43 = vector.extract_strided_slice %42 {offsets = [0, 0], sizes = [1, 128], strides = [1, 1]} : vector<1x512xf32> to vector<1x128xf32>
    %44 = arith.negf %43 : vector<1x128xf32>
    %45 = math.exp %44 : vector<1x128xf32>
    %cst_28 = arith.constant 1.000000e+00 : f32
    %46 = vector.broadcast %cst_28 : f32 to vector<1x128xf32>
    %47 = arith.addf %46, %45 : vector<1x128xf32>
    %48 = arith.divf %46, %47 : vector<1x128xf32>
    %49 = vector.extract_strided_slice %42 {offsets = [0, 128], sizes = [1, 128], strides = [1, 1]} : vector<1x512xf32> to vector<1x128xf32>
    %50 = arith.negf %49 : vector<1x128xf32>
    %51 = math.exp %50 : vector<1x128xf32>
    %cst_29 = arith.constant 1.000000e+00 : f32
    %52 = vector.broadcast %cst_29 : f32 to vector<1x128xf32>
    %53 = arith.addf %52, %51 : vector<1x128xf32>
    %54 = arith.divf %52, %53 : vector<1x128xf32>
    %55 = vector.extract_strided_slice %42 {offsets = [0, 256], sizes = [1, 128], strides = [1, 1]} : vector<1x512xf32> to vector<1x128xf32>
    %56 = vector.extract_strided_slice %42 {offsets = [0, 384], sizes = [1, 128], strides = [1, 1]} : vector<1x512xf32> to vector<1x128xf32>
    %57 = arith.mulf %48, %56 : vector<1x128xf32>
    %58 = arith.addf %55, %57 : vector<1x128xf32>
    %59 = math.tanh %58 : vector<1x128xf32>
    %cst_30 = arith.constant 1.000000e+00 : f32
    %60 = vector.broadcast %cst_30 : f32 to vector<1x128xf32>
    %61 = arith.subf %60, %54 : vector<1x128xf32>
    %62 = arith.mulf %61, %59 : vector<1x128xf32>
    %63 = arith.mulf %54, %7 : vector<1x128xf32>
    %64 = arith.addf %62, %63 : vector<1x128xf32>
    %65 = arith.index_cast %c0_i32 : i32 to index
    %c0_31 = arith.constant 0 : index
    %66 = vector.load %arg14[%65, %c0_31] : memref<8x128xf32, #tpu.memory_space<vmem>>, vector<1x128xf32>
    tpu.vector_store %arg14[%65, %c0_31], %64 {strides = array<i32>} : memref<8x128xf32, #tpu.memory_space<vmem>>, vector<1x128xf32>,
    %67 = arith.index_cast %c0_i32 : i32 to index
    %c0_32 = arith.constant 0 : index
    %68 = vector.load %arg15[%67, %c0_32] : memref<8x128xf32, #tpu.memory_space<vmem>>, vector<1x128xf32>
    tpu.vector_store %arg15[%67, %c0_32], %29 {strides = array<i32>} : memref<8x128xf32, #tpu.memory_space<vmem>>, vector<1x128xf32>,
    %c1_i32 = arith.constant 1 : i32
    %69 = arith.index_cast %c1_i32 : i32 to index
    %70 = memref.load %arg1[%69] : memref<6xi32, #tpu.memory_space<smem>>
    %71 = arith.index_cast %70 : i32 to index
    %c0_33 = arith.constant 0 : index
    %72 = vector.load %arg2[%71, %c0_33] : memref<64x128xf32, #tpu.memory_space<vmem>>, vector<1x128xf32>
    %73 = arith.truncf %72 : vector<1x128xf32> to vector<1x128xbf16>
    %c0_34 = arith.constant 0 : index
    %c0_35 = arith.constant 0 : index
    %74 = vector.load %arg5[%c0_34, %c0_35] : memref<128x256xbf16, #tpu.memory_space<vmem>>, vector<128x256xbf16>
    %cst_36 = arith.constant dense<0.000000e+00> : vector<1x256xf32>
    %75 = tpu.matmul %73, %74, %cst_36 {dimension_numbers = #tpu.dot_dimension_numbers<[1], [0], [0], [1], [0, 0, 1, 1], [], []>} : vector<1x128xbf16>, vector<128x256xbf16>, vector<1x256xf32> -> vector<1x256xf32>
    %76 = arith.truncf %64 : vector<1x128xf32> to vector<1x128xbf16>
    %c0_37 = arith.constant 0 : index
    %c0_38 = arith.constant 0 : index
    %77 = vector.load %arg6[%c0_37, %c0_38] : memref<128x128xbf16, #tpu.memory_space<vmem>>, vector<128x128xbf16>
    %cst_39 = arith.constant dense<0.000000e+00> : vector<1x128xf32>
    %78 = tpu.matmul %76, %77, %cst_39 {dimension_numbers = #tpu.dot_dimension_numbers<[1], [0], [0], [1], [0, 0, 1, 1], [], []>} : vector<1x128xbf16>, vector<128x128xbf16>, vector<1x128xf32> -> vector<1x128xf32>
    %79 = vector.extract_strided_slice %75 {offsets = [0, 0], sizes = [1, 128], strides = [1, 1]} : vector<1x256xf32> to vector<1x128xf32>
    %80 = arith.addf %79, %78 : vector<1x128xf32>
    %81 = arith.addf %80, %4 : vector<1x128xf32>
    %cst_40 = arith.constant dense<0xFF800000> : vector<1xf32>
    %82 = vector.multi_reduction <maximumf>, %81, %cst_40 [1] : vector<1x128xf32> to vector<1xf32>
    %83 = vector.shape_cast %82 : vector<1xf32> to vector<1x1xf32>
    %84 = vector.broadcast %83 : vector<1x1xf32> to vector<1x128xf32>
    %85 = arith.subf %81, %84 : vector<1x128xf32>
    %86 = math.exp %85 : vector<1x128xf32>
    %cst_41 = arith.constant dense<0.000000e+00> : vector<1xf32>
    %87 = vector.multi_reduction <add>, %86, %cst_41 [1] : vector<1x128xf32> to vector<1xf32>
    %88 = vector.shape_cast %87 : vector<1xf32> to vector<1x1xf32>
    %89 = vector.broadcast %88 : vector<1x1xf32> to vector<1x128xf32>
    %90 = arith.divf %86, %89 : vector<1x128xf32>
    %91 = arith.truncf %90 : vector<1x128xf32> to vector<1x128xbf16>
    %c0_42 = arith.constant 0 : index
    %c0_43 = arith.constant 0 : index
    %92 = vector.load %arg3[%c0_42, %c0_43] : memref<128x128xbf16, #tpu.memory_space<vmem>>, vector<128x128xbf16>
    %cst_44 = arith.constant dense<0.000000e+00> : vector<1x128xf32>
    %93 = tpu.matmul %91, %92, %cst_44 {dimension_numbers = #tpu.dot_dimension_numbers<[1], [0], [0], [1], [0, 0, 1, 1], [], []>} : vector<1x128xbf16>, vector<128x128xbf16>, vector<1x128xf32> -> vector<1x128xf32>
    %94 = vector.extract_strided_slice %75 {offsets = [0, 128], sizes = [1, 128], strides = [1, 1]} : vector<1x256xf32> to vector<1x128xf32>
    %95 = arith.addf %94, %93 : vector<1x128xf32>
    %96 = arith.addf %95, %5 : vector<1x128xf32>
    %cst_45 = arith.constant 0.000000e+00 : f32
    %97 = vector.broadcast %cst_45 : f32 to vector<1x128xf32>
    %98 = arith.maximumf %96, %97 : vector<1x128xf32>
    %99 = tpu.concatenate %98, %64 in 1 : vector<1x128xf32>, vector<1x128xf32> -> vector<1x256xf32>
    %100 = arith.truncf %99 : vector<1x256xf32> to vector<1x256xbf16>
    %c0_46 = arith.constant 0 : index
    %c0_47 = arith.constant 0 : index
    %101 = vector.load %arg9[%c0_46, %c0_47] : memref<256x512xbf16, #tpu.memory_space<vmem>>, vector<256x512xbf16>
    %cst_48 = arith.constant dense<0.000000e+00> : vector<1x512xf32>
    %102 = tpu.matmul %100, %101, %cst_48 {dimension_numbers = #tpu.dot_dimension_numbers<[1], [0], [0], [1], [0, 0, 1, 1], [], []>} : vector<1x256xbf16>, vector<256x512xbf16>, vector<1x512xf32> -> vector<1x512xf32>
    %103 = arith.addf %102, %6 : vector<1x512xf32>
    %104 = vector.extract_strided_slice %103 {offsets = [0, 0], sizes = [1, 128], strides = [1, 1]} : vector<1x512xf32> to vector<1x128xf32>
    %105 = arith.negf %104 : vector<1x128xf32>
    %106 = math.exp %105 : vector<1x128xf32>
    %cst_49 = arith.constant 1.000000e+00 : f32
    %107 = vector.broadcast %cst_49 : f32 to vector<1x128xf32>
    %108 = arith.addf %107, %106 : vector<1x128xf32>
    %109 = arith.divf %107, %108 : vector<1x128xf32>
    %110 = vector.extract_strided_slice %103 {offsets = [0, 128], sizes = [1, 128], strides = [1, 1]} : vector<1x512xf32> to vector<1x128xf32>
    %111 = arith.negf %110 : vector<1x128xf32>
    %112 = math.exp %111 : vector<1x128xf32>
    %cst_50 = arith.constant 1.000000e+00 : f32
    %113 = vector.broadcast %cst_50 : f32 to vector<1x128xf32>
    %114 = arith.addf %113, %112 : vector<1x128xf32>
    %115 = arith.divf %113, %114 : vector<1x128xf32>
    %116 = vector.extract_strided_slice %103 {offsets = [0, 256], sizes = [1, 128], strides = [1, 1]} : vector<1x512xf32> to vector<1x128xf32>
    %117 = vector.extract_strided_slice %103 {offsets = [0, 384], sizes = [1, 128], strides = [1, 1]} : vector<1x512xf32> to vector<1x128xf32>
    %118 = arith.mulf %109, %117 : vector<1x128xf32>
    %119 = arith.addf %116, %118 : vector<1x128xf32>
    %120 = math.tanh %119 : vector<1x128xf32>
    %cst_51 = arith.constant 1.000000e+00 : f32
    %121 = vector.broadcast %cst_51 : f32 to vector<1x128xf32>
    %122 = arith.subf %121, %115 : vector<1x128xf32>
    %123 = arith.mulf %122, %120 : vector<1x128xf32>
    %124 = arith.mulf %115, %64 : vector<1x128xf32>
    %125 = arith.addf %123, %124 : vector<1x128xf32>
    %126 = arith.index_cast %c1_i32 : i32 to index
    %c0_52 = arith.constant 0 : index
    %127 = vector.load %arg14[%126, %c0_52] : memref<8x128xf32, #tpu.memory_space<vmem>>, vector<1x128xf32>
    tpu.vector_store %arg14[%126, %c0_52], %125 {strides = array<i32>} : memref<8x128xf32, #tpu.memory_space<vmem>>, vector<1x128xf32>,
    %128 = arith.index_cast %c1_i32 : i32 to index
    %c0_53 = arith.constant 0 : index
    %129 = vector.load %arg15[%128, %c0_53] : memref<8x128xf32, #tpu.memory_space<vmem>>, vector<1x128xf32>
    tpu.vector_store %arg15[%128, %c0_53], %90 {strides = array<i32>} : memref<8x128xf32, #tpu.memory_space<vmem>>, vector<1x128xf32>,
    %c2_i32 = arith.constant 2 : i32
    %130 = arith.index_cast %c2_i32 : i32 to index
    %131 = memref.load %arg1[%130] : memref<6xi32, #tpu.memory_space<smem>>
    %132 = arith.index_cast %131 : i32 to index
    %c0_54 = arith.constant 0 : index
    %133 = vector.load %arg2[%132, %c0_54] : memref<64x128xf32, #tpu.memory_space<vmem>>, vector<1x128xf32>
    %134 = arith.truncf %133 : vector<1x128xf32> to vector<1x128xbf16>
    %c0_55 = arith.constant 0 : index
    %c0_56 = arith.constant 0 : index
    %135 = vector.load %arg5[%c0_55, %c0_56] : memref<128x256xbf16, #tpu.memory_space<vmem>>, vector<128x256xbf16>
    %cst_57 = arith.constant dense<0.000000e+00> : vector<1x256xf32>
    %136 = tpu.matmul %134, %135, %cst_57 {dimension_numbers = #tpu.dot_dimension_numbers<[1], [0], [0], [1], [0, 0, 1, 1], [], []>} : vector<1x128xbf16>, vector<128x256xbf16>, vector<1x256xf32> -> vector<1x256xf32>
    %137 = arith.truncf %125 : vector<1x128xf32> to vector<1x128xbf16>
    %c0_58 = arith.constant 0 : index
    %c0_59 = arith.constant 0 : index
    %138 = vector.load %arg6[%c0_58, %c0_59] : memref<128x128xbf16, #tpu.memory_space<vmem>>, vector<128x128xbf16>
    %cst_60 = arith.constant dense<0.000000e+00> : vector<1x128xf32>
    %139 = tpu.matmul %137, %138, %cst_60 {dimension_numbers = #tpu.dot_dimension_numbers<[1], [0], [0], [1], [0, 0, 1, 1], [], []>} : vector<1x128xbf16>, vector<128x128xbf16>, vector<1x128xf32> -> vector<1x128xf32>
    %140 = vector.extract_strided_slice %136 {offsets = [0, 0], sizes = [1, 128], strides = [1, 1]} : vector<1x256xf32> to vector<1x128xf32>
    %141 = arith.addf %140, %139 : vector<1x128xf32>
    %142 = arith.addf %141, %4 : vector<1x128xf32>
    %cst_61 = arith.constant dense<0xFF800000> : vector<1xf32>
    %143 = vector.multi_reduction <maximumf>, %142, %cst_61 [1] : vector<1x128xf32> to vector<1xf32>
    %144 = vector.shape_cast %143 : vector<1xf32> to vector<1x1xf32>
    %145 = vector.broadcast %144 : vector<1x1xf32> to vector<1x128xf32>
    %146 = arith.subf %142, %145 : vector<1x128xf32>
    %147 = math.exp %146 : vector<1x128xf32>
    %cst_62 = arith.constant dense<0.000000e+00> : vector<1xf32>
    %148 = vector.multi_reduction <add>, %147, %cst_62 [1] : vector<1x128xf32> to vector<1xf32>
    %149 = vector.shape_cast %148 : vector<1xf32> to vector<1x1xf32>
    %150 = vector.broadcast %149 : vector<1x1xf32> to vector<1x128xf32>
    %151 = arith.divf %147, %150 : vector<1x128xf32>
    %152 = arith.truncf %151 : vector<1x128xf32> to vector<1x128xbf16>
    %c0_63 = arith.constant 0 : index
    %c0_64 = arith.constant 0 : index
    %153 = vector.load %arg3[%c0_63, %c0_64] : memref<128x128xbf16, #tpu.memory_space<vmem>>, vector<128x128xbf16>
    %cst_65 = arith.constant dense<0.000000e+00> : vector<1x128xf32>
    %154 = tpu.matmul %152, %153, %cst_65 {dimension_numbers = #tpu.dot_dimension_numbers<[1], [0], [0], [1], [0, 0, 1, 1], [], []>} : vector<1x128xbf16>, vector<128x128xbf16>, vector<1x128xf32> -> vector<1x128xf32>
    %155 = vector.extract_strided_slice %136 {offsets = [0, 128], sizes = [1, 128], strides = [1, 1]} : vector<1x256xf32> to vector<1x128xf32>
    %156 = arith.addf %155, %154 : vector<1x128xf32>
    %157 = arith.addf %156, %5 : vector<1x128xf32>
    %cst_66 = arith.constant 0.000000e+00 : f32
    %158 = vector.broadcast %cst_66 : f32 to vector<1x128xf32>
    %159 = arith.maximumf %157, %158 : vector<1x128xf32>
    %160 = tpu.concatenate %159, %125 in 1 : vector<1x128xf32>, vector<1x128xf32> -> vector<1x256xf32>
    %161 = arith.truncf %160 : vector<1x256xf32> to vector<1x256xbf16>
    %c0_67 = arith.constant 0 : index
    %c0_68 = arith.constant 0 : index
    %162 = vector.load %arg9[%c0_67, %c0_68] : memref<256x512xbf16, #tpu.memory_space<vmem>>, vector<256x512xbf16>
    %cst_69 = arith.constant dense<0.000000e+00> : vector<1x512xf32>
    %163 = tpu.matmul %161, %162, %cst_69 {dimension_numbers = #tpu.dot_dimension_numbers<[1], [0], [0], [1], [0, 0, 1, 1], [], []>} : vector<1x256xbf16>, vector<256x512xbf16>, vector<1x512xf32> -> vector<1x512xf32>
    %164 = arith.addf %163, %6 : vector<1x512xf32>
    %165 = vector.extract_strided_slice %164 {offsets = [0, 0], sizes = [1, 128], strides = [1, 1]} : vector<1x512xf32> to vector<1x128xf32>
    %166 = arith.negf %165 : vector<1x128xf32>
    %167 = math.exp %166 : vector<1x128xf32>
    %cst_70 = arith.constant 1.000000e+00 : f32
    %168 = vector.broadcast %cst_70 : f32 to vector<1x128xf32>
    %169 = arith.addf %168, %167 : vector<1x128xf32>
    %170 = arith.divf %168, %169 : vector<1x128xf32>
    %171 = vector.extract_strided_slice %164 {offsets = [0, 128], sizes = [1, 128], strides = [1, 1]} : vector<1x512xf32> to vector<1x128xf32>
    %172 = arith.negf %171 : vector<1x128xf32>
    %173 = math.exp %172 : vector<1x128xf32>
    %cst_71 = arith.constant 1.000000e+00 : f32
    %174 = vector.broadcast %cst_71 : f32 to vector<1x128xf32>
    %175 = arith.addf %174, %173 : vector<1x128xf32>
    %176 = arith.divf %174, %175 : vector<1x128xf32>
    %177 = vector.extract_strided_slice %164 {offsets = [0, 256], sizes = [1, 128], strides = [1, 1]} : vector<1x512xf32> to vector<1x128xf32>
    %178 = vector.extract_strided_slice %164 {offsets = [0, 384], sizes = [1, 128], strides = [1, 1]} : vector<1x512xf32> to vector<1x128xf32>
    %179 = arith.mulf %170, %178 : vector<1x128xf32>
    %180 = arith.addf %177, %179 : vector<1x128xf32>
    %181 = math.tanh %180 : vector<1x128xf32>
    %cst_72 = arith.constant 1.000000e+00 : f32
    %182 = vector.broadcast %cst_72 : f32 to vector<1x128xf32>
    %183 = arith.subf %182, %176 : vector<1x128xf32>
    %184 = arith.mulf %183, %181 : vector<1x128xf32>
    %185 = arith.mulf %176, %125 : vector<1x128xf32>
    %186 = arith.addf %184, %185 : vector<1x128xf32>
    %187 = arith.index_cast %c2_i32 : i32 to index
    %c0_73 = arith.constant 0 : index
    %188 = vector.load %arg14[%187, %c0_73] : memref<8x128xf32, #tpu.memory_space<vmem>>, vector<1x128xf32>
    tpu.vector_store %arg14[%187, %c0_73], %186 {strides = array<i32>} : memref<8x128xf32, #tpu.memory_space<vmem>>, vector<1x128xf32>,
    %189 = arith.index_cast %c2_i32 : i32 to index
    %c0_74 = arith.constant 0 : index
    %190 = vector.load %arg15[%189, %c0_74] : memref<8x128xf32, #tpu.memory_space<vmem>>, vector<1x128xf32>
    tpu.vector_store %arg15[%189, %c0_74], %151 {strides = array<i32>} : memref<8x128xf32, #tpu.memory_space<vmem>>, vector<1x128xf32>,
    %c3_i32 = arith.constant 3 : i32
    %191 = arith.index_cast %c3_i32 : i32 to index
    %192 = memref.load %arg1[%191] : memref<6xi32, #tpu.memory_space<smem>>
    %193 = arith.index_cast %192 : i32 to index
    %c0_75 = arith.constant 0 : index
    %194 = vector.load %arg2[%193, %c0_75] : memref<64x128xf32, #tpu.memory_space<vmem>>, vector<1x128xf32>
    %195 = arith.truncf %194 : vector<1x128xf32> to vector<1x128xbf16>
    %c0_76 = arith.constant 0 : index
    %c0_77 = arith.constant 0 : index
    %196 = vector.load %arg5[%c0_76, %c0_77] : memref<128x256xbf16, #tpu.memory_space<vmem>>, vector<128x256xbf16>
    %cst_78 = arith.constant dense<0.000000e+00> : vector<1x256xf32>
    %197 = tpu.matmul %195, %196, %cst_78 {dimension_numbers = #tpu.dot_dimension_numbers<[1], [0], [0], [1], [0, 0, 1, 1], [], []>} : vector<1x128xbf16>, vector<128x256xbf16>, vector<1x256xf32> -> vector<1x256xf32>
    %198 = arith.truncf %186 : vector<1x128xf32> to vector<1x128xbf16>
    %c0_79 = arith.constant 0 : index
    %c0_80 = arith.constant 0 : index
    %199 = vector.load %arg6[%c0_79, %c0_80] : memref<128x128xbf16, #tpu.memory_space<vmem>>, vector<128x128xbf16>
    %cst_81 = arith.constant dense<0.000000e+00> : vector<1x128xf32>
    %200 = tpu.matmul %198, %199, %cst_81 {dimension_numbers = #tpu.dot_dimension_numbers<[1], [0], [0], [1], [0, 0, 1, 1], [], []>} : vector<1x128xbf16>, vector<128x128xbf16>, vector<1x128xf32> -> vector<1x128xf32>
    %201 = vector.extract_strided_slice %197 {offsets = [0, 0], sizes = [1, 128], strides = [1, 1]} : vector<1x256xf32> to vector<1x128xf32>
    %202 = arith.addf %201, %200 : vector<1x128xf32>
    %203 = arith.addf %202, %4 : vector<1x128xf32>
    %cst_82 = arith.constant dense<0xFF800000> : vector<1xf32>
    %204 = vector.multi_reduction <maximumf>, %203, %cst_82 [1] : vector<1x128xf32> to vector<1xf32>
    %205 = vector.shape_cast %204 : vector<1xf32> to vector<1x1xf32>
    %206 = vector.broadcast %205 : vector<1x1xf32> to vector<1x128xf32>
    %207 = arith.subf %203, %206 : vector<1x128xf32>
    %208 = math.exp %207 : vector<1x128xf32>
    %cst_83 = arith.constant dense<0.000000e+00> : vector<1xf32>
    %209 = vector.multi_reduction <add>, %208, %cst_83 [1] : vector<1x128xf32> to vector<1xf32>
    %210 = vector.shape_cast %209 : vector<1xf32> to vector<1x1xf32>
    %211 = vector.broadcast %210 : vector<1x1xf32> to vector<1x128xf32>
    %212 = arith.divf %208, %211 : vector<1x128xf32>
    %213 = arith.truncf %212 : vector<1x128xf32> to vector<1x128xbf16>
    %c0_84 = arith.constant 0 : index
    %c0_85 = arith.constant 0 : index
    %214 = vector.load %arg3[%c0_84, %c0_85] : memref<128x128xbf16, #tpu.memory_space<vmem>>, vector<128x128xbf16>
    %cst_86 = arith.constant dense<0.000000e+00> : vector<1x128xf32>
    %215 = tpu.matmul %213, %214, %cst_86 {dimension_numbers = #tpu.dot_dimension_numbers<[1], [0], [0], [1], [0, 0, 1, 1], [], []>} : vector<1x128xbf16>, vector<128x128xbf16>, vector<1x128xf32> -> vector<1x128xf32>
    %216 = vector.extract_strided_slice %197 {offsets = [0, 128], sizes = [1, 128], strides = [1, 1]} : vector<1x256xf32> to vector<1x128xf32>
    %217 = arith.addf %216, %215 : vector<1x128xf32>
    %218 = arith.addf %217, %5 : vector<1x128xf32>
    %cst_87 = arith.constant 0.000000e+00 : f32
    %219 = vector.broadcast %cst_87 : f32 to vector<1x128xf32>
    %220 = arith.maximumf %218, %219 : vector<1x128xf32>
    %221 = tpu.concatenate %220, %186 in 1 : vector<1x128xf32>, vector<1x128xf32> -> vector<1x256xf32>
    %222 = arith.truncf %221 : vector<1x256xf32> to vector<1x256xbf16>
    %c0_88 = arith.constant 0 : index
    %c0_89 = arith.constant 0 : index
    %223 = vector.load %arg9[%c0_88, %c0_89] : memref<256x512xbf16, #tpu.memory_space<vmem>>, vector<256x512xbf16>
    %cst_90 = arith.constant dense<0.000000e+00> : vector<1x512xf32>
    %224 = tpu.matmul %222, %223, %cst_90 {dimension_numbers = #tpu.dot_dimension_numbers<[1], [0], [0], [1], [0, 0, 1, 1], [], []>} : vector<1x256xbf16>, vector<256x512xbf16>, vector<1x512xf32> -> vector<1x512xf32>
    %225 = arith.addf %224, %6 : vector<1x512xf32>
    %226 = vector.extract_strided_slice %225 {offsets = [0, 0], sizes = [1, 128], strides = [1, 1]} : vector<1x512xf32> to vector<1x128xf32>
    %227 = arith.negf %226 : vector<1x128xf32>
    %228 = math.exp %227 : vector<1x128xf32>
    %cst_91 = arith.constant 1.000000e+00 : f32
    %229 = vector.broadcast %cst_91 : f32 to vector<1x128xf32>
    %230 = arith.addf %229, %228 : vector<1x128xf32>
    %231 = arith.divf %229, %230 : vector<1x128xf32>
    %232 = vector.extract_strided_slice %225 {offsets = [0, 128], sizes = [1, 128], strides = [1, 1]} : vector<1x512xf32> to vector<1x128xf32>
    %233 = arith.negf %232 : vector<1x128xf32>
    %234 = math.exp %233 : vector<1x128xf32>
    %cst_92 = arith.constant 1.000000e+00 : f32
    %235 = vector.broadcast %cst_92 : f32 to vector<1x128xf32>
    %236 = arith.addf %235, %234 : vector<1x128xf32>
    %237 = arith.divf %235, %236 : vector<1x128xf32>
    %238 = vector.extract_strided_slice %225 {offsets = [0, 256], sizes = [1, 128], strides = [1, 1]} : vector<1x512xf32> to vector<1x128xf32>
    %239 = vector.extract_strided_slice %225 {offsets = [0, 384], sizes = [1, 128], strides = [1, 1]} : vector<1x512xf32> to vector<1x128xf32>
    %240 = arith.mulf %231, %239 : vector<1x128xf32>
    %241 = arith.addf %238, %240 : vector<1x128xf32>
    %242 = math.tanh %241 : vector<1x128xf32>
    %cst_93 = arith.constant 1.000000e+00 : f32
    %243 = vector.broadcast %cst_93 : f32 to vector<1x128xf32>
    %244 = arith.subf %243, %237 : vector<1x128xf32>
    %245 = arith.mulf %244, %242 : vector<1x128xf32>
    %246 = arith.mulf %237, %186 : vector<1x128xf32>
    %247 = arith.addf %245, %246 : vector<1x128xf32>
    %248 = arith.index_cast %c3_i32 : i32 to index
    %c0_94 = arith.constant 0 : index
    %249 = vector.load %arg14[%248, %c0_94] : memref<8x128xf32, #tpu.memory_space<vmem>>, vector<1x128xf32>
    tpu.vector_store %arg14[%248, %c0_94], %247 {strides = array<i32>} : memref<8x128xf32, #tpu.memory_space<vmem>>, vector<1x128xf32>,
    %250 = arith.index_cast %c3_i32 : i32 to index
    %c0_95 = arith.constant 0 : index
    %251 = vector.load %arg15[%250, %c0_95] : memref<8x128xf32, #tpu.memory_space<vmem>>, vector<1x128xf32>
    tpu.vector_store %arg15[%250, %c0_95], %212 {strides = array<i32>} : memref<8x128xf32, #tpu.memory_space<vmem>>, vector<1x128xf32>,
    %c4_i32 = arith.constant 4 : i32
    %252 = arith.index_cast %c4_i32 : i32 to index
    %253 = memref.load %arg1[%252] : memref<6xi32, #tpu.memory_space<smem>>
    %254 = arith.index_cast %253 : i32 to index
    %c0_96 = arith.constant 0 : index
    %255 = vector.load %arg2[%254, %c0_96] : memref<64x128xf32, #tpu.memory_space<vmem>>, vector<1x128xf32>
    %256 = arith.truncf %255 : vector<1x128xf32> to vector<1x128xbf16>
    %c0_97 = arith.constant 0 : index
    %c0_98 = arith.constant 0 : index
    %257 = vector.load %arg5[%c0_97, %c0_98] : memref<128x256xbf16, #tpu.memory_space<vmem>>, vector<128x256xbf16>
    %cst_99 = arith.constant dense<0.000000e+00> : vector<1x256xf32>
    %258 = tpu.matmul %256, %257, %cst_99 {dimension_numbers = #tpu.dot_dimension_numbers<[1], [0], [0], [1], [0, 0, 1, 1], [], []>} : vector<1x128xbf16>, vector<128x256xbf16>, vector<1x256xf32> -> vector<1x256xf32>
    %259 = arith.truncf %247 : vector<1x128xf32> to vector<1x128xbf16>
    %c0_100 = arith.constant 0 : index
    %c0_101 = arith.constant 0 : index
    %260 = vector.load %arg6[%c0_100, %c0_101] : memref<128x128xbf16, #tpu.memory_space<vmem>>, vector<128x128xbf16>
    %cst_102 = arith.constant dense<0.000000e+00> : vector<1x128xf32>
    %261 = tpu.matmul %259, %260, %cst_102 {dimension_numbers = #tpu.dot_dimension_numbers<[1], [0], [0], [1], [0, 0, 1, 1], [], []>} : vector<1x128xbf16>, vector<128x128xbf16>, vector<1x128xf32> -> vector<1x128xf32>
    %262 = vector.extract_strided_slice %258 {offsets = [0, 0], sizes = [1, 128], strides = [1, 1]} : vector<1x256xf32> to vector<1x128xf32>
    %263 = arith.addf %262, %261 : vector<1x128xf32>
    %264 = arith.addf %263, %4 : vector<1x128xf32>
    %cst_103 = arith.constant dense<0xFF800000> : vector<1xf32>
    %265 = vector.multi_reduction <maximumf>, %264, %cst_103 [1] : vector<1x128xf32> to vector<1xf32>
    %266 = vector.shape_cast %265 : vector<1xf32> to vector<1x1xf32>
    %267 = vector.broadcast %266 : vector<1x1xf32> to vector<1x128xf32>
    %268 = arith.subf %264, %267 : vector<1x128xf32>
    %269 = math.exp %268 : vector<1x128xf32>
    %cst_104 = arith.constant dense<0.000000e+00> : vector<1xf32>
    %270 = vector.multi_reduction <add>, %269, %cst_104 [1] : vector<1x128xf32> to vector<1xf32>
    %271 = vector.shape_cast %270 : vector<1xf32> to vector<1x1xf32>
    %272 = vector.broadcast %271 : vector<1x1xf32> to vector<1x128xf32>
    %273 = arith.divf %269, %272 : vector<1x128xf32>
    %274 = arith.truncf %273 : vector<1x128xf32> to vector<1x128xbf16>
    %c0_105 = arith.constant 0 : index
    %c0_106 = arith.constant 0 : index
    %275 = vector.load %arg3[%c0_105, %c0_106] : memref<128x128xbf16, #tpu.memory_space<vmem>>, vector<128x128xbf16>
    %cst_107 = arith.constant dense<0.000000e+00> : vector<1x128xf32>
    %276 = tpu.matmul %274, %275, %cst_107 {dimension_numbers = #tpu.dot_dimension_numbers<[1], [0], [0], [1], [0, 0, 1, 1], [], []>} : vector<1x128xbf16>, vector<128x128xbf16>, vector<1x128xf32> -> vector<1x128xf32>
    %277 = vector.extract_strided_slice %258 {offsets = [0, 128], sizes = [1, 128], strides = [1, 1]} : vector<1x256xf32> to vector<1x128xf32>
    %278 = arith.addf %277, %276 : vector<1x128xf32>
    %279 = arith.addf %278, %5 : vector<1x128xf32>
    %cst_108 = arith.constant 0.000000e+00 : f32
    %280 = vector.broadcast %cst_108 : f32 to vector<1x128xf32>
    %281 = arith.maximumf %279, %280 : vector<1x128xf32>
    %282 = tpu.concatenate %281, %247 in 1 : vector<1x128xf32>, vector<1x128xf32> -> vector<1x256xf32>
    %283 = arith.truncf %282 : vector<1x256xf32> to vector<1x256xbf16>
    %c0_109 = arith.constant 0 : index
    %c0_110 = arith.constant 0 : index
    %284 = vector.load %arg9[%c0_109, %c0_110] : memref<256x512xbf16, #tpu.memory_space<vmem>>, vector<256x512xbf16>
    %cst_111 = arith.constant dense<0.000000e+00> : vector<1x512xf32>
    %285 = tpu.matmul %283, %284, %cst_111 {dimension_numbers = #tpu.dot_dimension_numbers<[1], [0], [0], [1], [0, 0, 1, 1], [], []>} : vector<1x256xbf16>, vector<256x512xbf16>, vector<1x512xf32> -> vector<1x512xf32>
    %286 = arith.addf %285, %6 : vector<1x512xf32>
    %287 = vector.extract_strided_slice %286 {offsets = [0, 0], sizes = [1, 128], strides = [1, 1]} : vector<1x512xf32> to vector<1x128xf32>
    %288 = arith.negf %287 : vector<1x128xf32>
    %289 = math.exp %288 : vector<1x128xf32>
    %cst_112 = arith.constant 1.000000e+00 : f32
    %290 = vector.broadcast %cst_112 : f32 to vector<1x128xf32>
    %291 = arith.addf %290, %289 : vector<1x128xf32>
    %292 = arith.divf %290, %291 : vector<1x128xf32>
    %293 = vector.extract_strided_slice %286 {offsets = [0, 128], sizes = [1, 128], strides = [1, 1]} : vector<1x512xf32> to vector<1x128xf32>
    %294 = arith.negf %293 : vector<1x128xf32>
    %295 = math.exp %294 : vector<1x128xf32>
    %cst_113 = arith.constant 1.000000e+00 : f32
    %296 = vector.broadcast %cst_113 : f32 to vector<1x128xf32>
    %297 = arith.addf %296, %295 : vector<1x128xf32>
    %298 = arith.divf %296, %297 : vector<1x128xf32>
    %299 = vector.extract_strided_slice %286 {offsets = [0, 256], sizes = [1, 128], strides = [1, 1]} : vector<1x512xf32> to vector<1x128xf32>
    %300 = vector.extract_strided_slice %286 {offsets = [0, 384], sizes = [1, 128], strides = [1, 1]} : vector<1x512xf32> to vector<1x128xf32>
    %301 = arith.mulf %292, %300 : vector<1x128xf32>
    %302 = arith.addf %299, %301 : vector<1x128xf32>
    %303 = math.tanh %302 : vector<1x128xf32>
    %cst_114 = arith.constant 1.000000e+00 : f32
    %304 = vector.broadcast %cst_114 : f32 to vector<1x128xf32>
    %305 = arith.subf %304, %298 : vector<1x128xf32>
    %306 = arith.mulf %305, %303 : vector<1x128xf32>
    %307 = arith.mulf %298, %247 : vector<1x128xf32>
    %308 = arith.addf %306, %307 : vector<1x128xf32>
    %309 = arith.index_cast %c4_i32 : i32 to index
    %c0_115 = arith.constant 0 : index
    %310 = vector.load %arg14[%309, %c0_115] : memref<8x128xf32, #tpu.memory_space<vmem>>, vector<1x128xf32>
    tpu.vector_store %arg14[%309, %c0_115], %308 {strides = array<i32>} : memref<8x128xf32, #tpu.memory_space<vmem>>, vector<1x128xf32>,
    %311 = arith.index_cast %c4_i32 : i32 to index
    %c0_116 = arith.constant 0 : index
    %312 = vector.load %arg15[%311, %c0_116] : memref<8x128xf32, #tpu.memory_space<vmem>>, vector<1x128xf32>
    tpu.vector_store %arg15[%311, %c0_116], %273 {strides = array<i32>} : memref<8x128xf32, #tpu.memory_space<vmem>>, vector<1x128xf32>,
    %c5_i32 = arith.constant 5 : i32
    %313 = arith.index_cast %c5_i32 : i32 to index
    %314 = memref.load %arg1[%313] : memref<6xi32, #tpu.memory_space<smem>>
    %315 = arith.index_cast %314 : i32 to index
    %c0_117 = arith.constant 0 : index
    %316 = vector.load %arg2[%315, %c0_117] : memref<64x128xf32, #tpu.memory_space<vmem>>, vector<1x128xf32>
    %317 = arith.truncf %316 : vector<1x128xf32> to vector<1x128xbf16>
    %c0_118 = arith.constant 0 : index
    %c0_119 = arith.constant 0 : index
    %318 = vector.load %arg5[%c0_118, %c0_119] : memref<128x256xbf16, #tpu.memory_space<vmem>>, vector<128x256xbf16>
    %cst_120 = arith.constant dense<0.000000e+00> : vector<1x256xf32>
    %319 = tpu.matmul %317, %318, %cst_120 {dimension_numbers = #tpu.dot_dimension_numbers<[1], [0], [0], [1], [0, 0, 1, 1], [], []>} : vector<1x128xbf16>, vector<128x256xbf16>, vector<1x256xf32> -> vector<1x256xf32>
    %320 = arith.truncf %308 : vector<1x128xf32> to vector<1x128xbf16>
    %c0_121 = arith.constant 0 : index
    %c0_122 = arith.constant 0 : index
    %321 = vector.load %arg6[%c0_121, %c0_122] : memref<128x128xbf16, #tpu.memory_space<vmem>>, vector<128x128xbf16>
    %cst_123 = arith.constant dense<0.000000e+00> : vector<1x128xf32>
    %322 = tpu.matmul %320, %321, %cst_123 {dimension_numbers = #tpu.dot_dimension_numbers<[1], [0], [0], [1], [0, 0, 1, 1], [], []>} : vector<1x128xbf16>, vector<128x128xbf16>, vector<1x128xf32> -> vector<1x128xf32>
    %323 = vector.extract_strided_slice %319 {offsets = [0, 0], sizes = [1, 128], strides = [1, 1]} : vector<1x256xf32> to vector<1x128xf32>
    %324 = arith.addf %323, %322 : vector<1x128xf32>
    %325 = arith.addf %324, %4 : vector<1x128xf32>
    %cst_124 = arith.constant dense<0xFF800000> : vector<1xf32>
    %326 = vector.multi_reduction <maximumf>, %325, %cst_124 [1] : vector<1x128xf32> to vector<1xf32>
    %327 = vector.shape_cast %326 : vector<1xf32> to vector<1x1xf32>
    %328 = vector.broadcast %327 : vector<1x1xf32> to vector<1x128xf32>
    %329 = arith.subf %325, %328 : vector<1x128xf32>
    %330 = math.exp %329 : vector<1x128xf32>
    %cst_125 = arith.constant dense<0.000000e+00> : vector<1xf32>
    %331 = vector.multi_reduction <add>, %330, %cst_125 [1] : vector<1x128xf32> to vector<1xf32>
    %332 = vector.shape_cast %331 : vector<1xf32> to vector<1x1xf32>
    %333 = vector.broadcast %332 : vector<1x1xf32> to vector<1x128xf32>
    %334 = arith.divf %330, %333 : vector<1x128xf32>
    %335 = arith.truncf %334 : vector<1x128xf32> to vector<1x128xbf16>
    %c0_126 = arith.constant 0 : index
    %c0_127 = arith.constant 0 : index
    %336 = vector.load %arg3[%c0_126, %c0_127] : memref<128x128xbf16, #tpu.memory_space<vmem>>, vector<128x128xbf16>
    %cst_128 = arith.constant dense<0.000000e+00> : vector<1x128xf32>
    %337 = tpu.matmul %335, %336, %cst_128 {dimension_numbers = #tpu.dot_dimension_numbers<[1], [0], [0], [1], [0, 0, 1, 1], [], []>} : vector<1x128xbf16>, vector<128x128xbf16>, vector<1x128xf32> -> vector<1x128xf32>
    %338 = vector.extract_strided_slice %319 {offsets = [0, 128], sizes = [1, 128], strides = [1, 1]} : vector<1x256xf32> to vector<1x128xf32>
    %339 = arith.addf %338, %337 : vector<1x128xf32>
    %340 = arith.addf %339, %5 : vector<1x128xf32>
    %cst_129 = arith.constant 0.000000e+00 : f32
    %341 = vector.broadcast %cst_129 : f32 to vector<1x128xf32>
    %342 = arith.maximumf %340, %341 : vector<1x128xf32>
    %343 = tpu.concatenate %342, %308 in 1 : vector<1x128xf32>, vector<1x128xf32> -> vector<1x256xf32>
    %344 = arith.truncf %343 : vector<1x256xf32> to vector<1x256xbf16>
    %c0_130 = arith.constant 0 : index
    %c0_131 = arith.constant 0 : index
    %345 = vector.load %arg9[%c0_130, %c0_131] : memref<256x512xbf16, #tpu.memory_space<vmem>>, vector<256x512xbf16>
    %cst_132 = arith.constant dense<0.000000e+00> : vector<1x512xf32>
    %346 = tpu.matmul %344, %345, %cst_132 {dimension_numbers = #tpu.dot_dimension_numbers<[1], [0], [0], [1], [0, 0, 1, 1], [], []>} : vector<1x256xbf16>, vector<256x512xbf16>, vector<1x512xf32> -> vector<1x512xf32>
    %347 = arith.addf %346, %6 : vector<1x512xf32>
    %348 = vector.extract_strided_slice %347 {offsets = [0, 0], sizes = [1, 128], strides = [1, 1]} : vector<1x512xf32> to vector<1x128xf32>
    %349 = arith.negf %348 : vector<1x128xf32>
    %350 = math.exp %349 : vector<1x128xf32>
    %cst_133 = arith.constant 1.000000e+00 : f32
    %351 = vector.broadcast %cst_133 : f32 to vector<1x128xf32>
    %352 = arith.addf %351, %350 : vector<1x128xf32>
    %353 = arith.divf %351, %352 : vector<1x128xf32>
    %354 = vector.extract_strided_slice %347 {offsets = [0, 128], sizes = [1, 128], strides = [1, 1]} : vector<1x512xf32> to vector<1x128xf32>
    %355 = arith.negf %354 : vector<1x128xf32>
    %356 = math.exp %355 : vector<1x128xf32>
    %cst_134 = arith.constant 1.000000e+00 : f32
    %357 = vector.broadcast %cst_134 : f32 to vector<1x128xf32>
    %358 = arith.addf %357, %356 : vector<1x128xf32>
    %359 = arith.divf %357, %358 : vector<1x128xf32>
    %360 = vector.extract_strided_slice %347 {offsets = [0, 256], sizes = [1, 128], strides = [1, 1]} : vector<1x512xf32> to vector<1x128xf32>
    %361 = vector.extract_strided_slice %347 {offsets = [0, 384], sizes = [1, 128], strides = [1, 1]} : vector<1x512xf32> to vector<1x128xf32>
    %362 = arith.mulf %353, %361 : vector<1x128xf32>
    %363 = arith.addf %360, %362 : vector<1x128xf32>
    %364 = math.tanh %363 : vector<1x128xf32>
    %cst_135 = arith.constant 1.000000e+00 : f32
    %365 = vector.broadcast %cst_135 : f32 to vector<1x128xf32>
    %366 = arith.subf %365, %359 : vector<1x128xf32>
    %367 = arith.mulf %366, %364 : vector<1x128xf32>
    %368 = arith.mulf %359, %308 : vector<1x128xf32>
    %369 = arith.addf %367, %368 : vector<1x128xf32>
    %370 = arith.index_cast %c5_i32 : i32 to index
    %c0_136 = arith.constant 0 : index
    %371 = vector.load %arg14[%370, %c0_136] : memref<8x128xf32, #tpu.memory_space<vmem>>, vector<1x128xf32>
    tpu.vector_store %arg14[%370, %c0_136], %369 {strides = array<i32>} : memref<8x128xf32, #tpu.memory_space<vmem>>, vector<1x128xf32>,
    %372 = arith.index_cast %c5_i32 : i32 to index
    %c0_137 = arith.constant 0 : index
    %373 = vector.load %arg15[%372, %c0_137] : memref<8x128xf32, #tpu.memory_space<vmem>>, vector<1x128xf32>
    tpu.vector_store %arg15[%372, %c0_137], %334 {strides = array<i32>} : memref<8x128xf32, #tpu.memory_space<vmem>>, vector<1x128xf32>,
    %c6_i32 = arith.constant 6 : i32
    %c0_138 = arith.constant 0 : index
    %c0_139 = arith.constant 0 : index
    %374 = vector.load %arg14[%c0_138, %c0_139] : memref<8x128xf32, #tpu.memory_space<vmem>>, vector<8x128xf32>
    %375 = arith.truncf %374 : vector<8x128xf32> to vector<8x128xbf16>
    %c0_140 = arith.constant 0 : index
    %c0_141 = arith.constant 0 : index
    %376 = vector.load %arg11[%c0_140, %c0_141] : memref<128x128xbf16, #tpu.memory_space<vmem>>, vector<128x128xbf16>
    %cst_142 = arith.constant dense<0.000000e+00> : vector<8x128xf32>
    %377 = tpu.matmul %375, %376, %cst_142 {dimension_numbers = #tpu.dot_dimension_numbers<[1], [0], [0], [1], [0, 0, 1, 1], [], []>} : vector<8x128xbf16>, vector<128x128xbf16>, vector<8x128xf32> -> vector<8x128xf32>
    %c0_143 = arith.constant 0 : index
    %c0_144 = arith.constant 0 : index
    %378 = vector.load %arg12[%c0_143, %c0_144] : memref<1x128xf32, #tpu.memory_space<vmem>>, vector<1x128xf32>
    %379 = vector.broadcast %378 : vector<1x128xf32> to vector<8x128xf32>
    %380 = arith.addf %377, %379 : vector<8x128xf32>
    %cst_145 = arith.constant dense<0xFF800000> : vector<8xf32>
    %381 = vector.multi_reduction <maximumf>, %380, %cst_145 [1] : vector<8x128xf32> to vector<8xf32>
    %382 = vector.shape_cast %381 : vector<8xf32> to vector<8x1xf32>
    %383 = vector.broadcast %382 : vector<8x1xf32> to vector<8x128xf32>
    %384 = arith.subf %380, %383 : vector<8x128xf32>
    %385 = math.exp %384 : vector<8x128xf32>
    %cst_146 = arith.constant dense<0.000000e+00> : vector<8xf32>
    %386 = vector.multi_reduction <add>, %385, %cst_146 [1] : vector<8x128xf32> to vector<8xf32>
    %387 = vector.shape_cast %386 : vector<8xf32> to vector<8x1xf32>
    %388 = math.log %387 : vector<8x1xf32>
    %389 = vector.broadcast %388 : vector<8x1xf32> to vector<8x128xf32>
    %390 = arith.subf %384, %389 : vector<8x128xf32>
    %c0_147 = arith.constant 0 : index
    %c0_148 = arith.constant 0 : index
    %391 = vector.load %arg13[%c0_147, %c0_148] : memref<8x128xf32, #tpu.memory_space<vmem>>, vector<8x128xf32>
    tpu.vector_store %arg13[%c0_147, %c0_148], %390 {strides = array<i32>} : memref<8x128xf32, #tpu.memory_space<vmem>>, vector<8x128xf32>,
    return
  }
  func.func @transform_0(%arg0: i32, %arg1: memref<6xi32, #tpu.memory_space<smem>>) -> (i32, i32) {
    %c0_i32 = arith.constant 0 : i32
    %c0_i32_0 = arith.constant 0 : i32
    %c0_i32_1 = arith.constant 0 : i32
    return %c0_i32, %c0_i32_0 : i32, i32
  }
  func.func @transform_1(%arg0: i32, %arg1: memref<6xi32, #tpu.memory_space<smem>>) -> (i32, i32) {
    %c0_i32 = arith.constant 0 : i32
    %c0_i32_0 = arith.constant 0 : i32
    %c0_i32_1 = arith.constant 0 : i32
    return %c0_i32, %c0_i32_0 : i32, i32
  }
  func.func @transform_2(%arg0: i32, %arg1: memref<6xi32, #tpu.memory_space<smem>>) -> (i32, i32) {
    %c0_i32 = arith.constant 0 : i32
    %c0_i32_0 = arith.constant 0 : i32
    %c0_i32_1 = arith.constant 0 : i32
    return %c0_i32, %c0_i32_0 : i32, i32
  }
  func.func @transform_3(%arg0: i32, %arg1: memref<6xi32, #tpu.memory_space<smem>>) -> (i32, i32) {
    %c0_i32 = arith.constant 0 : i32
    %c0_i32_0 = arith.constant 0 : i32
    %c0_i32_1 = arith.constant 0 : i32
    return %c0_i32, %c0_i32_0 : i32, i32
  }
  func.func @transform_4(%arg0: i32, %arg1: memref<6xi32, #tpu.memory_space<smem>>) -> (i32, i32) {
    %c0_i32 = arith.constant 0 : i32
    %c0_i32_0 = arith.constant 0 : i32
    %c0_i32_1 = arith.constant 0 : i32
    return %c0_i32, %c0_i32_0 : i32, i32
  }
  func.func @transform_5(%arg0: i32, %arg1: memref<6xi32, #tpu.memory_space<smem>>) -> (i32, i32) {
    %c0_i32 = arith.constant 0 : i32
    %c0_i32_0 = arith.constant 0 : i32
    %c0_i32_1 = arith.constant 0 : i32
    return %c0_i32, %c0_i32_0 : i32, i32
  }
  func.func @transform_6(%arg0: i32, %arg1: memref<6xi32, #tpu.memory_space<smem>>) -> (i32, i32) {
    %c0_i32 = arith.constant 0 : i32
    %c0_i32_0 = arith.constant 0 : i32
    %c0_i32_1 = arith.constant 0 : i32
    return %c0_i32, %c0_i32_0 : i32, i32
  }
  func.func @transform_7(%arg0: i32, %arg1: memref<6xi32, #tpu.memory_space<smem>>) -> (i32, i32) {
    %c0_i32 = arith.constant 0 : i32
    %c0_i32_0 = arith.constant 0 : i32
    %c0_i32_1 = arith.constant 0 : i32
    return %c0_i32, %c0_i32_0 : i32, i32
  }
  func.func @transform_8(%arg0: i32, %arg1: memref<6xi32, #tpu.memory_space<smem>>) -> (i32, i32) {
    %c0_i32 = arith.constant 0 : i32
    %c0_i32_0 = arith.constant 0 : i32
    %c0_i32_1 = arith.constant 0 : i32
    return %c0_i32, %c0_i32_0 : i32, i32
  }
  func.func @transform_9(%arg0: i32, %arg1: memref<6xi32, #tpu.memory_space<smem>>) -> (i32, i32) {
    %c0_i32 = arith.constant 0 : i32
    %c0_i32_0 = arith.constant 0 : i32
    %c0_i32_1 = arith.constant 0 : i32
    return %c0_i32, %c0_i32_0 : i32, i32
  }
  func.func @transform_10(%arg0: i32, %arg1: memref<6xi32, #tpu.memory_space<smem>>) -> (i32, i32) {
    %c0_i32 = arith.constant 0 : i32
    %c0_i32_0 = arith.constant 0 : i32
    %c0_i32_1 = arith.constant 0 : i32
    return %c0_i32, %c0_i32_0 : i32, i32
  }
  func.func @transform_11(%arg0: i32, %arg1: memref<6xi32, #tpu.memory_space<smem>>) -> (i32, i32) {
    %c0_i32 = arith.constant 0 : i32
    %c0_i32_0 = arith.constant 0 : i32
    %c0_i32_1 = arith.constant 0 : i32
    return %c0_i32, %c0_i32_0 : i32, i32
  }
  func.func @transform_12(%arg0: i32, %arg1: memref<6xi32, #tpu.memory_space<smem>>) -> (i32, i32) {
    %c0_i32 = arith.constant 0 : i32
    %c0_i32_0 = arith.constant 0 : i32
    %c0_i32_1 = arith.constant 0 : i32
    return %c0_i32, %c0_i32_0 : i32, i32
  }
  func.func @transform_13(%arg0: i32, %arg1: memref<6xi32, #tpu.memory_space<smem>>) -> (i32, i32) {
    %c0_i32 = arith.constant 0 : i32
    %c0_i32_0 = arith.constant 0 : i32
    %c0_i32_1 = arith.constant 0 : i32
    return %c0_i32, %c0_i32_0 : i32, i32
  }
}

</mosaic_0001>

<bundles_post_ra>
// kernel: attn_decoder_decode.1
= control target key start
LH: loop header
LB: loop body
LE: loop exit
PB: predicated region body
PF: predicated region fallthrough
CT: control target
= control target key end

     0   :  { %s9461_s0 = inlined_call_operand.vmem [shape: s32[6], index: 0, kind: input, shape index: {}]   ;;  %s9462_s1 = inlined_call_operand.vmem [shape: f32[64,128], index: 1, kind: input, shape index: {}]   ;;  %s9463_s2 = inlined_call_operand.vmem [shape: bf16[128,128], index: 2, kind: input, shape index: {}]   ;;  %s9464_s3 = inlined_call_operand.vmem [shape: f32[1,128], index: 3, kind: input, shape index: {}]   ;;  %s9465_s4 = inlined_call_operand.vmem [shape: bf16[128,256], index: 4, kind: input, shape index: {}]   ;;  %s9466_s5 = inlined_call_operand.vmem [shape: bf16[128,128], index: 5, kind: input, shape index: {}]   ;;  %s9467_s6 = inlined_call_operand.vmem [shape: f32[1,128], index: 6, kind: input, shape index: {}]   ;;  %s9468_s7 = inlined_call_operand.vmem [shape: f32[1,128], index: 7, kind: input, shape index: {}]   ;;  %s9469_s8 = inlined_call_operand.vmem [shape: bf16[256,512], index: 8, kind: input, shape index: {}]   ;;  %s9470_s9 = inlined_call_operand.vmem [shape: f32[1,512], index: 9, kind: input, shape index: {}]   ;;  %s9471_s10 = inlined_call_operand.vmem [shape: bf16[128,128], index: 10, kind: input, shape index: {}]   ;;  %s9472_s11 = inlined_call_operand.vmem [shape: f32[1,128], index: 11, kind: input, shape index: {}]   ;;  %s9473_s12 = inlined_call_operand.hbm [shape: f32[8,128], index: 12, kind: output, shape index: {0}]   ;;  %s9474_s13 = inlined_call_operand.hbm [shape: f32[8,128], index: 13, kind: output, shape index: {1}]   ;;  %s9475_s14 = inlined_call_operand.hbm [shape: f32[8,128], index: 14, kind: output, shape index: {2}]  }
   0x1   :  { %s20_s15 = sshll.u32 %s9461_s0, 4  ;;  %s21_s15 = int_to_ptr.vmem [resolvable:$true] %s20_s15 }
   0x2   :  { %s6940_s16 = scalar_lea.vmem %s21_s15, 16  ;;  %p6945_p1 = scmp.lt.s32.totalorder %s21_s15, %s21_s15 }
   0x3   :  { %p6941_p0 = scmp.ne.s32.totalorder %s21_s15, %s6940_s16  ;;  %p6946_p2 = scmp.lt.s32.totalorder %s6940_s16, %s6940_s16 }
   0x5   :  { %p6947_p3 = por %p6946_p2, %p6945_p1 }
   0x7   :  { %p6948_p4 = pnand %p6947_p3, %p6941_p0 }
   0x9   :  { %6951 = shalt.err (!%p6948_p4)  }
   0xa   :  { %s7024_s17 = smov [#allocation3]  }
   0xb   :  { %23 = dma.vmem_to_smem %s21_s15, 16, %s7024_s17, [#allocation2] }
   0xc   :  { %7018 = dma.done.wait [#allocation2], 16 }
   0xd   :  { %7019 = vsyncadd [#allocation2], 4294967280 }
   0xe   :  { %25 = sfence }
   0xf   :  { %26 = vsyncpa [#allocation5], 0  ;;  %v6366_v0 = vld [vmem:[%s9465_s4 + $0x4] ss:$8 sps:$4 sm:$0xff]   ;;  %v7025_v1 = vmov 0.0   ;;  %vm7026_vm0 = vmmov 0  }
  0x10   :  { %6099 = vmatprep.subr.bf16.mxu1 %v7025_v1  ;;  %51 = vst [vmem:[#allocation6] sm:$0xff] %v7025_v1  ;;  %52 = vst [vmem:[#allocation8] sm:$0xff] %v7025_v1  ;;  %v6368_v2 = vld [vmem:[%s9466_s5] sm:$0xff]   ;;  %6115 = vmatprep.mubr.msk.bf16.mxu1 %vm7026_vm0, %v7025_v1  ;;  %v9476_v4 = vmov 0   ;;  %v6370_v5 = vld [vmem:[%s9465_s4 + $0x14] ss:$8 sps:$4 sm:$0xff]  }
  0x11   :  { %157 = vmatprep.subr.bf16.mxu0 %v6366_v0  ;;  %v6369_v3 = vld [vmem:[%s9465_s4] ss:$8 sps:$4 sm:$0xff]   ;;  %189 = vmatprep.mubr.bf16.mxu0 %v9476_v4  ;;  %v6373_v7 = vld [vmem:[%s9465_s4 + $0x10] ss:$8 sps:$4 sm:$0xff]   ;;  %v6374_v8 = vld [vmem:[%s9465_s4 + $0x24] ss:$8 sps:$4 sm:$0xff]  }
  0x12   :  { %6100 = vmatpush3.bf16.msra.mxu1 %v6368_v2  ;;  %158 = vmatpush1.bf16.msra.mxu0 %v6369_v3  ;;  %v6372_v6 = vld [vmem:[%s9466_s5 + $0x8] sm:$0xff]   ;;  %v6376_v9 = vld [vmem:[%s9466_s5 + $0x10] sm:$0xff]   ;;  %v6380_v12 = vld [vmem:[%s9466_s5 + $0x18] sm:$0xff]   ;;  %s57_s26 = sld [smem:[#allocation3]] }
  0x13   :  { %6101 = vmatprep.subr.bf16.mxu1 %v7025_v1  ;;  %159 = vmatprep.subr.bf16.mxu0 %v6370_v5  ;;  %v6377_v10 = vld [vmem:[%s9465_s4 + $0x20] ss:$8 sps:$4 sm:$0xff]   ;;  %v6378_v11 = vld [vmem:[%s9465_s4 + $0x34] ss:$8 sps:$4 sm:$0xff]   ;;  %v6381_v13 = vld [vmem:[%s9465_s4 + $0x30] ss:$8 sps:$4 sm:$0xff]  }
  0x14   :  { %v6382_v14 = vld [vmem:[%s9465_s4 + $0x44] ss:$8 sps:$4 sm:$0xff]   ;;  %v6385_v16 = vld [vmem:[%s9465_s4 + $0x40] ss:$8 sps:$4 sm:$0xff]   ;;  %v6386_v17 = vld [vmem:[%s9465_s4 + $0x54] ss:$8 sps:$4 sm:$0xff]  }
  0x15   :  { %v6384_v15 = vld [vmem:[%s9466_s5 + $0x20] sm:$0xff]   ;;  %v6388_v18 = vld [vmem:[%s9466_s5 + $0x28] sm:$0xff]   ;;  %v6389_v19 = vld [vmem:[%s9465_s4 + $0x50] ss:$8 sps:$4 sm:$0xff]  }
  0x16   :  { %6102 = vmatpush3.bf16.msra.mxu1 %v6372_v6  ;;  %160 = vmatpush1.bf16.msra.mxu0 %v6373_v7  ;;  %v6390_v20 = vld [vmem:[%s9465_s4 + $0x64] ss:$8 sps:$4 sm:$0xff]   ;;  %v6392_v21 = vld [vmem:[%s9466_s5 + $0x30] sm:$0xff]   ;;  %v6393_v22 = vld [vmem:[%s9465_s4 + $0x60] ss:$8 sps:$4 sm:$0xff]  }
  0x17   :  { %6103 = vmatprep.subr.bf16.mxu1 %v7025_v1  ;;  %161 = vmatprep.subr.bf16.mxu0 %v6374_v8  ;;  %v6394_v23 = vld [vmem:[%s9465_s4 + $0x74] ss:$8 sps:$4 sm:$0xff]   ;;  %v56_v25 = vld [vmem:[%s9464_s3] sm:$0x1]  ;;  %v6397_v26 = vld [vmem:[%s9465_s4 + $0x70] ss:$8 sps:$4 sm:$0xff]  }
  0x18   :  { %s58_s15 = scalar_lea.vmem %s9462_s1, %s57_s26  ;;  %v6396_v24 = vld [vmem:[%s9466_s5 + $0x38] sm:$0xff]   ;;  %v7200_v28 = vpack.c.bf16 %v56_v25, %v56_v25 }
  0x19   :  { %v59_v27 = vld [vmem:[%s58_s15] sm:$0x1] }
  0x1a   :  { %6104 = vmatpush3.bf16.msra.mxu1 %v6376_v9  ;;  %162 = vmatpush1.bf16.msra.mxu0 %v6377_v10  ;;  %v60_v29 = vpack.c.bf16 %v59_v27, %v59_v27 }
  0x1b   :  { %6105 = vmatprep.subr.bf16.mxu1 %v7025_v1  ;;  %163 = vmatprep.subr.bf16.mxu0 %v6378_v11 }
  0x1e   :  { %6106 = vmatpush3.bf16.msra.mxu1 %v6380_v12  ;;  %164 = vmatpush1.bf16.msra.mxu0 %v6381_v13 }
  0x1f   :  { %6107 = vmatprep.subr.bf16.mxu1 %v7025_v1  ;;  %165 = vmatprep.subr.bf16.mxu0 %v6382_v14 }
  0x22   :  { %6108 = vmatpush3.bf16.msra.mxu1 %v6384_v15  ;;  %166 = vmatpush1.bf16.msra.mxu0 %v6385_v16 }
  0x23   :  { %6109 = vmatprep.subr.bf16.mxu1 %v7025_v1  ;;  %167 = vmatprep.subr.bf16.mxu0 %v6386_v17 }
  0x26   :  { %6110 = vmatpush3.bf16.msra.mxu1 %v6388_v18  ;;  %168 = vmatpush1.bf16.msra.mxu0 %v6389_v19 }
  0x27   :  { %6111 = vmatprep.subr.bf16.mxu1 %v7025_v1  ;;  %169 = vmatprep.subr.bf16.mxu0 %v6390_v20 }
  0x2a   :  { %6112 = vmatpush3.bf16.msra.mxu1 %v6392_v21  ;;  %170 = vmatpush1.bf16.msra.mxu0 %v6393_v22 }
  0x2b   :  { %6113 = vmatprep.subr.bf16.mxu1 %v7025_v1  ;;  %171 = vmatprep.subr.bf16.mxu0 %v6394_v23 }
  0x2e   :  { %6114 = vmatpush3.bf16.msra.mxu1 %v6396_v24  ;;  %172 = vmatpush1.bf16.msra.mxu0 %v6397_v26 }
  0x2f   :  { %6119 = vmatprep.subr.bf16.mxu0 %v7025_v1 }
  0x31   :  { %6116 = vmatmul.mubr.bf16.vlgmr.msra.gmra.mrb[0].mxu1 %v7200_v28  ;;  %190 = vmatmul.mubr.bf16.vlgmr.msra.gmra.mrb[0].mxu0 %v60_v29 }
  0x32   :  { %863 = vmatprep.mubr.bf16.mxu1 %v7200_v28  ;;  %6135 = vmatprep.mubr.msk.bf16.mxu0 %vm7026_vm0, %v7025_v1 }
  0x33   :  { %27 = vsyncpa [#allocation7], 0  ;;  %v7210_v33 = vld [vmem:[%s9467_s6] sm:$0x1]  ;;  %vm305_vm1 = vcmask 1040384   ;;  %v6399_v43 = vld [vmem:[%s9463_s2 + $0x8] sm:$0xff]  }
  0x34   :  { %v6398_v42 = vld [vmem:[%s9463_s2] sm:$0xff]   ;;  %v7222_v44 = vld [vmem:[#allocation6] sm:$0xff]  ;;  %v6400_v45 = vld [vmem:[%s9463_s2 + $0x10] sm:$0xff]   ;;  %s5478_s23 = sld [smem:[#allocation3 + $0x1]]  ;;  %s5577_s0 = sld [smem:[#allocation3 + $0x2]] }
  0x35   :  { %6120 = vmatpush3.bf16.msra.mxu0 %v6398_v42  ;;  %v6401_v46 = vld [vmem:[%s9463_s2 + $0x18] sm:$0xff]   ;;  %v6402_v52 = vld [vmem:[%s9463_s2 + $0x20] sm:$0xff]   ;;  %v6403_v53 = vld [vmem:[%s9463_s2 + $0x28] sm:$0xff]   ;;  %s5775_s25 = sld [smem:[#allocation3 + $0x4]]  ;;  %s7028_s28 = smov [#allocation6]  }
  0x36   :  { %6121 = vmatprep.subr.bf16.mxu0 %v7222_v44  ;;  %v6404_v54 = vld [vmem:[%s9463_s2 + $0x30] sm:$0xff]   ;;  %v6405_v55 = vld [vmem:[%s9463_s2 + $0x38] sm:$0xff]   ;;  %s5349_s29 = sshll.u32 %s7028_s28, 4  ;;  %s5350_s29 = int_to_ptr.vmem [resolvable:$true] %s5349_s29 }
  0x37   :  { %v7256_v56 = vld [vmem:[%s9469_s8] ss:$16 sps:$4 sm:$0xff]   ;;  %v7261_v57 = vld [vmem:[%s9469_s8 + $0x4] ss:$16 sps:$4 sm:$0xff]   ;;  %v7266_v58 = vld [vmem:[%s9469_s8 + $0xc] ss:$16 sps:$4 sm:$0xff]   ;;  %p6957_p6 = scmp.lt.s32.totalorder %s5350_s29, %s5350_s29 }
  0x38   :  { %v7271_v59 = vld [vmem:[%s9469_s8 + $0x24] ss:$16 sps:$4 sm:$0xff]   ;;  %831 = vmatprep.subr.bf16.mxu1 %v7261_v57  ;;  %v7279_v60 = vld [vmem:[%s9469_s8 + $0x20] ss:$16 sps:$4 sm:$0xff]   ;;  %v7431_v25 = vld [vmem:[%s9469_s8 + $0x8] ss:$16 sps:$4 sm:$0xff]  }
  0x39   :  { %6122 = vmatpush3.bf16.msra.mxu0 %v6399_v43  ;;  %832 = vmatpush1.bf16.msra.mxu1 %v7256_v56  ;;  %v7285_v61 = vld [vmem:[%s9469_s8 + $0x44] ss:$16 sps:$4 sm:$0xff]   ;;  %v7291_v62 = vld [vmem:[%s9469_s8 + $0x40] ss:$16 sps:$4 sm:$0xff]   ;;  %v7436_v27 = vld [vmem:[%s9469_s8 + $0x2c] ss:$16 sps:$4 sm:$0xff]  }
  0x3a   :  { %6123 = vmatprep.subr.bf16.mxu0 %v7222_v44  ;;  %833 = vmatprep.subr.bf16.mxu1 %v7271_v59  ;;  %v7297_v63 = vld [vmem:[%s9469_s8 + $0x64] ss:$16 sps:$4 sm:$0xff]   ;;  %v7303_v0 = vld [vmem:[%s9469_s8 + $0x60] ss:$16 sps:$4 sm:$0xff]   ;;  %v7442_v29 = vld [vmem:[%s9469_s8 + $0x28] ss:$16 sps:$4 sm:$0xff]   ;;  %s935_s15 = scalar_lea.vmem %s9462_s1, %s5478_s23  ;;  %s1790_s27 = scalar_lea.vmem %s9462_s1, %s5577_s0 }
  0x3b   :  { %v7309_v1 = vld [vmem:[%s9469_s8 + $0x84] ss:$16 sps:$4 sm:$0xff]   ;;  %v7315_v2 = vld [vmem:[%s9469_s8 + $0x80] ss:$16 sps:$4 sm:$0xff]   ;;  %v7515_v42 = vld [vmem:[%s9469_s8 + $0xe8] ss:$16 sps:$4 sm:$0xff]   ;;  %s3500_s19 = scalar_lea.vmem %s9462_s1, %s5775_s25 }
  0x3c   :  { %v7321_v3 = vld [vmem:[%s9469_s8 + $0xa4] ss:$16 sps:$4 sm:$0xff]   ;;  %v7327_v5 = vld [vmem:[%s9469_s8 + $0xa0] ss:$16 sps:$4 sm:$0xff]   ;;  %9576 = vst [vmem:[#allocation18_spill] sm:$0xff] %v7515_v42  ;;  %s6952_s30 = scalar_lea.vmem %s5350_s29, 128 }
  0x3d   :  { %6124 = vmatpush3.bf16.msra.mxu0 %v6400_v45  ;;  %834 = vmatpush1.bf16.msra.mxu1 %v7279_v60  ;;  %v7333_v6 = vld [vmem:[%s9469_s8 + $0xc4] ss:$16 sps:$4 sm:$0xff]   ;;  %v7339_v7 = vld [vmem:[%s9469_s8 + $0xc0] ss:$16 sps:$4 sm:$0xff]   ;;  %v7521_v43 = vld [vmem:[%s9469_s8 + $0x10c] ss:$16 sps:$4 sm:$0xff]   ;;  %p6953_p5 = scmp.ne.s32.totalorder %s5350_s29, %s6952_s30  ;;  %p6958_p7 = scmp.lt.s32.totalorder %s6952_s30, %s6952_s30 }
  0x3e   :  { %6125 = vmatprep.subr.bf16.mxu0 %v7222_v44  ;;  %835 = vmatprep.subr.bf16.mxu1 %v7285_v61  ;;  %v7345_v8 = vld [vmem:[%s9469_s8 + $0xe4] ss:$16 sps:$4 sm:$0xff]   ;;  %v7351_v9 = vld [vmem:[%s9469_s8 + $0xe0] ss:$16 sps:$4 sm:$0xff]   ;;  %9577 = vst [vmem:[#allocation19_spill] sm:$0xff] %v7521_v43 }
  0x3f   :  { %v7357_v10 = vld [vmem:[%s9469_s8 + $0x104] ss:$16 sps:$4 sm:$0xff]   ;;  %v7363_v11 = vld [vmem:[%s9469_s8 + $0x100] ss:$16 sps:$4 sm:$0xff]   ;;  %v7527_v45 = vld [vmem:[%s9469_s8 + $0x108] ss:$16 sps:$4 sm:$0xff]   ;;  %p6959_p8 = por %p6958_p7, %p6957_p6 }
  0x40   :  { %v7369_v12 = vld [vmem:[%s9469_s8 + $0x124] ss:$16 sps:$4 sm:$0xff]   ;;  %v7375_v13 = vld [vmem:[%s9469_s8 + $0x120] ss:$16 sps:$4 sm:$0xff]   ;;  %9578 = vst [vmem:[#allocation20_spill] sm:$0xff] %v7527_v45 }
  0x41   :  { %6126 = vmatpush3.bf16.msra.mxu0 %v6401_v46  ;;  %836 = vmatpush1.bf16.msra.mxu1 %v7291_v62  ;;  %v7381_v14 = vld [vmem:[%s9469_s8 + $0x144] ss:$16 sps:$4 sm:$0xff]   ;;  %v7387_v15 = vld [vmem:[%s9469_s8 + $0x140] ss:$16 sps:$4 sm:$0xff]   ;;  %v7533_v46 = vld [vmem:[%s9469_s8 + $0x12c] ss:$16 sps:$4 sm:$0xff]   ;;  %p6960_p9 = pnand %p6959_p8, %p6953_p5 }
  0x42   :  { %6127 = vmatprep.subr.bf16.mxu0 %v7222_v44  ;;  %837 = vmatprep.subr.bf16.mxu1 %v7297_v63  ;;  %v7393_v16 = vld [vmem:[%s9469_s8 + $0x164] ss:$16 sps:$4 sm:$0xff]   ;;  %v7399_v17 = vld [vmem:[%s9469_s8 + $0x160] ss:$16 sps:$4 sm:$0xff]   ;;  %9579 = vst [vmem:[#allocation21_spill] sm:$0xff] %v7533_v46 }
  0x43   :  { %v7405_v18 = vld [vmem:[%s9469_s8 + $0x184] ss:$16 sps:$4 sm:$0xff]   ;;  %v7411_v19 = vld [vmem:[%s9469_s8 + $0x180] ss:$16 sps:$4 sm:$0xff]  }
  0x44   :  { %v7417_v20 = vld [vmem:[%s9469_s8 + $0x1a4] ss:$16 sps:$4 sm:$0xff]   ;;  %v7423_v21 = vld [vmem:[%s9469_s8 + $0x1a0] ss:$16 sps:$4 sm:$0xff]  }
  0x45   :  { %6128 = vmatpush3.bf16.msra.mxu0 %v6402_v52  ;;  %838 = vmatpush1.bf16.msra.mxu1 %v7303_v0  ;;  %v7569_v52 = vld [vmem:[%s9469_s8 + $0x18c] ss:$16 sps:$4 sm:$0xff]   ;;  %v7618_v4 = vld [vmem:[%s9469_s8 + $0x1e4] ss:$16 sps:$4 sm:$0xff]  }
  0x46   :  { %6129 = vmatprep.subr.bf16.mxu0 %v7222_v44  ;;  %839 = vmatprep.subr.bf16.mxu1 %v7309_v1  ;;  %9585 = vst [vmem:[#allocation27_spill] sm:$0xff] %v7569_v52 }
  0x49   :  { %6130 = vmatpush3.bf16.msra.mxu0 %v6403_v53  ;;  %840 = vmatpush1.bf16.msra.mxu1 %v7315_v2  ;;  %v7575_v53 = vld [vmem:[%s9469_s8 + $0x188] ss:$16 sps:$4 sm:$0xff]  }
  0x4a   :  { %6131 = vmatprep.subr.bf16.mxu0 %v7222_v44  ;;  %841 = vmatprep.subr.bf16.mxu1 %v7321_v3  ;;  %9586 = vst [vmem:[#allocation28_spill] sm:$0xff] %v7575_v53 }
  0x4d   :  { %6132 = vmatpush3.bf16.msra.mxu0 %v6404_v54  ;;  %842 = vmatpush1.bf16.msra.mxu1 %v7327_v5  ;;  %v7581_v54 = vld [vmem:[%s9469_s8 + $0x1ac] ss:$16 sps:$4 sm:$0xff]  }
  0x4e   :  { %6133 = vmatprep.subr.bf16.mxu0 %v7222_v44  ;;  %843 = vmatprep.subr.bf16.mxu1 %v7333_v6  ;;  %9587 = vst [vmem:[#allocation29_spill] sm:$0xff] %v7581_v54 }
  0x51   :  { %6134 = vmatpush3.bf16.msra.mxu0 %v6405_v55  ;;  %844 = vmatpush1.bf16.msra.mxu1 %v7339_v7  ;;  %v7587_v55 = vld [vmem:[%s9469_s8 + $0x1a8] ss:$16 sps:$4 sm:$0xff]  }
  0x52   :  { %872 = vmatprep.subr.bf16.mxu0 %v7266_v58  ;;  %845 = vmatprep.subr.bf16.mxu1 %v7345_v8  ;;  %9588 = vst [vmem:[#allocation30_spill] sm:$0xff] %v7587_v55 }
  0x55   :  { %846 = vmatpush1.bf16.msra.mxu1 %v7351_v9 }
  0x56   :  { %847 = vmatprep.subr.bf16.mxu1 %v7357_v10 }
  0x59   :  { %848 = vmatpush1.bf16.msra.mxu1 %v7363_v11 }
  0x5a   :  { %849 = vmatprep.subr.bf16.mxu1 %v7369_v12 }
  0x5d   :  { %850 = vmatpush1.bf16.msra.mxu1 %v7375_v13 }
  0x5e   :  { %851 = vmatprep.subr.bf16.mxu1 %v7381_v14 }
  0x61   :  { %852 = vmatpush1.bf16.msra.mxu1 %v7387_v15 }
  0x62   :  { %853 = vmatprep.subr.bf16.mxu1 %v7393_v16 }
  0x65   :  { %854 = vmatpush1.bf16.msra.mxu1 %v7399_v17 }
  0x66   :  { %855 = vmatprep.subr.bf16.mxu1 %v7405_v18 }
  0x69   :  { %856 = vmatpush1.bf16.msra.mxu1 %v7411_v19 }
  0x6a   :  { %857 = vmatprep.subr.bf16.mxu1 %v7417_v20 }
  0x6d   :  { %858 = vmatpush1.bf16.msra.mxu1 %v7423_v21 }
 0x104   :  { %v297_v30 = vpop.f32.mrb[0].mxu1  ;;  %v191_v31 = vpop.f32.mrb[0].mxu0 }
 0x105   :  { %v6117_v32 = vpop.f32.mrb[1].mxu1  ;;  %v303_v34 = vadd.f32 %v297_v30, %v191_v31  ;;  %v7212_v35 = vpop.f32.mrb[1].mxu0  ;;  %v7449_v30 = vld [vmem:[%s9469_s8 + $0x4c] ss:$16 sps:$4 sm:$0xff]   ;;  %v7455_v31 = vld [vmem:[%s9469_s8 + $0x48] ss:$16 sps:$4 sm:$0xff]  }
 0x106   :  { %v300_v36 = vpop.f32.mrb[2].mxu1  ;;  %v195_v37 = vpop.f32.mrb[2].mxu0  ;;  %v7467_v32 = vld [vmem:[%s9469_s8 + $0x68] ss:$16 sps:$4 sm:$0xff]  }
 0x107   :  { %v6118_v38 = vpop.f32.mrb[3].mxu1  ;;  %v196_v39 = vpop.f32.mrb[3].mxu0  ;;  %v304_v40 = vadd.f32 %v303_v34, %v7210_v33  ;;  %v7473_v34 = vld [vmem:[%s9469_s8 + $0x8c] ss:$16 sps:$4 sm:$0xff]   ;;  %v7479_v36 = vld [vmem:[%s9469_s8 + $0x88] ss:$16 sps:$4 sm:$0xff]  }
 0x108   :  { %9570 = vst [vmem:[#allocation12_spill] sm:$0xff] %v7479_v36  ;;  %v7485_v37 = vld [vmem:[%s9469_s8 + $0xac] ss:$16 sps:$4 sm:$0xff]   ;;  %v7491_v38 = vld [vmem:[%s9469_s8 + $0xa8] ss:$16 sps:$4 sm:$0xff]  }
 0x109   :  { %v306_v41 = vsel %vm305_vm1, %v304_v40, -inf  ;;  %9571 = vst [vmem:[#allocation13_spill] sm:$0xff] %v7485_v37  ;;  %9572 = vst [vmem:[#allocation14_spill] sm:$0xff] %v7491_v38  ;;  %v7497_v39 = vld [vmem:[%s9469_s8 + $0xcc] ss:$16 sps:$4 sm:$0xff]  }
 0x10a   :  { %307 = vmax.xlane.f32.xlu0 %v306_v41  ;;  %9573 = vst [vmem:[#allocation15_spill] sm:$0xff] %v7497_v39  ;;  %v7509_v41 = vld [vmem:[%s9469_s8 + $0xec] ss:$16 sps:$4 sm:$0xff]  }
 0x10b   :  { %9575 = vst [vmem:[#allocation17_spill] sm:$0xff] %v7509_v41 }
 0x197   :  { %v308_v47 = vpop.xlane.xlu0 %307 }
 0x198   :  { %v309_v48 = vsub.f32 %v304_v40, %v308_v47  ;;  %v7503_v40 = vld [vmem:[%s9469_s8 + $0xc8] ss:$16 sps:$4 sm:$0xff]  }
 0x199   :  { %9574 = vst [vmem:[#allocation16_spill] sm:$0xff] %v7503_v40  ;;  %v7539_v47 = vld [vmem:[%s9469_s8 + $0x128] ss:$16 sps:$4 sm:$0xff]  }
 0x19a   :  { %v310_v49 = vmul.f32 1.442695, %v309_v48  ;;  %9580 = vst [vmem:[#allocation22_spill] sm:$0xff] %v7539_v47  ;;  %v7545_v48 = vld [vmem:[%s9469_s8 + $0x14c] ss:$16 sps:$4 sm:$0xff]  }
 0x19b   :  { %9581 = vst [vmem:[#allocation23_spill] sm:$0xff] %v7545_v48 }
 0x19c   :  { %6830 = vpow2.f32 %v310_v49  ;;  %v7551_v49 = vld [vmem:[%s9469_s8 + $0x148] ss:$16 sps:$4 sm:$0xff]  }
 0x19d   :  { %9582 = vst [vmem:[#allocation24_spill] sm:$0xff] %v7551_v49 }
 0x1a6   :  { %v7234_v50 = vpop.eup %6830 }
 0x1a7   :  { %v312_v51 = vsel %vm305_vm1, %v7234_v50, 0.0 }
 0x1a8   :  { %313 = vadd.xlane.f32.xlu0 %v312_v51  ;;  %v7563_v51 = vld [vmem:[%s9469_s8 + $0x168] ss:$16 sps:$4 sm:$0xff]  }
 0x1a9   :  { %9584 = vst [vmem:[#allocation26_spill] sm:$0xff] %v7563_v51 }
 0x235   :  { %v314_v22 = vpop.xlane.xlu0 %313 }
 0x236   :  { %6832 = vrcp.f32 %v314_v22  ;;  %v7594_v22 = vld [vmem:[%s9469_s8 + $0x1c4] ss:$16 sps:$4 sm:$0xff]  }
 0x237   :  { %859 = vmatprep.subr.bf16.mxu1 %v7594_v22 }
 0x240   :  { %v6833_v23 = vpop.eup %6832 }
 0x241   :  { %v316_v24 = vmul.f32 %v6833_v23, %v7234_v50  ;;  %v7557_v50 = vld [vmem:[%s9469_s8 + $0x16c] ss:$16 sps:$4 sm:$0xff]  }
 0x242   :  { %9583 = vst [vmem:[#allocation25_spill] sm:$0xff] %v7557_v50  ;;  %v7599_v23 = vld [vmem:[%s9469_s8 + $0x1cc] ss:$16 sps:$4 sm:$0xff]  }
 0x243   :  { %v317_v26 = vpack.c.bf16 %v316_v24, %v316_v24  ;;  %933 = vst [vmem:[#allocation8] sm:$0x1] %v316_v24  ;;  %9589 = vst [vmem:[#allocation31_spill] sm:$0xff] %v7599_v23  ;;  %v7604_v24 = vld [vmem:[%s9469_s8 + $0x1c0] ss:$16 sps:$4 sm:$0xff]  }
 0x244   :  { %860 = vmatpush1.bf16.msra.mxu1 %v7604_v24 }
 0x245   :  { %6136 = vmatmul.mubr.bf16.vlgmr.msra.gmra.mrb[4].mxu0 %v317_v26  ;;  %v7609_v26 = vld [vmem:[%s9469_s8 + $0x1c8] ss:$16 sps:$4 sm:$0xff]   ;;  %861 = vmatprep.subr.bf16.mxu1 %v7618_v4 }
 0x246   :  { %873 = vmatpush1.bf16.msra.mxu0 %v7431_v25  ;;  %904 = vmatprep.mubr.bf16.mxu0 %v7200_v28  ;;  %v7461_v28 = vld [vmem:[%s9469_s8 + $0x6c] ss:$16 sps:$4 sm:$0xff]   ;;  %9590 = vst [vmem:[#allocation32_spill] sm:$0xff] %v7609_v26 }
 0x247   :  { %874 = vmatprep.subr.bf16.mxu0 %v7436_v27 }
 0x24a   :  { %875 = vmatpush1.bf16.msra.mxu0 %v7442_v29 }
 0x24b   :  { %876 = vmatprep.subr.bf16.mxu0 %v7449_v30 }
 0x24e   :  { %877 = vmatpush1.bf16.msra.mxu0 %v7455_v31 }
 0x24f   :  { %878 = vmatprep.subr.bf16.mxu0 %v7461_v28 }
 0x252   :  { %879 = vmatpush1.bf16.msra.mxu0 %v7467_v32 }
 0x253   :  { %880 = vmatprep.subr.bf16.mxu0 %v7473_v34 }
 0x256   :  { %881 = vmatpush1.bf16.msra.mxu0 %v7479_v36 }
 0x257   :  { %882 = vmatprep.subr.bf16.mxu0 %v7485_v37 }
 0x25a   :  { %883 = vmatpush1.bf16.msra.mxu0 %v7491_v38 }
 0x25b   :  { %884 = vmatprep.subr.bf16.mxu0 %v7497_v39 }
 0x25e   :  { %885 = vmatpush1.bf16.msra.mxu0 %v7503_v40 }
 0x25f   :  { %886 = vmatprep.subr.bf16.mxu0 %v7509_v41 }
 0x262   :  { %887 = vmatpush1.bf16.msra.mxu0 %v7515_v42 }
 0x263   :  { %888 = vmatprep.subr.bf16.mxu0 %v7521_v43 }
 0x266   :  { %889 = vmatpush1.bf16.msra.mxu0 %v7527_v45 }
 0x267   :  { %890 = vmatprep.subr.bf16.mxu0 %v7533_v46  ;;  %v9594_v46 = vmov 0  }
 0x26a   :  { %891 = vmatpush1.bf16.msra.mxu0 %v7539_v47 }
 0x26b   :  { %892 = vmatprep.subr.bf16.mxu0 %v7545_v48 }
 0x26e   :  { %893 = vmatpush1.bf16.msra.mxu0 %v7551_v49 }
 0x26f   :  { %894 = vmatprep.subr.bf16.mxu0 %v7557_v50 }
 0x272   :  { %895 = vmatpush1.bf16.msra.mxu0 %v7563_v51 }
 0x273   :  { %896 = vmatprep.subr.bf16.mxu0 %v7569_v52 }
 0x276   :  { %897 = vmatpush1.bf16.msra.mxu0 %v7575_v53  ;;  %v7646_v53 = vld [vmem:[%s9468_s7] sm:$0x1] }
 0x277   :  { %898 = vmatprep.subr.bf16.mxu0 %v7581_v54  ;;  %v7628_v54 = vld [vmem:[%s9469_s8 + $0x1e0] ss:$16 sps:$4 sm:$0xff]   ;;  %9593 = vst [vmem:[#allocation35_spill] sm:$0xff] %v7646_v53 }
 0x278   :  { %862 = vmatpush1.bf16.msra.mxu1 %v7628_v54 }
 0x27a   :  { %899 = vmatpush1.bf16.msra.mxu0 %v7587_v55  ;;  %v7623_v55 = vld [vmem:[%s9469_s8 + $0x1ec] ss:$16 sps:$4 sm:$0xff]  }
 0x27b   :  { %900 = vmatprep.subr.bf16.mxu0 %v7599_v23  ;;  %9591 = vst [vmem:[#allocation33_spill] sm:$0xff] %v7623_v55  ;;  %v7633_v23 = vld [vmem:[%s9469_s8 + $0x1e8] ss:$16 sps:$4 sm:$0xff]  }
 0x27c   :  { %9592 = vst [vmem:[#allocation34_spill] sm:$0xff] %v7633_v23 }
 0x27e   :  { %901 = vmatpush1.bf16.msra.mxu0 %v7609_v26  ;;  %v6919_v26 = vld [vmem:[%s9465_s4 + $0x4] ss:$8 sps:$4 sm:$0xff]  }
 0x27f   :  { %902 = vmatprep.subr.bf16.mxu0 %v7623_v55  ;;  %1034 = vmatprep.subr.bf16.mxu1 %v6919_v26  ;;  %v6920_v26 = vld [vmem:[%s9465_s4] ss:$8 sps:$4 sm:$0xff]  }
 0x282   :  { %903 = vmatpush1.bf16.msra.mxu0 %v7633_v23 }
 0x283   :  { %6139 = vmatprep.subr.bf16.mxu0 %v7222_v44 }
 0x318   :  { %v416_v52 = vpop.f32.mrb[4].mxu0 }
 0x319   :  { %v422_v51 = vadd.f32 %v416_v52, %v7212_v35  ;;  %v6137_v55 = vpop.f32.mrb[5].mxu0  ;;  %v6921_v35 = vld [vmem:[%s9465_s4 + $0x14] ss:$8 sps:$4 sm:$0xff]   ;;  %v6927_v52 = vld [vmem:[%s9465_s4 + $0x44] ss:$8 sps:$4 sm:$0xff]  }
 0x31a   :  { %v419_v50 = vpop.f32.mrb[6].mxu0  ;;  %v6928_v55 = vld [vmem:[%s9465_s4 + $0x40] ss:$8 sps:$4 sm:$0xff]  }
 0x31b   :  { %v423_v49 = vadd.f32 %v422_v51, %v7646_v53  ;;  %v6138_v23 = vpop.f32.mrb[7].mxu0  ;;  %v6925_v50 = vld [vmem:[%s9465_s4 + $0x34] ss:$8 sps:$4 sm:$0xff]   ;;  %v6926_v51 = vld [vmem:[%s9465_s4 + $0x30] ss:$8 sps:$4 sm:$0xff]  }
 0x31c   :  { %v6929_v23 = vld [vmem:[%s9465_s4 + $0x54] ss:$8 sps:$4 sm:$0xff]  }
 0x31d   :  { %v424_v48 = vmax.f32 %v423_v49, 0.0  ;;  %v6924_v49 = vld [vmem:[%s9465_s4 + $0x20] ss:$8 sps:$4 sm:$0xff]  }
 0x31f   :  { %v425_v47 = vpack.c.bf16 %v424_v48, %v424_v48  ;;  %v6922_v48 = vld [vmem:[%s9465_s4 + $0x10] ss:$8 sps:$4 sm:$0xff]  }
 0x321   :  { %864 = vmatmul.mubr.bf16.vlgmr.msra.gmra.mrb[4].mxu1 %v425_v47  ;;  %905 = vmatmul.mubr.bf16.vlgmr.msra.gmra.mrb[8].mxu0 %v425_v47  ;;  %v6923_v47 = vld [vmem:[%s9465_s4 + $0x24] ss:$8 sps:$4 sm:$0xff]  }
 0x322   :  { %1035 = vmatpush1.bf16.msra.mxu1 %v6920_v26  ;;  %1066 = vmatprep.mubr.bf16.mxu1 %v9594_v46  ;;  %v6930_v26 = vld [vmem:[%s9465_s4 + $0x50] ss:$8 sps:$4 sm:$0xff]  }
 0x323   :  { %1036 = vmatprep.subr.bf16.mxu1 %v6921_v35  ;;  %6155 = vmatprep.mubr.msk.bf16.mxu0 %vm7026_vm0, %v7222_v44  ;;  %v6931_v35 = vld [vmem:[%s9465_s4 + $0x64] ss:$8 sps:$4 sm:$0xff]  }
 0x326   :  { %1037 = vmatpush1.bf16.msra.mxu1 %v6922_v48  ;;  %v6932_v48 = vld [vmem:[%s9465_s4 + $0x60] ss:$8 sps:$4 sm:$0xff]  }
 0x327   :  { %1038 = vmatprep.subr.bf16.mxu1 %v6923_v47  ;;  %v6933_v47 = vld [vmem:[%s9465_s4 + $0x74] ss:$8 sps:$4 sm:$0xff]  }
 0x32a   :  { %1039 = vmatpush1.bf16.msra.mxu1 %v6924_v49  ;;  %v6934_v49 = vld [vmem:[%s9465_s4 + $0x70] ss:$8 sps:$4 sm:$0xff]  }
 0x32b   :  { %1040 = vmatprep.subr.bf16.mxu1 %v6925_v50  ;;  %v6502_v50 = vld [vmem:[%s9466_s5] sm:$0xff]  }
 0x32c   :  { %6140 = vmatpush3.bf16.msra.mxu0 %v6502_v50  ;;  %v811_v50 = vlaneseq }
 0x32d   :  { %6141 = vmatprep.subr.bf16.mxu0 %v7222_v44 }
 0x32e   :  { %1041 = vmatpush1.bf16.msra.mxu1 %v6926_v51  ;;  %v6503_v51 = vld [vmem:[%s9466_s5 + $0x8] sm:$0xff]  }
 0x32f   :  { %1042 = vmatprep.subr.bf16.mxu1 %v6927_v52  ;;  %v6504_v52 = vld [vmem:[%s9466_s5 + $0x10] sm:$0xff]  }
 0x330   :  { %6142 = vmatpush3.bf16.msra.mxu0 %v6503_v51  ;;  %v812_v51 = vshrl.u32 %v811_v50, 7 }
 0x331   :  { %6143 = vmatprep.subr.bf16.mxu0 %v7222_v44 }
 0x332   :  { %1043 = vmatpush1.bf16.msra.mxu1 %v6928_v55  ;;  %v6505_v55 = vld [vmem:[%s9466_s5 + $0x18] sm:$0xff]   ;;  %v825_v38 = vsub.s32 3, %v812_v51 }
 0x333   :  { %1044 = vmatprep.subr.bf16.mxu1 %v6929_v23  ;;  %v6506_v23 = vld [vmem:[%s9466_s5 + $0x20] sm:$0xff]  }
 0x334   :  { %6144 = vmatpush3.bf16.msra.mxu0 %v6504_v52  ;;  %v813_v52 = vsub.s32 0, %v812_v51 }
 0x335   :  { %6145 = vmatprep.subr.bf16.mxu0 %v7222_v44 }
 0x336   :  { %1045 = vmatpush1.bf16.msra.mxu1 %v6930_v26  ;;  %v6507_v26 = vld [vmem:[%s9466_s5 + $0x28] sm:$0xff]  }
 0x337   :  { %1046 = vmatprep.subr.bf16.mxu1 %v6931_v35  ;;  %v6508_v35 = vld [vmem:[%s9466_s5 + $0x30] sm:$0xff]  }
 0x338   :  { %6146 = vmatpush3.bf16.msra.mxu0 %v6505_v55  ;;  %v55_v55 = vld [vmem:[%s9470_s9] sm:$0xf]  ;;  %s5676_s9 = sld [smem:[#allocation3 + $0x3]] }
 0x339   :  { %6147 = vmatprep.subr.bf16.mxu0 %v7222_v44  ;;  %v7745_v36 = vrot.slane %v55_v55, %v825_v38  ;;  %v6935_v38 = vld [vmem:[%s9464_s3] sm:$0x1] }
 0x33a   :  { %1047 = vmatpush1.bf16.msra.mxu1 %v6932_v48  ;;  %v936_v48 = vld [vmem:[%s935_s15] sm:$0x1]  ;;  %s5874_s15 = sld [smem:[#allocation3 + $0x5]] }
 0x33b   :  { %1048 = vmatprep.subr.bf16.mxu1 %v6933_v47  ;;  %v937_v47 = vpack.c.bf16 %v936_v48, %v936_v48 }
 0x33c   :  { %6148 = vmatpush3.bf16.msra.mxu0 %v6506_v23  ;;  %v817_v23 = vsub.s32 1, %v812_v51 }
 0x33d   :  { %6149 = vmatprep.subr.bf16.mxu0 %v7222_v44 }
 0x33e   :  { %1049 = vmatpush1.bf16.msra.mxu1 %v6934_v49  ;;  %v6509_v49 = vld [vmem:[%s9466_s5 + $0x38] sm:$0xff]   ;;  %s2645_s23 = scalar_lea.vmem %s9462_s1, %s5676_s9 }
 0x33f   :  { %6159 = vmatprep.subr.bf16.mxu1 %v7222_v44 }
 0x340   :  { %6150 = vmatpush3.bf16.msra.mxu0 %v6507_v26  ;;  %v7739_v26 = vrot.slane %v55_v55, %v813_v52 }
 0x341   :  { %6151 = vmatprep.subr.bf16.mxu0 %v7222_v44  ;;  %1067 = vmatmul.mubr.bf16.vlgmr.msra.gmra.mrb[8].mxu1 %v937_v47  ;;  %v7741_v47 = vrot.slane %v55_v55, %v817_v23  ;;  %v821_v23 = vsub.s32 2, %v812_v51 }
 0x342   :  { %6175 = vmatprep.mubr.msk.bf16.mxu1 %vm7026_vm0, %v7222_v44 }
 0x344   :  { %6152 = vmatpush3.bf16.msra.mxu0 %v6508_v35 }
 0x345   :  { %6153 = vmatprep.subr.bf16.mxu0 %v7222_v44 }
 0x348   :  { %6154 = vmatpush3.bf16.msra.mxu0 %v6509_v49 }
 0x349   :  { %1686 = vmatprep.subr.bf16.mxu0 %v7261_v57 }
 0x3f4   :  { %v865_v35 = vpop.f32.mrb[4].mxu1  ;;  %v906_v48 = vpop.f32.mrb[8].mxu0 }
 0x3f5   :  { %v866_v46 = vadd.f32 %v865_v35, %v7739_v26  ;;  %v867_v53 = vpop.f32.mrb[5].mxu1  ;;  %v908_v49 = vpop.f32.mrb[9].mxu0  ;;  %v7747_v35 = vrot.slane %v55_v55, %v821_v23  ;;  %v9611_v23 = vld [vmem:[#allocation28_spill] sm:$0xff] }
 0x3f6   :  { %v869_v45 = vpop.f32.mrb[6].mxu1  ;;  %v910_v57 = vpop.f32.mrb[10].mxu0  ;;  %v868_v41 = vadd.f32 %v867_v53, %v7741_v47 }
 0x3f7   :  { %v5476_v43 = vmul.f32 -1.442695, %v866_v46  ;;  %v870_v50 = vpop.f32.mrb[7].mxu1  ;;  %v911_v42 = vpop.f32.mrb[11].mxu0  ;;  %v909_v46 = vadd.f32 %v908_v49, %v7745_v36  ;;  %v9609_v49 = vld [vmem:[#allocation26_spill] sm:$0xff] }
 0x3f8   :  { %v5477_v40 = vmul.f32 -1.442695, %v868_v41  ;;  %v907_v42 = vadd.f32 %v906_v48, %v7747_v35  ;;  %v9608_v48 = vld [vmem:[#allocation25_spill] sm:$0xff] }
 0x3f9   :  { %6834 = vpow2.f32 %v5476_v43 }
 0x3fa   :  { %6836 = vpow2.f32 %v5477_v40 }
 0x403   :  { %v6835_v52 = vpop.eup %6834 }
 0x404   :  { %v916_v39 = vadd.f32 1.0, %v6835_v52  ;;  %v6837_v37 = vpop.eup %6836  ;;  %v9610_v52 = vld [vmem:[#allocation27_spill] sm:$0xff] }
 0x405   :  { %v922_v45 = vadd.f32 1.0, %v6837_v37 }
 0x406   :  { %6838 = vrcp.f32 %v916_v39 }
 0x407   :  { %6840 = vrcp.f32 %v922_v45  ;;  %v9612_v45 = vld [vmem:[#allocation29_spill] sm:$0xff] }
 0x410   :  { %v6839_v57 = vpop.eup %6838 }
 0x411   :  { %v925_v43 = vmul.f32 %v6839_v57, %v909_v46  ;;  %v6841_v40 = vpop.eup %6840  ;;  %v9613_v46 = vld [vmem:[#allocation30_spill] sm:$0xff]  ;;  %v9614_v57 = vld [vmem:[#allocation31_spill] sm:$0xff] }
 0x412   :  { %v928_v53 = vsub.f32 1.0, %v6841_v40  ;;  %v930_v51 = vmul.f32 %v6935_v38, %v6841_v40  ;;  %v9618_v38 = vld [vmem:[#allocation35_spill] sm:$0xff] }
 0x413   :  { %v926_v41 = vadd.f32 %v925_v43, %v907_v42  ;;  %v9615_v42 = vld [vmem:[#allocation32_spill] sm:$0xff]  ;;  %v9616_v43 = vld [vmem:[#allocation33_spill] sm:$0xff] }
 0x415   :  { %6842 = vtanh.f32 %v926_v41  ;;  %v9617_v41 = vld [vmem:[#allocation34_spill] sm:$0xff] }
 0x41f   :  { %v6843_v39 = vpop.eup %6842 }
 0x420   :  { %v929_v50 = vmul.f32 %v6843_v39, %v928_v53 }
 0x422   :  { %v7754_v55 = vadd.f32 %v930_v51, %v929_v50 }
 0x424   :  { %932 = vst [vmem:[#allocation6] sm:$0x1] %v7754_v55  ;;  %v7759_v37 = vpack.c.bf16 %v7754_v55, %v7754_v55 }
 0x426   :  { %6156 = vmatmul.mubr.bf16.vlgmr.msra.gmra.mrb[12].mxu0 %v7759_v37 }
 0x427   :  { %1718 = vmatprep.mubr.bf16.mxu0 %v7759_v37  ;;  %1687 = vmatpush1.bf16.msra.mxu0 %v7256_v56  ;;  %v1068_v56 = vpop.f32.mrb[8].mxu1 }
 0x428   :  { %1688 = vmatprep.subr.bf16.mxu0 %v7271_v59  ;;  %v7794_v59 = vpop.f32.mrb[9].mxu1 }
 0x42b   :  { %1689 = vmatpush1.bf16.msra.mxu0 %v7279_v60  ;;  %v1072_v60 = vpop.f32.mrb[10].mxu1 }
 0x42c   :  { %1690 = vmatprep.subr.bf16.mxu0 %v7285_v61  ;;  %v1073_v61 = vpop.f32.mrb[11].mxu1 }
 0x42d   :  { %v9619_v61 = vmov 0  }
 0x42f   :  { %1691 = vmatpush1.bf16.msra.mxu0 %v7291_v62 }
 0x430   :  { %1692 = vmatprep.subr.bf16.mxu0 %v7297_v63 }
 0x433   :  { %1693 = vmatpush1.bf16.msra.mxu0 %v7303_v0 }
 0x434   :  { %1694 = vmatprep.subr.bf16.mxu0 %v7309_v1 }
 0x437   :  { %1695 = vmatpush1.bf16.msra.mxu0 %v7315_v2 }
 0x438   :  { %1696 = vmatprep.subr.bf16.mxu0 %v7321_v3 }
 0x43b   :  { %1697 = vmatpush1.bf16.msra.mxu0 %v7327_v5 }
 0x43c   :  { %1698 = vmatprep.subr.bf16.mxu0 %v7333_v6  ;;  %v6511_v6 = vld [vmem:[%s9463_s2 + $0x8] sm:$0xff]  }
 0x43f   :  { %1699 = vmatpush1.bf16.msra.mxu0 %v7339_v7  ;;  %v6512_v7 = vld [vmem:[%s9463_s2 + $0x10] sm:$0xff]  }
 0x440   :  { %1700 = vmatprep.subr.bf16.mxu0 %v7345_v8 }
 0x443   :  { %1701 = vmatpush1.bf16.msra.mxu0 %v7351_v9 }
 0x444   :  { %1702 = vmatprep.subr.bf16.mxu0 %v7357_v10 }
 0x447   :  { %1703 = vmatpush1.bf16.msra.mxu0 %v7363_v11 }
 0x448   :  { %1704 = vmatprep.subr.bf16.mxu0 %v7369_v12 }
 0x44b   :  { %1705 = vmatpush1.bf16.msra.mxu0 %v7375_v13  ;;  %v6514_v13 = vld [vmem:[%s9463_s2 + $0x20] sm:$0xff]  }
 0x44c   :  { %1706 = vmatprep.subr.bf16.mxu0 %v7381_v14  ;;  %v6515_v14 = vld [vmem:[%s9463_s2 + $0x28] sm:$0xff]  }
 0x44f   :  { %1707 = vmatpush1.bf16.msra.mxu0 %v7387_v15  ;;  %v6516_v15 = vld [vmem:[%s9463_s2 + $0x30] sm:$0xff]  }
 0x450   :  { %1708 = vmatprep.subr.bf16.mxu0 %v7393_v16  ;;  %v6517_v16 = vld [vmem:[%s9463_s2 + $0x38] sm:$0xff]  }
 0x453   :  { %1709 = vmatpush1.bf16.msra.mxu0 %v7399_v17 }
 0x454   :  { %1710 = vmatprep.subr.bf16.mxu0 %v7405_v18 }
 0x457   :  { %1711 = vmatpush1.bf16.msra.mxu0 %v7411_v19 }
 0x458   :  { %1712 = vmatprep.subr.bf16.mxu0 %v7417_v20 }
 0x45b   :  { %1713 = vmatpush1.bf16.msra.mxu0 %v7423_v21  ;;  %v9596_v21 = vld [vmem:[#allocation13_spill] sm:$0xff] }
 0x45c   :  { %1714 = vmatprep.subr.bf16.mxu0 %v7594_v22  ;;  %v9606_v22 = vld [vmem:[#allocation23_spill] sm:$0xff] }
 0x45f   :  { %1715 = vmatpush1.bf16.msra.mxu0 %v7604_v24  ;;  %v9607_v24 = vld [vmem:[#allocation24_spill] sm:$0xff] }
 0x460   :  { %1716 = vmatprep.subr.bf16.mxu0 %v7618_v4  ;;  %v6510_v4 = vld [vmem:[%s9463_s2] sm:$0xff]  }
 0x461   :  { %6160 = vmatpush3.bf16.msra.mxu1 %v6510_v4  ;;  %v7916_v4 = vld [vmem:[%s9465_s4 + $0x34] ss:$8 sps:$4 sm:$0xff]  }
 0x462   :  { %6161 = vmatprep.subr.bf16.mxu1 %v7222_v44 }
 0x463   :  { %1717 = vmatpush1.bf16.msra.mxu0 %v7628_v54  ;;  %v9597_v54 = vld [vmem:[#allocation14_spill] sm:$0xff] }
 0x465   :  { %6162 = vmatpush3.bf16.msra.mxu1 %v6511_v6  ;;  %v6532_v6 = vld [vmem:[%s9466_s5 + $0x10] sm:$0xff]  }
 0x466   :  { %6163 = vmatprep.subr.bf16.mxu1 %v7222_v44 }
 0x469   :  { %6164 = vmatpush3.bf16.msra.mxu1 %v6512_v7  ;;  %v7924_v7 = vld [vmem:[%s9465_s4 + $0x30] ss:$8 sps:$4 sm:$0xff]  }
 0x46a   :  { %6165 = vmatprep.subr.bf16.mxu1 %v7222_v44 }
 0x4f9   :  { %v1174_v62 = vpop.f32.mrb[12].mxu0 }
 0x4fa   :  { %v1180_v63 = vadd.f32 %v1174_v62, %v1068_v56  ;;  %v6157_v0 = vpop.f32.mrb[13].mxu0  ;;  %v7872_v62 = vld [vmem:[%s9465_s4 + $0x4] ss:$8 sps:$4 sm:$0xff]  }
 0x4fb   :  { %v1177_v1 = vpop.f32.mrb[14].mxu0  ;;  %1889 = vmatprep.subr.bf16.mxu0 %v7872_v62  ;;  %v6524_v0 = vld [vmem:[%s9466_s5] sm:$0xff]  }
 0x4fc   :  { %v6158_v2 = vpop.f32.mrb[15].mxu0  ;;  %v1181_v3 = vadd.f32 %v1180_v63, %v7210_v33  ;;  %v6513_v33 = vld [vmem:[%s9463_s2 + $0x18] sm:$0xff]  }
 0x4fd   :  { %6166 = vmatpush3.bf16.msra.mxu1 %v6513_v33  ;;  %v7884_v63 = vld [vmem:[%s9465_s4 + $0x14] ss:$8 sps:$4 sm:$0xff]   ;;  %v7892_v1 = vld [vmem:[%s9465_s4 + $0x10] ss:$8 sps:$4 sm:$0xff]   ;;  %v7900_v2 = vld [vmem:[%s9465_s4 + $0x24] ss:$8 sps:$4 sm:$0xff]  }
 0x4fe   :  { %v1182_v5 = vsel %vm305_vm1, %v1181_v3, -inf  ;;  %6167 = vmatprep.subr.bf16.mxu1 %v7222_v44  ;;  %v7932_v33 = vld [vmem:[%s9465_s4 + $0x44] ss:$8 sps:$4 sm:$0xff]  }
 0x4ff   :  { %1183 = vmax.xlane.f32.xlu1 %v1182_v5  ;;  %v7908_v5 = vld [vmem:[%s9465_s4 + $0x20] ss:$8 sps:$4 sm:$0xff]  }
 0x501   :  { %6168 = vmatpush3.bf16.msra.mxu1 %v6514_v13  ;;  %v7961_v13 = vld [vmem:[%s9465_s4 + $0x64] ss:$8 sps:$4 sm:$0xff]  }
 0x502   :  { %6169 = vmatprep.subr.bf16.mxu1 %v7222_v44 }
 0x505   :  { %6170 = vmatpush3.bf16.msra.mxu1 %v6515_v14  ;;  %v6544_v14 = vld [vmem:[%s9466_s5 + $0x28] sm:$0xff]  }
 0x506   :  { %6171 = vmatprep.subr.bf16.mxu1 %v7222_v44 }
 0x509   :  { %6172 = vmatpush3.bf16.msra.mxu1 %v6516_v15  ;;  %v7972_v15 = vld [vmem:[%s9465_s4 + $0x60] ss:$8 sps:$4 sm:$0xff]  }
 0x50a   :  { %6173 = vmatprep.subr.bf16.mxu1 %v7222_v44 }
 0x50d   :  { %6174 = vmatpush3.bf16.msra.mxu1 %v6517_v16  ;;  %v7978_v16 = vld [vmem:[%s9465_s4 + $0x74] ss:$8 sps:$4 sm:$0xff]  }
 0x50e   :  { %1727 = vmatprep.subr.bf16.mxu1 %v7266_v58  ;;  %v9595_v58 = vld [vmem:[#allocation12_spill] sm:$0xff] }
 0x58c   :  { %v1184_v8 = vpop.xlane.xlu1 %1183 }
 0x58d   :  { %v1185_v9 = vsub.f32 %v1181_v3, %v1184_v8  ;;  %v6528_v3 = vld [vmem:[%s9466_s5 + $0x8] sm:$0xff]   ;;  %v6536_v8 = vld [vmem:[%s9466_s5 + $0x18] sm:$0xff]  }
 0x58f   :  { %v1186_v10 = vmul.f32 1.442695, %v1185_v9  ;;  %v7940_v9 = vld [vmem:[%s9465_s4 + $0x40] ss:$8 sps:$4 sm:$0xff]  }
 0x591   :  { %6844 = vpow2.f32 %v1186_v10  ;;  %v7948_v10 = vld [vmem:[%s9465_s4 + $0x50] ss:$8 sps:$4 sm:$0xff]  }
 0x59b   :  { %v6845_v11 = vpop.eup %6844 }
 0x59c   :  { %v1188_v12 = vsel %vm305_vm1, %v6845_v11, 0.0 }
 0x59d   :  { %1189 = vadd.xlane.f32.xlu1 %v1188_v12  ;;  %v6540_v12 = vld [vmem:[%s9466_s5 + $0x20] sm:$0xff]  }
 0x62a   :  { %v1190_v17 = vpop.xlane.xlu1 %1189 }
 0x62b   :  { %6846 = vrcp.f32 %v1190_v17  ;;  %v6548_v17 = vld [vmem:[%s9466_s5 + $0x30] sm:$0xff]  }
 0x635   :  { %v6847_v18 = vpop.eup %6846 }
 0x636   :  { %v1192_v19 = vmul.f32 %v6847_v18, %v6845_v11  ;;  %v7953_v11 = vld [vmem:[%s9465_s4 + $0x54] ss:$8 sps:$4 sm:$0xff]   ;;  %v7988_v18 = vld [vmem:[%s9465_s4 + $0x70] ss:$8 sps:$4 sm:$0xff]  }
 0x638   :  { %v1193_v20 = vpack.c.bf16 %v1192_v19, %v1192_v19  ;;  %1788 = vst [vmem:[#allocation8 + $0x1] sm:$0x1] %v1192_v19  ;;  %v1791_v19 = vld [vmem:[%s1790_s27] sm:$0x1] }
 0x63a   :  { %6176 = vmatmul.mubr.bf16.vlgmr.msra.gmra.mrb[12].mxu1 %v1193_v20  ;;  %v6549_v20 = vld [vmem:[%s9466_s5 + $0x38] sm:$0xff]  }
 0x63b   :  { %1759 = vmatprep.mubr.bf16.mxu1 %v7759_v37  ;;  %1728 = vmatpush1.bf16.msra.mxu1 %v7431_v25  ;;  %v9598_v25 = vld [vmem:[#allocation15_spill] sm:$0xff] }
 0x63c   :  { %1729 = vmatprep.subr.bf16.mxu1 %v7436_v27  ;;  %v9599_v27 = vld [vmem:[#allocation16_spill] sm:$0xff] }
 0x63f   :  { %1730 = vmatpush1.bf16.msra.mxu1 %v7442_v29  ;;  %v9600_v29 = vld [vmem:[#allocation17_spill] sm:$0xff] }
 0x640   :  { %1731 = vmatprep.subr.bf16.mxu1 %v7449_v30  ;;  %v9601_v30 = vld [vmem:[#allocation18_spill] sm:$0xff] }
 0x643   :  { %1732 = vmatpush1.bf16.msra.mxu1 %v7455_v31  ;;  %v9602_v31 = vld [vmem:[#allocation19_spill] sm:$0xff] }
 0x644   :  { %1733 = vmatprep.subr.bf16.mxu1 %v7461_v28  ;;  %v9603_v28 = vld [vmem:[#allocation20_spill] sm:$0xff] }
 0x647   :  { %1734 = vmatpush1.bf16.msra.mxu1 %v7467_v32  ;;  %v9604_v32 = vld [vmem:[#allocation21_spill] sm:$0xff] }
 0x648   :  { %1735 = vmatprep.subr.bf16.mxu1 %v7473_v34  ;;  %v9605_v34 = vld [vmem:[#allocation22_spill] sm:$0xff] }
 0x64b   :  { %1736 = vmatpush1.bf16.msra.mxu1 %v9595_v58  ;;  %v1792_v58 = vpack.c.bf16 %v1791_v19, %v1791_v19 }
 0x64c   :  { %1737 = vmatprep.subr.bf16.mxu1 %v9596_v21 }
 0x64f   :  { %1738 = vmatpush1.bf16.msra.mxu1 %v9597_v54 }
 0x650   :  { %1739 = vmatprep.subr.bf16.mxu1 %v9598_v25 }
 0x653   :  { %1740 = vmatpush1.bf16.msra.mxu1 %v9599_v27 }
 0x654   :  { %1741 = vmatprep.subr.bf16.mxu1 %v9600_v29 }
 0x657   :  { %1742 = vmatpush1.bf16.msra.mxu1 %v9601_v30 }
 0x658   :  { %1743 = vmatprep.subr.bf16.mxu1 %v9602_v31 }
 0x65b   :  { %1744 = vmatpush1.bf16.msra.mxu1 %v9603_v28 }
 0x65c   :  { %1745 = vmatprep.subr.bf16.mxu1 %v9604_v32 }
 0x65f   :  { %1746 = vmatpush1.bf16.msra.mxu1 %v9605_v34 }
 0x660   :  { %1747 = vmatprep.subr.bf16.mxu1 %v9606_v22 }
 0x663   :  { %1748 = vmatpush1.bf16.msra.mxu1 %v9607_v24 }
 0x664   :  { %1749 = vmatprep.subr.bf16.mxu1 %v9608_v48 }
 0x667   :  { %1750 = vmatpush1.bf16.msra.mxu1 %v9609_v49 }
 0x668   :  { %1751 = vmatprep.subr.bf16.mxu1 %v9610_v52 }
 0x66b   :  { %1752 = vmatpush1.bf16.msra.mxu1 %v9611_v23 }
 0x66c   :  { %1753 = vmatprep.subr.bf16.mxu1 %v9612_v45 }
 0x66f   :  { %1754 = vmatpush1.bf16.msra.mxu1 %v9613_v46 }
 0x670   :  { %1755 = vmatprep.subr.bf16.mxu1 %v9614_v57 }
 0x673   :  { %1756 = vmatpush1.bf16.msra.mxu1 %v9615_v42 }
 0x674   :  { %1757 = vmatprep.subr.bf16.mxu1 %v9616_v43 }
 0x677   :  { %1758 = vmatpush1.bf16.msra.mxu1 %v9617_v41 }
 0x678   :  { %6179 = vmatprep.subr.bf16.mxu1 %v7222_v44 }
 0x70d   :  { %v1292_v40 = vpop.f32.mrb[12].mxu1 }
 0x70e   :  { %v1298_v53 = vadd.f32 %v1292_v40, %v7794_v59  ;;  %v6177_v39 = vpop.f32.mrb[13].mxu1  ;;  %v7877_v59 = vld [vmem:[%s9465_s4] ss:$8 sps:$4 sm:$0xff]  }
 0x70f   :  { %v1295_v50 = vpop.f32.mrb[14].mxu1 }
 0x710   :  { %v1299_v51 = vadd.f32 %v1298_v53, %v9618_v38  ;;  %v6178_v37 = vpop.f32.mrb[15].mxu1 }
 0x712   :  { %v1300_v56 = vmax.f32 %v1299_v51, 0.0 }
 0x714   :  { %v1301_v60 = vpack.c.bf16 %v1300_v56, %v1300_v56 }
 0x716   :  { %1719 = vmatmul.mubr.bf16.vlgmr.msra.gmra.mrb[16].mxu0 %v1301_v60  ;;  %1760 = vmatmul.mubr.bf16.vlgmr.msra.gmra.mrb[16].mxu1 %v1301_v60 }
 0x717   :  { %1921 = vmatprep.mubr.bf16.mxu0 %v9619_v61  ;;  %6195 = vmatprep.mubr.msk.bf16.mxu1 %vm7026_vm0, %v7222_v44 }
 0x718   :  { %1890 = vmatpush1.bf16.msra.mxu0 %v7877_v59  ;;  %6180 = vmatpush3.bf16.msra.mxu1 %v6524_v0 }
 0x719   :  { %1891 = vmatprep.subr.bf16.mxu0 %v7884_v63  ;;  %6181 = vmatprep.subr.bf16.mxu1 %v7222_v44 }
 0x71c   :  { %1892 = vmatpush1.bf16.msra.mxu0 %v7892_v1  ;;  %6182 = vmatpush3.bf16.msra.mxu1 %v6528_v3 }
 0x71d   :  { %1893 = vmatprep.subr.bf16.mxu0 %v7900_v2  ;;  %6183 = vmatprep.subr.bf16.mxu1 %v7222_v44 }
 0x720   :  { %1894 = vmatpush1.bf16.msra.mxu0 %v7908_v5  ;;  %6184 = vmatpush3.bf16.msra.mxu1 %v6532_v6 }
 0x721   :  { %1895 = vmatprep.subr.bf16.mxu0 %v7916_v4  ;;  %6185 = vmatprep.subr.bf16.mxu1 %v7222_v44 }
 0x724   :  { %1896 = vmatpush1.bf16.msra.mxu0 %v7924_v7  ;;  %6186 = vmatpush3.bf16.msra.mxu1 %v6536_v8 }
 0x725   :  { %1897 = vmatprep.subr.bf16.mxu0 %v7932_v33  ;;  %6187 = vmatprep.subr.bf16.mxu1 %v7222_v44 }
 0x728   :  { %1898 = vmatpush1.bf16.msra.mxu0 %v7940_v9  ;;  %6188 = vmatpush3.bf16.msra.mxu1 %v6540_v12 }
 0x729   :  { %1899 = vmatprep.subr.bf16.mxu0 %v7953_v11  ;;  %6189 = vmatprep.subr.bf16.mxu1 %v7222_v44 }
 0x72c   :  { %1900 = vmatpush1.bf16.msra.mxu0 %v7948_v10  ;;  %6190 = vmatpush3.bf16.msra.mxu1 %v6544_v14  ;;  %v8021_v14 = vld [vmem:[%s9467_s6] sm:$0x1] }
 0x72d   :  { %1901 = vmatprep.subr.bf16.mxu0 %v7961_v13  ;;  %6191 = vmatprep.subr.bf16.mxu1 %v7222_v44  ;;  %9620 = vst [vmem:[#allocation12_spill] sm:$0xff] %v8021_v14 }
 0x730   :  { %1902 = vmatpush1.bf16.msra.mxu0 %v7972_v15  ;;  %6192 = vmatpush3.bf16.msra.mxu1 %v6548_v17 }
 0x731   :  { %1903 = vmatprep.subr.bf16.mxu0 %v7978_v16  ;;  %6193 = vmatprep.subr.bf16.mxu1 %v7222_v44 }
 0x734   :  { %1904 = vmatpush1.bf16.msra.mxu0 %v7988_v18  ;;  %6194 = vmatpush3.bf16.msra.mxu1 %v6549_v20  ;;  %v6550_v20 = vld [vmem:[%s9463_s2] sm:$0xff]  }
 0x735   :  { %6199 = vmatprep.subr.bf16.mxu0 %v7222_v44 }
 0x737   :  { %1922 = vmatmul.mubr.bf16.vlgmr.msra.gmra.mrb[20].mxu0 %v1792_v58  ;;  %v6551_v58 = vld [vmem:[%s9463_s2 + $0x8] sm:$0xff]  }
 0x738   :  { %6215 = vmatprep.mubr.msk.bf16.mxu0 %vm7026_vm0, %v7222_v44  ;;  %6200 = vmatpush3.bf16.msra.mxu0 %v6550_v20  ;;  %v8212_v20 = vld [vmem:[%s9469_s8 + $0x184] ss:$16 sps:$4 sm:$0xff]  }
 0x739   :  { %6201 = vmatprep.subr.bf16.mxu0 %v7222_v44 }
 0x73c   :  { %6202 = vmatpush3.bf16.msra.mxu0 %v6551_v58  ;;  %v8218_v58 = vld [vmem:[%s9469_s8 + $0x180] ss:$16 sps:$4 sm:$0xff]  }
 0x73d   :  { %6203 = vmatprep.subr.bf16.mxu0 %v7222_v44 }
 0x7e9   :  { %v1720_v21 = vpop.f32.mrb[16].mxu0  ;;  %v1761_v54 = vpop.f32.mrb[16].mxu1 }
 0x7ea   :  { %v1721_v25 = vadd.f32 %v1720_v21, %v7739_v26  ;;  %v1722_v27 = vpop.f32.mrb[17].mxu0  ;;  %v1763_v29 = vpop.f32.mrb[17].mxu1  ;;  %v1762_v57 = vadd.f32 %v1761_v54, %v7747_v35  ;;  %v6552_v21 = vld [vmem:[%s9463_s2 + $0x10] sm:$0xff]   ;;  %v6553_v54 = vld [vmem:[%s9463_s2 + $0x18] sm:$0xff]  }
 0x7eb   :  { %v1724_v30 = vpop.f32.mrb[18].mxu0  ;;  %v1765_v31 = vpop.f32.mrb[18].mxu1  ;;  %v1723_v22 = vadd.f32 %v1722_v27, %v7741_v47  ;;  %v1764_v45 = vadd.f32 %v1763_v29, %v7745_v36  ;;  %6204 = vmatpush3.bf16.msra.mxu0 %v6552_v21  ;;  %v8224_v21 = vld [vmem:[%s9469_s8 + $0x1a4] ss:$16 sps:$4 sm:$0xff]  }
 0x7ec   :  { %v5575_v28 = vmul.f32 -1.442695, %v1721_v25  ;;  %v1725_v32 = vpop.f32.mrb[19].mxu0  ;;  %v1766_v34 = vpop.f32.mrb[19].mxu1  ;;  %6205 = vmatprep.subr.bf16.mxu0 %v7222_v44 }
 0x7ed   :  { %v5576_v24 = vmul.f32 -1.442695, %v1723_v22  ;;  %v6555_v32 = vld [vmem:[%s9463_s2 + $0x28] sm:$0xff]   ;;  %v6556_v34 = vld [vmem:[%s9463_s2 + $0x30] sm:$0xff]   ;;  %v6557_v22 = vld [vmem:[%s9463_s2 + $0x38] sm:$0xff]  }
 0x7ee   :  { %6848 = vpow2.f32 %v5575_v28  ;;  %v6554_v28 = vld [vmem:[%s9463_s2 + $0x20] sm:$0xff]  }
 0x7ef   :  { %6850 = vpow2.f32 %v5576_v24  ;;  %6206 = vmatpush3.bf16.msra.mxu0 %v6553_v54  ;;  %v8063_v24 = vld [vmem:[%s9469_s8] ss:$16 sps:$4 sm:$0xff]  }
 0x7f0   :  { %6207 = vmatprep.subr.bf16.mxu0 %v7222_v44  ;;  %v8230_v54 = vld [vmem:[%s9469_s8 + $0x1a0] ss:$16 sps:$4 sm:$0xff]  }
 0x7f3   :  { %6208 = vmatpush3.bf16.msra.mxu0 %v6554_v28 }
 0x7f4   :  { %6209 = vmatprep.subr.bf16.mxu0 %v7222_v44 }
 0x7f7   :  { %6210 = vmatpush3.bf16.msra.mxu0 %v6555_v32  ;;  %v8243_v32 = vld [vmem:[%s9469_s8 + $0x2c] ss:$16 sps:$4 sm:$0xff]  }
 0x7f8   :  { %v6849_v48 = vpop.eup %6848  ;;  %6211 = vmatprep.subr.bf16.mxu0 %v7222_v44  ;;  %9623 = vst [vmem:[#allocation15_spill] sm:$0xff] %v8243_v32 }
 0x7f9   :  { %v1771_v49 = vadd.f32 1.0, %v6849_v48  ;;  %v6851_v52 = vpop.eup %6850  ;;  %v8068_v48 = vld [vmem:[%s9469_s8 + $0x4] ss:$16 sps:$4 sm:$0xff]  }
 0x7fa   :  { %v1777_v23 = vadd.f32 1.0, %v6851_v52  ;;  %v8078_v52 = vld [vmem:[%s9469_s8 + $0x24] ss:$16 sps:$4 sm:$0xff]   ;;  %2541 = vmatprep.subr.bf16.mxu1 %v8068_v48 }
 0x7fb   :  { %6852 = vrcp.f32 %v1771_v49  ;;  %6212 = vmatpush3.bf16.msra.mxu0 %v6556_v34  ;;  %v8073_v49 = vld [vmem:[%s9469_s8 + $0xc] ss:$16 sps:$4 sm:$0xff]  }
 0x7fc   :  { %6854 = vrcp.f32 %v1777_v23  ;;  %6213 = vmatprep.subr.bf16.mxu0 %v7222_v44  ;;  %9621 = vst [vmem:[#allocation13_spill] sm:$0xff] %v8073_v49  ;;  %v8086_v23 = vld [vmem:[%s9469_s8 + $0x20] ss:$16 sps:$4 sm:$0xff]   ;;  %v8256_v34 = vld [vmem:[%s9469_s8 + $0x4c] ss:$16 sps:$4 sm:$0xff]  }
 0x7fd   :  { %9625 = vst [vmem:[#allocation17_spill] sm:$0xff] %v8256_v34 }
 0x7ff   :  { %6214 = vmatpush3.bf16.msra.mxu0 %v6557_v22  ;;  %v8268_v22 = vld [vmem:[%s9469_s8 + $0x6c] ss:$16 sps:$4 sm:$0xff]  }
 0x800   :  { %2582 = vmatprep.subr.bf16.mxu0 %v8073_v49  ;;  %9627 = vst [vmem:[#allocation19_spill] sm:$0xff] %v8268_v22  ;;  %v8452_v49 = vld [vmem:[%s9468_s7] sm:$0x1] }
 0x805   :  { %v6853_v46 = vpop.eup %6852 }
 0x806   :  { %v1780_v42 = vmul.f32 %v6853_v46, %v1764_v45  ;;  %v6855_v41 = vpop.eup %6854  ;;  %v8092_v45 = vld [vmem:[%s9469_s8 + $0x44] ss:$16 sps:$4 sm:$0xff]   ;;  %v8098_v46 = vld [vmem:[%s9469_s8 + $0x40] ss:$16 sps:$4 sm:$0xff]  }
 0x807   :  { %v1783_v40 = vsub.f32 1.0, %v6855_v41  ;;  %v1785_v50 = vmul.f32 %v6855_v41, %v7754_v55  ;;  %v8122_v41 = vld [vmem:[%s9469_s8 + $0x80] ss:$16 sps:$4 sm:$0xff]  }
 0x808   :  { %v1781_v43 = vadd.f32 %v1780_v42, %v1762_v57  ;;  %v8104_v57 = vld [vmem:[%s9469_s8 + $0x64] ss:$16 sps:$4 sm:$0xff]   ;;  %v8110_v42 = vld [vmem:[%s9469_s8 + $0x60] ss:$16 sps:$4 sm:$0xff]  }
 0x80a   :  { %6856 = vtanh.f32 %v1781_v43  ;;  %v1923_v37 = vpop.f32.mrb[20].mxu0  ;;  %v8116_v43 = vld [vmem:[%s9469_s8 + $0x84] ss:$16 sps:$4 sm:$0xff]  }
 0x80b   :  { %v8016_v56 = vpop.f32.mrb[21].mxu0 }
 0x80c   :  { %v1927_v60 = vpop.f32.mrb[22].mxu0 }
 0x80d   :  { %v1928_v0 = vpop.f32.mrb[23].mxu0  ;;  %v8158_v60 = vld [vmem:[%s9469_s8 + $0xe0] ss:$16 sps:$4 sm:$0xff]  }
 0x80e   :  { %v8164_v0 = vld [vmem:[%s9469_s8 + $0x104] ss:$16 sps:$4 sm:$0xff]  }
 0x814   :  { %v6857_v53 = vpop.eup %6856 }
 0x815   :  { %v1784_v39 = vmul.f32 %v6857_v53, %v1783_v40  ;;  %v8128_v40 = vld [vmem:[%s9469_s8 + $0xa4] ss:$16 sps:$4 sm:$0xff]   ;;  %v8134_v53 = vld [vmem:[%s9469_s8 + $0xa0] ss:$16 sps:$4 sm:$0xff]  }
 0x817   :  { %v8007_v38 = vadd.f32 %v1785_v50, %v1784_v39  ;;  %v8140_v39 = vld [vmem:[%s9469_s8 + $0xc4] ss:$16 sps:$4 sm:$0xff]   ;;  %v8146_v50 = vld [vmem:[%s9469_s8 + $0xc0] ss:$16 sps:$4 sm:$0xff]  }
 0x819   :  { %1787 = vst [vmem:[#allocation6 + $0x1] sm:$0x1] %v8007_v38  ;;  %v8012_v51 = vpack.c.bf16 %v8007_v38, %v8007_v38 }
 0x81b   :  { %6196 = vmatmul.mubr.bf16.vlgmr.msra.gmra.mrb[20].mxu1 %v8012_v51 }
 0x81c   :  { %2573 = vmatprep.mubr.bf16.mxu1 %v8012_v51  ;;  %2542 = vmatpush1.bf16.msra.mxu1 %v8063_v24 }
 0x81d   :  { %2543 = vmatprep.subr.bf16.mxu1 %v8078_v52 }
 0x820   :  { %2544 = vmatpush1.bf16.msra.mxu1 %v8086_v23 }
 0x821   :  { %2545 = vmatprep.subr.bf16.mxu1 %v8092_v45 }
 0x824   :  { %2546 = vmatpush1.bf16.msra.mxu1 %v8098_v46 }
 0x825   :  { %2547 = vmatprep.subr.bf16.mxu1 %v8104_v57 }
 0x828   :  { %2548 = vmatpush1.bf16.msra.mxu1 %v8110_v42 }
 0x829   :  { %2549 = vmatprep.subr.bf16.mxu1 %v8116_v43 }
 0x82c   :  { %2550 = vmatpush1.bf16.msra.mxu1 %v8122_v41 }
 0x82d   :  { %2551 = vmatprep.subr.bf16.mxu1 %v8128_v40 }
 0x830   :  { %2552 = vmatpush1.bf16.msra.mxu1 %v8134_v53 }
 0x831   :  { %2553 = vmatprep.subr.bf16.mxu1 %v8140_v39 }
 0x834   :  { %2554 = vmatpush1.bf16.msra.mxu1 %v8146_v50 }
 0x8ee   :  { %v2029_v3 = vpop.f32.mrb[20].mxu1 }
 0x8ef   :  { %v2035_v6 = vadd.f32 %v2029_v3, %v1923_v37  ;;  %v6197_v55 = vpop.f32.mrb[21].mxu1  ;;  %v8152_v37 = vld [vmem:[%s9469_s8 + $0xe4] ss:$16 sps:$4 sm:$0xff]   ;;  %v8170_v3 = vld [vmem:[%s9469_s8 + $0x100] ss:$16 sps:$4 sm:$0xff]  }
 0x8f0   :  { %v2032_v8 = vpop.f32.mrb[22].mxu1  ;;  %2555 = vmatprep.subr.bf16.mxu1 %v8152_v37  ;;  %v8182_v55 = vld [vmem:[%s9469_s8 + $0x120] ss:$16 sps:$4 sm:$0xff]  }
 0x8f1   :  { %v6198_v12 = vpop.f32.mrb[23].mxu1  ;;  %v2036_v17 = vadd.f32 %v8021_v14, %v2035_v6  ;;  %2556 = vmatpush1.bf16.msra.mxu1 %v8158_v60  ;;  %v8176_v6 = vld [vmem:[%s9469_s8 + $0x124] ss:$16 sps:$4 sm:$0xff]  }
 0x8f2   :  { %2557 = vmatprep.subr.bf16.mxu1 %v8164_v0  ;;  %v8188_v8 = vld [vmem:[%s9469_s8 + $0x144] ss:$16 sps:$4 sm:$0xff]   ;;  %v8194_v12 = vld [vmem:[%s9469_s8 + $0x140] ss:$16 sps:$4 sm:$0xff]  }
 0x8f3   :  { %v2037_v19 = vsel %vm305_vm1, %v2036_v17, -inf }
 0x8f4   :  { %2038 = vmax.xlane.f32.xlu0 %v2037_v19  ;;  %v8206_v19 = vld [vmem:[%s9469_s8 + $0x160] ss:$16 sps:$4 sm:$0xff]  }
 0x8f5   :  { %2558 = vmatpush1.bf16.msra.mxu1 %v8170_v3 }
 0x8f6   :  { %2559 = vmatprep.subr.bf16.mxu1 %v8176_v6 }
 0x8f9   :  { %2560 = vmatpush1.bf16.msra.mxu1 %v8182_v55 }
 0x8fa   :  { %2561 = vmatprep.subr.bf16.mxu1 %v8188_v8 }
 0x8fd   :  { %2562 = vmatpush1.bf16.msra.mxu1 %v8194_v12 }
 0x981   :  { %v2039_v25 = vpop.xlane.xlu0 %2038 }
 0x982   :  { %v2040_v27 = vsub.f32 %v2036_v17, %v2039_v25  ;;  %v8200_v17 = vld [vmem:[%s9469_s8 + $0x164] ss:$16 sps:$4 sm:$0xff]  }
 0x983   :  { %2563 = vmatprep.subr.bf16.mxu1 %v8200_v17 }
 0x984   :  { %v2041_v29 = vmul.f32 1.442695, %v2040_v27  ;;  %2564 = vmatpush1.bf16.msra.mxu1 %v8206_v19 }
 0x985   :  { %2565 = vmatprep.subr.bf16.mxu1 %v8212_v20 }
 0x986   :  { %6858 = vpow2.f32 %v2041_v29 }
 0x988   :  { %2566 = vmatpush1.bf16.msra.mxu1 %v8218_v58 }
 0x989   :  { %2567 = vmatprep.subr.bf16.mxu1 %v8224_v21 }
 0x98c   :  { %2568 = vmatpush1.bf16.msra.mxu1 %v8230_v54 }
 0x990   :  { %v8041_v30 = vpop.eup %6858 }
 0x991   :  { %v2043_v31 = vsel %vm305_vm1, %v8041_v30, 0.0 }
 0x992   :  { %2044 = vadd.xlane.f32.xlu1 %v2043_v31  ;;  %v8238_v31 = vld [vmem:[%s9469_s8 + $0x8] ss:$16 sps:$4 sm:$0xff]  }
 0x993   :  { %9622 = vst [vmem:[#allocation14_spill] sm:$0xff] %v8238_v31 }
 0xa1f   :  { %v2045_v25 = vpop.xlane.xlu1 %2044 }
 0xa20   :  { %6860 = vrcp.f32 %v2045_v25  ;;  %v8274_v25 = vld [vmem:[%s9469_s8 + $0x68] ss:$16 sps:$4 sm:$0xff]  }
 0xa21   :  { %9628 = vst [vmem:[#allocation20_spill] sm:$0xff] %v8274_v25 }
 0xa2a   :  { %v6861_v27 = vpop.eup %6860 }
 0xa2b   :  { %v2047_v29 = vmul.f32 %v6861_v27, %v8041_v30  ;;  %v8250_v30 = vld [vmem:[%s9469_s8 + $0x28] ss:$16 sps:$4 sm:$0xff]   ;;  %v8280_v27 = vld [vmem:[%s9469_s8 + $0x8c] ss:$16 sps:$4 sm:$0xff]  }
 0xa2c   :  { %9624 = vst [vmem:[#allocation16_spill] sm:$0xff] %v8250_v30  ;;  %9629 = vst [vmem:[#allocation21_spill] sm:$0xff] %v8280_v27 }
 0xa2d   :  { %v2048_v28 = vpack.c.bf16 %v2047_v29, %v2047_v29  ;;  %2643 = vst [vmem:[#allocation8 + $0x2] sm:$0x1] %v2047_v29  ;;  %v8286_v29 = vld [vmem:[%s9469_s8 + $0x88] ss:$16 sps:$4 sm:$0xff]  }
 0xa2e   :  { %9630 = vst [vmem:[#allocation22_spill] sm:$0xff] %v8286_v29 }
 0xa2f   :  { %6216 = vmatmul.mubr.bf16.vlgmr.msra.gmra.mrb[24].mxu0 %v2048_v28  ;;  %v8292_v28 = vld [vmem:[%s9469_s8 + $0xac] ss:$16 sps:$4 sm:$0xff]  }
 0xa30   :  { %2614 = vmatprep.mubr.bf16.mxu0 %v8012_v51  ;;  %2583 = vmatpush1.bf16.msra.mxu0 %v8238_v31  ;;  %v8262_v51 = vld [vmem:[%s9469_s8 + $0x48] ss:$16 sps:$4 sm:$0xff]   ;;  %9631 = vst [vmem:[#allocation23_spill] sm:$0xff] %v8292_v28 }
 0xa31   :  { %2584 = vmatprep.subr.bf16.mxu0 %v8243_v32  ;;  %9626 = vst [vmem:[#allocation18_spill] sm:$0xff] %v8262_v51 }
 0xa34   :  { %2585 = vmatpush1.bf16.msra.mxu0 %v8250_v30 }
 0xa35   :  { %2586 = vmatprep.subr.bf16.mxu0 %v8256_v34  ;;  %v8435_v34 = vld [vmem:[%s9469_s8 + $0x1e0] ss:$16 sps:$4 sm:$0xff]  }
 0xa36   :  { %9653 = vst [vmem:[#allocation45_spill] sm:$0xff] %v8435_v34 }
 0xa38   :  { %2587 = vmatpush1.bf16.msra.mxu0 %v8262_v51  ;;  %v8430_v51 = vld [vmem:[%s9469_s8 + $0x1ec] ss:$16 sps:$4 sm:$0xff]  }
 0xa39   :  { %2588 = vmatprep.subr.bf16.mxu0 %v8268_v22  ;;  %v8298_v22 = vld [vmem:[%s9469_s8 + $0xa8] ss:$16 sps:$4 sm:$0xff]   ;;  %9652 = vst [vmem:[#allocation44_spill] sm:$0xff] %v8430_v51 }
 0xa3a   :  { %9632 = vst [vmem:[#allocation24_spill] sm:$0xff] %v8298_v22 }
 0xa3c   :  { %2589 = vmatpush1.bf16.msra.mxu0 %v8274_v25  ;;  %v8304_v25 = vld [vmem:[%s9469_s8 + $0xcc] ss:$16 sps:$4 sm:$0xff]  }
 0xa3d   :  { %2590 = vmatprep.subr.bf16.mxu0 %v8280_v27  ;;  %9633 = vst [vmem:[#allocation25_spill] sm:$0xff] %v8304_v25  ;;  %v8310_v27 = vld [vmem:[%s9469_s8 + $0xc8] ss:$16 sps:$4 sm:$0xff]  }
 0xa3e   :  { %9634 = vst [vmem:[#allocation26_spill] sm:$0xff] %v8310_v27 }
 0xa40   :  { %2591 = vmatpush1.bf16.msra.mxu0 %v8286_v29  ;;  %v8316_v29 = vld [vmem:[%s9469_s8 + $0xec] ss:$16 sps:$4 sm:$0xff]  }
 0xa41   :  { %2592 = vmatprep.subr.bf16.mxu0 %v8292_v28  ;;  %9635 = vst [vmem:[#allocation27_spill] sm:$0xff] %v8316_v29  ;;  %v8322_v28 = vld [vmem:[%s9469_s8 + $0xe8] ss:$16 sps:$4 sm:$0xff]  }
 0xa42   :  { %9636 = vst [vmem:[#allocation28_spill] sm:$0xff] %v8322_v28 }
 0xa44   :  { %2593 = vmatpush1.bf16.msra.mxu0 %v8298_v22  ;;  %v8328_v22 = vld [vmem:[%s9469_s8 + $0x10c] ss:$16 sps:$4 sm:$0xff]  }
 0xa45   :  { %2594 = vmatprep.subr.bf16.mxu0 %v8304_v25  ;;  %9637 = vst [vmem:[#allocation29_spill] sm:$0xff] %v8328_v22  ;;  %v8334_v25 = vld [vmem:[%s9469_s8 + $0x108] ss:$16 sps:$4 sm:$0xff]  }
 0xa46   :  { %9638 = vst [vmem:[#allocation30_spill] sm:$0xff] %v8334_v25 }
 0xa48   :  { %2595 = vmatpush1.bf16.msra.mxu0 %v8310_v27  ;;  %v8340_v27 = vld [vmem:[%s9469_s8 + $0x12c] ss:$16 sps:$4 sm:$0xff]  }
 0xa49   :  { %2596 = vmatprep.subr.bf16.mxu0 %v8316_v29  ;;  %9639 = vst [vmem:[#allocation31_spill] sm:$0xff] %v8340_v27  ;;  %v8346_v29 = vld [vmem:[%s9469_s8 + $0x128] ss:$16 sps:$4 sm:$0xff]  }
 0xa4a   :  { %9640 = vst [vmem:[#allocation32_spill] sm:$0xff] %v8346_v29 }
 0xa4c   :  { %2597 = vmatpush1.bf16.msra.mxu0 %v8322_v28  ;;  %v8352_v28 = vld [vmem:[%s9469_s8 + $0x14c] ss:$16 sps:$4 sm:$0xff]  }
 0xa4d   :  { %2598 = vmatprep.subr.bf16.mxu0 %v8328_v22  ;;  %9641 = vst [vmem:[#allocation33_spill] sm:$0xff] %v8352_v28  ;;  %v8358_v22 = vld [vmem:[%s9469_s8 + $0x148] ss:$16 sps:$4 sm:$0xff]  }
 0xa4e   :  { %9642 = vst [vmem:[#allocation34_spill] sm:$0xff] %v8358_v22 }
 0xa50   :  { %2599 = vmatpush1.bf16.msra.mxu0 %v8334_v25  ;;  %v8364_v25 = vld [vmem:[%s9469_s8 + $0x16c] ss:$16 sps:$4 sm:$0xff]  }
 0xa51   :  { %2600 = vmatprep.subr.bf16.mxu0 %v8340_v27  ;;  %9643 = vst [vmem:[#allocation35_spill] sm:$0xff] %v8364_v25  ;;  %v8370_v27 = vld [vmem:[%s9469_s8 + $0x168] ss:$16 sps:$4 sm:$0xff]  }
 0xa52   :  { %9644 = vst [vmem:[#allocation36_spill] sm:$0xff] %v8370_v27 }
 0xa54   :  { %2601 = vmatpush1.bf16.msra.mxu0 %v8346_v29  ;;  %v8376_v29 = vld [vmem:[%s9469_s8 + $0x18c] ss:$16 sps:$4 sm:$0xff]  }
 0xa55   :  { %2602 = vmatprep.subr.bf16.mxu0 %v8352_v28  ;;  %9645 = vst [vmem:[#allocation37_spill] sm:$0xff] %v8376_v29  ;;  %v8382_v28 = vld [vmem:[%s9469_s8 + $0x188] ss:$16 sps:$4 sm:$0xff]  }
 0xa56   :  { %9646 = vst [vmem:[#allocation38_spill] sm:$0xff] %v8382_v28 }
 0xa58   :  { %2603 = vmatpush1.bf16.msra.mxu0 %v8358_v22  ;;  %v8388_v22 = vld [vmem:[%s9469_s8 + $0x1ac] ss:$16 sps:$4 sm:$0xff]  }
 0xa59   :  { %2604 = vmatprep.subr.bf16.mxu0 %v8364_v25  ;;  %9647 = vst [vmem:[#allocation39_spill] sm:$0xff] %v8388_v22  ;;  %v8394_v25 = vld [vmem:[%s9469_s8 + $0x1a8] ss:$16 sps:$4 sm:$0xff]  }
 0xa5a   :  { %9648 = vst [vmem:[#allocation40_spill] sm:$0xff] %v8394_v25 }
 0xa5c   :  { %2605 = vmatpush1.bf16.msra.mxu0 %v8370_v27  ;;  %v8406_v27 = vld [vmem:[%s9469_s8 + $0x1cc] ss:$16 sps:$4 sm:$0xff]  }
 0xa5d   :  { %2606 = vmatprep.subr.bf16.mxu0 %v8376_v29  ;;  %v8401_v29 = vld [vmem:[%s9469_s8 + $0x1c4] ss:$16 sps:$4 sm:$0xff]   ;;  %9649 = vst [vmem:[#allocation41_spill] sm:$0xff] %v8406_v27 }
 0xa5e   :  { %2569 = vmatprep.subr.bf16.mxu1 %v8401_v29 }
 0xa60   :  { %2607 = vmatpush1.bf16.msra.mxu0 %v8382_v28  ;;  %v8411_v28 = vld [vmem:[%s9469_s8 + $0x1c0] ss:$16 sps:$4 sm:$0xff]  }
 0xa61   :  { %2608 = vmatprep.subr.bf16.mxu0 %v8388_v22  ;;  %v8416_v22 = vld [vmem:[%s9469_s8 + $0x1c8] ss:$16 sps:$4 sm:$0xff]   ;;  %2570 = vmatpush1.bf16.msra.mxu1 %v8411_v28 }
 0xa62   :  { %9650 = vst [vmem:[#allocation42_spill] sm:$0xff] %v8416_v22 }
 0xa64   :  { %2609 = vmatpush1.bf16.msra.mxu0 %v8394_v25  ;;  %v8425_v25 = vld [vmem:[%s9469_s8 + $0x1e4] ss:$16 sps:$4 sm:$0xff]  }
 0xa65   :  { %2610 = vmatprep.subr.bf16.mxu0 %v8406_v27  ;;  %9651 = vst [vmem:[#allocation43_spill] sm:$0xff] %v8425_v25  ;;  %v8440_v27 = vld [vmem:[%s9469_s8 + $0x1e8] ss:$16 sps:$4 sm:$0xff]   ;;  %2571 = vmatprep.subr.bf16.mxu1 %v8425_v25 }
 0xa66   :  { %2572 = vmatpush1.bf16.msra.mxu1 %v8435_v34 }
 0xa67   :  { %2744 = vmatprep.subr.bf16.mxu1 %v7872_v62  ;;  %v6654_v62 = vld [vmem:[%s9466_s5] sm:$0xff]  }
 0xa68   :  { %2611 = vmatpush1.bf16.msra.mxu0 %v8416_v22 }
 0xa69   :  { %2612 = vmatprep.subr.bf16.mxu0 %v8430_v51 }
 0xa6c   :  { %2613 = vmatpush1.bf16.msra.mxu0 %v8440_v27 }
 0xa6d   :  { %6219 = vmatprep.subr.bf16.mxu0 %v7222_v44 }
 0xb02   :  { %v2147_v22 = vpop.f32.mrb[24].mxu0 }
 0xb03   :  { %v2153_v30 = vadd.f32 %v2147_v22, %v8016_v56  ;;  %v6217_v32 = vpop.f32.mrb[25].mxu0 }
 0xb04   :  { %v2150_v31 = vpop.f32.mrb[26].mxu0 }
 0xb05   :  { %v2154_v51 = vadd.f32 %v8452_v49, %v2153_v30  ;;  %v6218_v14 = vpop.f32.mrb[27].mxu0 }
 0xb07   :  { %v2155_v34 = vmax.f32 %v2154_v51, 0.0 }
 0xb09   :  { %v2156_v25 = vpack.c.bf16 %v2155_v34, %v2155_v34 }
 0xb0b   :  { %2574 = vmatmul.mubr.bf16.vlgmr.msra.gmra.mrb[24].mxu1 %v2156_v25  ;;  %2615 = vmatmul.mubr.bf16.vlgmr.msra.gmra.mrb[28].mxu0 %v2156_v25 }
 0xb0c   :  { %2745 = vmatpush1.bf16.msra.mxu1 %v7877_v59  ;;  %2776 = vmatprep.mubr.bf16.mxu1 %v9619_v61  ;;  %v6655_v59 = vld [vmem:[%s9466_s5 + $0x8] sm:$0xff]  }
 0xb0d   :  { %2746 = vmatprep.subr.bf16.mxu1 %v7884_v63  ;;  %6235 = vmatprep.mubr.msk.bf16.mxu0 %vm7026_vm0, %v7222_v44  ;;  %v6656_v63 = vld [vmem:[%s9466_s5 + $0x10] sm:$0xff]  }
 0xb0e   :  { %6220 = vmatpush3.bf16.msra.mxu0 %v6654_v62 }
 0xb0f   :  { %6221 = vmatprep.subr.bf16.mxu0 %v7222_v44 }
 0xb10   :  { %2747 = vmatpush1.bf16.msra.mxu1 %v7892_v1  ;;  %v6657_v1 = vld [vmem:[%s9466_s5 + $0x18] sm:$0xff]  }
 0xb11   :  { %2748 = vmatprep.subr.bf16.mxu1 %v7900_v2  ;;  %v6658_v2 = vld [vmem:[%s9466_s5 + $0x20] sm:$0xff]  }
 0xb12   :  { %6222 = vmatpush3.bf16.msra.mxu0 %v6655_v59 }
 0xb13   :  { %6223 = vmatprep.subr.bf16.mxu0 %v7222_v44 }
 0xb14   :  { %2749 = vmatpush1.bf16.msra.mxu1 %v7908_v5  ;;  %v6659_v5 = vld [vmem:[%s9466_s5 + $0x28] sm:$0xff]  }
 0xb15   :  { %2750 = vmatprep.subr.bf16.mxu1 %v7916_v4  ;;  %v6660_v4 = vld [vmem:[%s9466_s5 + $0x30] sm:$0xff]  }
 0xb16   :  { %6224 = vmatpush3.bf16.msra.mxu0 %v6656_v63 }
 0xb17   :  { %6225 = vmatprep.subr.bf16.mxu0 %v7222_v44 }
 0xb18   :  { %2751 = vmatpush1.bf16.msra.mxu1 %v7924_v7  ;;  %v2646_v7 = vld [vmem:[%s2645_s23] sm:$0x1] }
 0xb19   :  { %2752 = vmatprep.subr.bf16.mxu1 %v7932_v33  ;;  %v2647_v33 = vpack.c.bf16 %v2646_v7, %v2646_v7 }
 0xb1a   :  { %6226 = vmatpush3.bf16.msra.mxu0 %v6657_v1 }
 0xb1b   :  { %6227 = vmatprep.subr.bf16.mxu0 %v7222_v44 }
 0xb1c   :  { %2753 = vmatpush1.bf16.msra.mxu1 %v7940_v9  ;;  %v6661_v9 = vld [vmem:[%s9466_s5 + $0x38] sm:$0xff]  }
 0xb1d   :  { %2754 = vmatprep.subr.bf16.mxu1 %v7953_v11 }
 0xb1e   :  { %6228 = vmatpush3.bf16.msra.mxu0 %v6658_v2 }
 0xb1f   :  { %6229 = vmatprep.subr.bf16.mxu0 %v7222_v44 }
 0xb20   :  { %2755 = vmatpush1.bf16.msra.mxu1 %v7948_v10 }
 0xb21   :  { %2756 = vmatprep.subr.bf16.mxu1 %v7961_v13 }
 0xb22   :  { %6230 = vmatpush3.bf16.msra.mxu0 %v6659_v5 }
 0xb23   :  { %6231 = vmatprep.subr.bf16.mxu0 %v7222_v44 }
 0xb24   :  { %2757 = vmatpush1.bf16.msra.mxu1 %v7972_v15 }
 0xb25   :  { %2758 = vmatprep.subr.bf16.mxu1 %v7978_v16 }
 0xb26   :  { %6232 = vmatpush3.bf16.msra.mxu0 %v6660_v4 }
 0xb27   :  { %6233 = vmatprep.subr.bf16.mxu0 %v7222_v44 }
 0xb28   :  { %2759 = vmatpush1.bf16.msra.mxu1 %v7988_v18 }
 0xb29   :  { %6239 = vmatprep.subr.bf16.mxu1 %v7222_v44 }
 0xb2a   :  { %6234 = vmatpush3.bf16.msra.mxu0 %v6661_v9 }
 0xb2b   :  { %2777 = vmatmul.mubr.bf16.vlgmr.msra.gmra.mrb[28].mxu1 %v2647_v33  ;;  %3396 = vmatprep.subr.bf16.mxu0 %v8068_v48 }
 0xb2c   :  { %6255 = vmatprep.mubr.msk.bf16.mxu1 %vm7026_vm0, %v7222_v44 }
 0xbde   :  { %v2575_v10 = vpop.f32.mrb[24].mxu1  ;;  %v2616_v11 = vpop.f32.mrb[28].mxu0 }
 0xbdf   :  { %v2576_v13 = vadd.f32 %v2575_v10, %v7739_v26  ;;  %v2577_v15 = vpop.f32.mrb[25].mxu1  ;;  %v2618_v16 = vpop.f32.mrb[29].mxu0  ;;  %v2617_v63 = vadd.f32 %v2616_v11, %v7747_v35 }
 0xbe0   :  { %v2579_v18 = vpop.f32.mrb[26].mxu1  ;;  %v2620_v56 = vpop.f32.mrb[30].mxu0  ;;  %v2578_v30 = vadd.f32 %v2577_v15, %v7741_v47  ;;  %v2619_v62 = vadd.f32 %v2618_v16, %v7745_v36  ;;  %v9658_v16 = vld [vmem:[#allocation14_spill] sm:$0xff] }
 0xbe1   :  { %v5674_v14 = vmul.f32 -1.442695, %v2576_v13  ;;  %v2580_v31 = vpop.f32.mrb[27].mxu1  ;;  %v2621_v32 = vpop.f32.mrb[31].mxu0  ;;  %v9659_v18 = vld [vmem:[#allocation15_spill] sm:$0xff]  ;;  %v9660_v56 = vld [vmem:[#allocation16_spill] sm:$0xff] }
 0xbe2   :  { %v5675_v34 = vmul.f32 -1.442695, %v2578_v30  ;;  %v9662_v31 = vld [vmem:[#allocation18_spill] sm:$0xff]  ;;  %v9663_v32 = vld [vmem:[#allocation19_spill] sm:$0xff]  ;;  %v9664_v30 = vld [vmem:[#allocation20_spill] sm:$0xff] }
 0xbe3   :  { %6862 = vpow2.f32 %v5674_v14  ;;  %v9661_v14 = vld [vmem:[#allocation17_spill] sm:$0xff] }
 0xbe4   :  { %6864 = vpow2.f32 %v5675_v34  ;;  %v9665_v34 = vld [vmem:[#allocation21_spill] sm:$0xff] }
 0xbed   :  { %v6863_v51 = vpop.eup %6862 }
 0xbee   :  { %v2626_v22 = vadd.f32 1.0, %v6863_v51  ;;  %v6865_v48 = vpop.eup %6864  ;;  %v9666_v51 = vld [vmem:[#allocation22_spill] sm:$0xff] }
 0xbef   :  { %v2632_v25 = vadd.f32 1.0, %v6865_v48  ;;  %v9668_v48 = vld [vmem:[#allocation24_spill] sm:$0xff] }
 0xbf0   :  { %6866 = vrcp.f32 %v2626_v22  ;;  %v9667_v22 = vld [vmem:[#allocation23_spill] sm:$0xff] }
 0xbf1   :  { %6868 = vrcp.f32 %v2632_v25  ;;  %v9669_v25 = vld [vmem:[#allocation25_spill] sm:$0xff] }
 0xbfa   :  { %v6867_v59 = vpop.eup %6866 }
 0xbfb   :  { %v2635_v1 = vmul.f32 %v6867_v59, %v2619_v62  ;;  %v6869_v5 = vpop.eup %6868  ;;  %v9670_v62 = vld [vmem:[#allocation26_spill] sm:$0xff]  ;;  %v9671_v59 = vld [vmem:[#allocation27_spill] sm:$0xff] }
 0xbfc   :  { %v2638_v4 = vsub.f32 1.0, %v6869_v5  ;;  %v2640_v9 = vmul.f32 %v6869_v5, %v8007_v38  ;;  %v9654_v38 = vld [vmem:[#allocation43_spill] sm:$0xff] }
 0xbfd   :  { %v2636_v2 = vadd.f32 %v2635_v1, %v2617_v63  ;;  %v9672_v63 = vld [vmem:[#allocation28_spill] sm:$0xff]  ;;  %v9673_v1 = vld [vmem:[#allocation29_spill] sm:$0xff]  ;;  %v9675_v5 = vld [vmem:[#allocation31_spill] sm:$0xff] }
 0xbff   :  { %6870 = vtanh.f32 %v2636_v2  ;;  %v9674_v2 = vld [vmem:[#allocation30_spill] sm:$0xff] }
 0xc09   :  { %v6871_v7 = vpop.eup %6870 }
 0xc0a   :  { %v2639_v33 = vmul.f32 %v6871_v7, %v2638_v4  ;;  %v9676_v4 = vld [vmem:[#allocation32_spill] sm:$0xff]  ;;  %v9677_v7 = vld [vmem:[#allocation33_spill] sm:$0xff] }
 0xc0c   :  { %v8516_v10 = vadd.f32 %v2640_v9, %v2639_v33  ;;  %v9678_v33 = vld [vmem:[#allocation34_spill] sm:$0xff]  ;;  %v9679_v9 = vld [vmem:[#allocation35_spill] sm:$0xff] }
 0xc0e   :  { %2642 = vst [vmem:[#allocation6 + $0x2] sm:$0x1] %v8516_v10  ;;  %v8521_v13 = vpack.c.bf16 %v8516_v10, %v8516_v10 }
 0xc10   :  { %6236 = vmatmul.mubr.bf16.vlgmr.msra.gmra.mrb[32].mxu0 %v8521_v13 }
 0xc11   :  { %3428 = vmatprep.mubr.bf16.mxu0 %v8521_v13  ;;  %3397 = vmatpush1.bf16.msra.mxu0 %v8063_v24  ;;  %v9655_v24 = vld [vmem:[#allocation45_spill] sm:$0xff] }
 0xc12   :  { %3398 = vmatprep.subr.bf16.mxu0 %v8078_v52  ;;  %v2778_v52 = vpop.f32.mrb[28].mxu1 }
 0xc15   :  { %3399 = vmatpush1.bf16.msra.mxu0 %v8086_v23  ;;  %v8556_v23 = vpop.f32.mrb[29].mxu1 }
 0xc16   :  { %3400 = vmatprep.subr.bf16.mxu0 %v8092_v45  ;;  %v2782_v45 = vpop.f32.mrb[30].mxu1 }
 0xc17   :  { %v9684_v45 = vld [vmem:[#allocation40_spill] sm:$0xff] }
 0xc19   :  { %3401 = vmatpush1.bf16.msra.mxu0 %v8098_v46  ;;  %v2783_v46 = vpop.f32.mrb[31].mxu1 }
 0xc1a   :  { %3402 = vmatprep.subr.bf16.mxu0 %v8104_v57  ;;  %v9685_v46 = vld [vmem:[#allocation41_spill] sm:$0xff] }
 0xc1d   :  { %3403 = vmatpush1.bf16.msra.mxu0 %v8110_v42 }
 0xc1e   :  { %3404 = vmatprep.subr.bf16.mxu0 %v8116_v43 }
 0xc21   :  { %3405 = vmatpush1.bf16.msra.mxu0 %v8122_v41 }
 0xc22   :  { %3406 = vmatprep.subr.bf16.mxu0 %v8128_v40 }
 0xc25   :  { %3407 = vmatpush1.bf16.msra.mxu0 %v8134_v53  ;;  %v9656_v53 = vld [vmem:[#allocation12_spill] sm:$0xff] }
 0xc26   :  { %3408 = vmatprep.subr.bf16.mxu0 %v8140_v39 }
 0xc29   :  { %3409 = vmatpush1.bf16.msra.mxu0 %v8146_v50 }
 0xc2a   :  { %3410 = vmatprep.subr.bf16.mxu0 %v8152_v37  ;;  %v6662_v37 = vld [vmem:[%s9463_s2] sm:$0xff]  }
 0xc2b   :  { %6240 = vmatpush3.bf16.msra.mxu1 %v6662_v37 }
 0xc2c   :  { %6241 = vmatprep.subr.bf16.mxu1 %v7222_v44 }
 0xc2d   :  { %3411 = vmatpush1.bf16.msra.mxu0 %v8158_v60  ;;  %v6663_v60 = vld [vmem:[%s9463_s2 + $0x8] sm:$0xff]  }
 0xc2e   :  { %3412 = vmatprep.subr.bf16.mxu0 %v8164_v0  ;;  %v6664_v0 = vld [vmem:[%s9463_s2 + $0x10] sm:$0xff]  }
 0xc2f   :  { %6242 = vmatpush3.bf16.msra.mxu1 %v6663_v60 }
 0xc30   :  { %6243 = vmatprep.subr.bf16.mxu1 %v7222_v44 }
 0xc31   :  { %3413 = vmatpush1.bf16.msra.mxu0 %v8170_v3  ;;  %v6665_v3 = vld [vmem:[%s9463_s2 + $0x18] sm:$0xff]  }
 0xc32   :  { %3414 = vmatprep.subr.bf16.mxu0 %v8176_v6 }
 0xc33   :  { %6244 = vmatpush3.bf16.msra.mxu1 %v6664_v0 }
 0xc34   :  { %6245 = vmatprep.subr.bf16.mxu1 %v7222_v44 }
 0xc35   :  { %3415 = vmatpush1.bf16.msra.mxu0 %v8182_v55 }
 0xc36   :  { %3416 = vmatprep.subr.bf16.mxu0 %v8188_v8 }
 0xc37   :  { %6246 = vmatpush3.bf16.msra.mxu1 %v6665_v3  ;;  %v8646_v3 = vld [vmem:[%s9465_s4 + $0x14] ss:$8 sps:$4 sm:$0xff]  }
 0xc38   :  { %6247 = vmatprep.subr.bf16.mxu1 %v7222_v44 }
 0xc39   :  { %3417 = vmatpush1.bf16.msra.mxu0 %v8194_v12 }
 0xc3a   :  { %3418 = vmatprep.subr.bf16.mxu0 %v8200_v17 }
 0xc3d   :  { %3419 = vmatpush1.bf16.msra.mxu0 %v8206_v19  ;;  %v6666_v19 = vld [vmem:[%s9463_s2 + $0x20] sm:$0xff]  }
 0xc3e   :  { %3420 = vmatprep.subr.bf16.mxu0 %v8212_v20  ;;  %6248 = vmatpush3.bf16.msra.mxu1 %v6666_v19  ;;  %v6667_v20 = vld [vmem:[%s9463_s2 + $0x28] sm:$0xff]   ;;  %v8678_v19 = vld [vmem:[%s9465_s4 + $0x34] ss:$8 sps:$4 sm:$0xff]  }
 0xc3f   :  { %6249 = vmatprep.subr.bf16.mxu1 %v7222_v44 }
 0xc41   :  { %3421 = vmatpush1.bf16.msra.mxu0 %v8218_v58  ;;  %v6668_v58 = vld [vmem:[%s9463_s2 + $0x30] sm:$0xff]  }
 0xc42   :  { %3422 = vmatprep.subr.bf16.mxu0 %v8224_v21  ;;  %6250 = vmatpush3.bf16.msra.mxu1 %v6667_v20  ;;  %v6669_v21 = vld [vmem:[%s9463_s2 + $0x38] sm:$0xff]   ;;  %v6684_v20 = vld [vmem:[%s9466_s5 + $0x10] sm:$0xff]  }
 0xc43   :  { %6251 = vmatprep.subr.bf16.mxu1 %v7222_v44 }
 0xc45   :  { %3423 = vmatpush1.bf16.msra.mxu0 %v8230_v54  ;;  %v9657_v54 = vld [vmem:[#allocation13_spill] sm:$0xff] }
 0xc46   :  { %3424 = vmatprep.subr.bf16.mxu0 %v8401_v29  ;;  %6252 = vmatpush3.bf16.msra.mxu1 %v6668_v58  ;;  %v8686_v58 = vld [vmem:[%s9465_s4 + $0x30] ss:$8 sps:$4 sm:$0xff]  }
 0xc47   :  { %6253 = vmatprep.subr.bf16.mxu1 %v7222_v44 }
 0xc49   :  { %3425 = vmatpush1.bf16.msra.mxu0 %v8411_v28 }
 0xc4a   :  { %3426 = vmatprep.subr.bf16.mxu0 %v9654_v38  ;;  %6254 = vmatpush3.bf16.msra.mxu1 %v6669_v21  ;;  %v9681_v38 = vld [vmem:[#allocation37_spill] sm:$0xff] }
 0xc4b   :  { %3437 = vmatprep.subr.bf16.mxu1 %v9657_v54  ;;  %v8694_v21 = vld [vmem:[%s9465_s4 + $0x44] ss:$8 sps:$4 sm:$0xff]   ;;  %v6688_v54 = vld [vmem:[%s9466_s5 + $0x18] sm:$0xff]  }
 0xc4d   :  { %3427 = vmatpush1.bf16.msra.mxu0 %v9655_v24  ;;  %v9682_v24 = vld [vmem:[#allocation38_spill] sm:$0xff] }
 0xce3   :  { %v2884_v57 = vpop.f32.mrb[32].mxu0 }
 0xce4   :  { %v2890_v42 = vadd.f32 %v2884_v57, %v2778_v52  ;;  %v6237_v43 = vpop.f32.mrb[33].mxu0  ;;  %v9683_v52 = vld [vmem:[#allocation39_spill] sm:$0xff]  ;;  %v9686_v57 = vld [vmem:[#allocation42_spill] sm:$0xff] }
 0xce5   :  { %v2887_v41 = vpop.f32.mrb[34].mxu0 }
 0xce6   :  { %v6238_v40 = vpop.f32.mrb[35].mxu0  ;;  %v2891_v39 = vadd.f32 %v9656_v53, %v2890_v42  ;;  %v9687_v42 = vld [vmem:[#allocation44_spill] sm:$0xff] }
 0xce8   :  { %v2892_v50 = vsel %vm305_vm1, %v2891_v39, -inf }
 0xce9   :  { %2893 = vmax.xlane.f32.xlu0 %v2892_v50 }
 0xd76   :  { %v2894_v6 = vpop.xlane.xlu0 %2893 }
 0xd77   :  { %v2895_v55 = vsub.f32 %v2891_v39, %v2894_v6  ;;  %v6676_v6 = vld [vmem:[%s9466_s5] sm:$0xff]  }
 0xd79   :  { %v2896_v8 = vmul.f32 1.442695, %v2895_v55  ;;  %v8654_v55 = vld [vmem:[%s9465_s4 + $0x10] ss:$8 sps:$4 sm:$0xff]  }
 0xd7b   :  { %6872 = vpow2.f32 %v2896_v8  ;;  %v8662_v8 = vld [vmem:[%s9465_s4 + $0x24] ss:$8 sps:$4 sm:$0xff]  }
 0xd85   :  { %v6873_v12 = vpop.eup %6872 }
 0xd86   :  { %v2898_v17 = vsel %vm305_vm1, %v6873_v12, 0.0 }
 0xd87   :  { %2899 = vadd.xlane.f32.xlu1 %v2898_v17  ;;  %v8670_v17 = vld [vmem:[%s9465_s4 + $0x20] ss:$8 sps:$4 sm:$0xff]  }
 0xe14   :  { %v2900_v29 = vpop.xlane.xlu1 %2899 }
 0xe15   :  { %6874 = vrcp.f32 %v2900_v29  ;;  %v8702_v29 = vld [vmem:[%s9465_s4 + $0x40] ss:$8 sps:$4 sm:$0xff]  }
 0xe1f   :  { %v6875_v28 = vpop.eup %6874 }
 0xe20   :  { %v2902_v11 = vmul.f32 %v6875_v28, %v6873_v12  ;;  %v6680_v12 = vld [vmem:[%s9466_s5 + $0x8] sm:$0xff]   ;;  %v8710_v28 = vld [vmem:[%s9465_s4 + $0x50] ss:$8 sps:$4 sm:$0xff]  }
 0xe22   :  { %v2903_v15 = vpack.c.bf16 %v2902_v11, %v2902_v11  ;;  %3498 = vst [vmem:[#allocation8 + $0x3] sm:$0x1] %v2902_v11  ;;  %v8715_v11 = vld [vmem:[%s9465_s4 + $0x54] ss:$8 sps:$4 sm:$0xff]  }
 0xe24   :  { %6256 = vmatmul.mubr.bf16.vlgmr.msra.gmra.mrb[32].mxu1 %v2903_v15  ;;  %v6692_v15 = vld [vmem:[%s9466_s5 + $0x20] sm:$0xff]  }
 0xe25   :  { %3469 = vmatprep.mubr.bf16.mxu1 %v8521_v13  ;;  %3438 = vmatpush1.bf16.msra.mxu1 %v9658_v16  ;;  %v9680_v13 = vld [vmem:[#allocation36_spill] sm:$0xff]  ;;  %v8723_v16 = vld [vmem:[%s9465_s4 + $0x64] ss:$8 sps:$4 sm:$0xff]  }
 0xe26   :  { %3439 = vmatprep.subr.bf16.mxu1 %v9659_v18  ;;  %v6696_v18 = vld [vmem:[%s9466_s5 + $0x28] sm:$0xff]  }
 0xe29   :  { %3440 = vmatpush1.bf16.msra.mxu1 %v9660_v56  ;;  %v8734_v56 = vld [vmem:[%s9465_s4 + $0x60] ss:$8 sps:$4 sm:$0xff]  }
 0xe2a   :  { %3441 = vmatprep.subr.bf16.mxu1 %v9661_v14  ;;  %v8740_v14 = vld [vmem:[%s9465_s4 + $0x74] ss:$8 sps:$4 sm:$0xff]  }
 0xe2d   :  { %3442 = vmatpush1.bf16.msra.mxu1 %v9662_v31  ;;  %v6700_v31 = vld [vmem:[%s9466_s5 + $0x30] sm:$0xff]  }
 0xe2e   :  { %3443 = vmatprep.subr.bf16.mxu1 %v9663_v32  ;;  %v8750_v32 = vld [vmem:[%s9465_s4 + $0x70] ss:$8 sps:$4 sm:$0xff]  }
 0xe31   :  { %3444 = vmatpush1.bf16.msra.mxu1 %v9664_v30  ;;  %v3501_v30 = vld [vmem:[%s3500_s19] sm:$0x1] }
 0xe32   :  { %3445 = vmatprep.subr.bf16.mxu1 %v9665_v34  ;;  %v6701_v34 = vld [vmem:[%s9466_s5 + $0x38] sm:$0xff]  }
 0xe35   :  { %3446 = vmatpush1.bf16.msra.mxu1 %v9666_v51  ;;  %v3502_v51 = vpack.c.bf16 %v3501_v30, %v3501_v30 }
 0xe36   :  { %3447 = vmatprep.subr.bf16.mxu1 %v9667_v22 }
 0xe39   :  { %3448 = vmatpush1.bf16.msra.mxu1 %v9668_v48 }
 0xe3a   :  { %3449 = vmatprep.subr.bf16.mxu1 %v9669_v25 }
 0xe3d   :  { %3450 = vmatpush1.bf16.msra.mxu1 %v9670_v62 }
 0xe3e   :  { %3451 = vmatprep.subr.bf16.mxu1 %v9671_v59 }
 0xe41   :  { %3452 = vmatpush1.bf16.msra.mxu1 %v9672_v63 }
 0xe42   :  { %3453 = vmatprep.subr.bf16.mxu1 %v9673_v1 }
 0xe45   :  { %3454 = vmatpush1.bf16.msra.mxu1 %v9674_v2 }
 0xe46   :  { %3455 = vmatprep.subr.bf16.mxu1 %v9675_v5 }
 0xe49   :  { %3456 = vmatpush1.bf16.msra.mxu1 %v9676_v4 }
 0xe4a   :  { %3457 = vmatprep.subr.bf16.mxu1 %v9677_v7 }
 0xe4d   :  { %3458 = vmatpush1.bf16.msra.mxu1 %v9678_v33 }
 0xe4e   :  { %3459 = vmatprep.subr.bf16.mxu1 %v9679_v9 }
 0xe51   :  { %3460 = vmatpush1.bf16.msra.mxu1 %v9680_v13 }
 0xe52   :  { %3461 = vmatprep.subr.bf16.mxu1 %v9681_v38 }
 0xe55   :  { %3462 = vmatpush1.bf16.msra.mxu1 %v9682_v24 }
 0xe56   :  { %3463 = vmatprep.subr.bf16.mxu1 %v9683_v52 }
 0xe59   :  { %3464 = vmatpush1.bf16.msra.mxu1 %v9684_v45 }
 0xe5a   :  { %3465 = vmatprep.subr.bf16.mxu1 %v9685_v46 }
 0xe5d   :  { %3466 = vmatpush1.bf16.msra.mxu1 %v9686_v57 }
 0xe5e   :  { %3467 = vmatprep.subr.bf16.mxu1 %v9687_v42 }
 0xe61   :  { %3468 = vmatpush1.bf16.msra.mxu1 %v8440_v27  ;;  %v8634_v27 = vld [vmem:[%s9465_s4 + $0x4] ss:$8 sps:$4 sm:$0xff]  }
 0xe62   :  { %6259 = vmatprep.subr.bf16.mxu1 %v7222_v44  ;;  %3599 = vmatprep.subr.bf16.mxu0 %v8634_v27 }
 0xef7   :  { %v3002_v43 = vpop.f32.mrb[32].mxu1 }
 0xef8   :  { %v3008_v41 = vadd.f32 %v3002_v43, %v8556_v23  ;;  %v6257_v40 = vpop.f32.mrb[33].mxu1  ;;  %v8639_v23 = vld [vmem:[%s9465_s4] ss:$8 sps:$4 sm:$0xff]   ;;  %s4355_s4 = scalar_lea.vmem %s9462_s1, %s5874_s15 }
 0xef9   :  { %v3005_v39 = vpop.f32.mrb[34].mxu1 }
 0xefa   :  { %v3009_v50 = vadd.f32 %v8452_v49, %v3008_v41  ;;  %v6258_v37 = vpop.f32.mrb[35].mxu1 }
 0xefc   :  { %v3010_v60 = vmax.f32 %v3009_v50, 0.0 }
 0xefe   :  { %v3011_v0 = vpack.c.bf16 %v3010_v60, %v3010_v60 }
 0xf00   :  { %3429 = vmatmul.mubr.bf16.vlgmr.msra.gmra.mrb[36].mxu0 %v3011_v0  ;;  %3470 = vmatmul.mubr.bf16.vlgmr.msra.gmra.mrb[36].mxu1 %v3011_v0 }
 0xf01   :  { %3631 = vmatprep.mubr.bf16.mxu0 %v9619_v61  ;;  %6275 = vmatprep.mubr.msk.bf16.mxu1 %vm7026_vm0, %v7222_v44 }
 0xf02   :  { %3600 = vmatpush1.bf16.msra.mxu0 %v8639_v23  ;;  %6260 = vmatpush3.bf16.msra.mxu1 %v6676_v6 }
 0xf03   :  { %3601 = vmatprep.subr.bf16.mxu0 %v8646_v3  ;;  %6261 = vmatprep.subr.bf16.mxu1 %v7222_v44 }
 0xf06   :  { %3602 = vmatpush1.bf16.msra.mxu0 %v8654_v55  ;;  %6262 = vmatpush3.bf16.msra.mxu1 %v6680_v12 }
 0xf07   :  { %3603 = vmatprep.subr.bf16.mxu0 %v8662_v8  ;;  %6263 = vmatprep.subr.bf16.mxu1 %v7222_v44 }
 0xf0a   :  { %3604 = vmatpush1.bf16.msra.mxu0 %v8670_v17  ;;  %6264 = vmatpush3.bf16.msra.mxu1 %v6684_v20 }
 0xf0b   :  { %3605 = vmatprep.subr.bf16.mxu0 %v8678_v19  ;;  %6265 = vmatprep.subr.bf16.mxu1 %v7222_v44 }
 0xf0e   :  { %3606 = vmatpush1.bf16.msra.mxu0 %v8686_v58  ;;  %6266 = vmatpush3.bf16.msra.mxu1 %v6688_v54 }
 0xf0f   :  { %3607 = vmatprep.subr.bf16.mxu0 %v8694_v21  ;;  %6267 = vmatprep.subr.bf16.mxu1 %v7222_v44 }
 0xf12   :  { %3608 = vmatpush1.bf16.msra.mxu0 %v8702_v29  ;;  %6268 = vmatpush3.bf16.msra.mxu1 %v6692_v15 }
 0xf13   :  { %3609 = vmatprep.subr.bf16.mxu0 %v8715_v11  ;;  %6269 = vmatprep.subr.bf16.mxu1 %v7222_v44 }
 0xf16   :  { %3610 = vmatpush1.bf16.msra.mxu0 %v8710_v28  ;;  %6270 = vmatpush3.bf16.msra.mxu1 %v6696_v18 }
 0xf17   :  { %3611 = vmatprep.subr.bf16.mxu0 %v8723_v16  ;;  %6271 = vmatprep.subr.bf16.mxu1 %v7222_v44 }
 0xf1a   :  { %3612 = vmatpush1.bf16.msra.mxu0 %v8734_v56  ;;  %6272 = vmatpush3.bf16.msra.mxu1 %v6700_v31 }
 0xf1b   :  { %3613 = vmatprep.subr.bf16.mxu0 %v8740_v14  ;;  %6273 = vmatprep.subr.bf16.mxu1 %v7222_v44 }
 0xf1e   :  { %3614 = vmatpush1.bf16.msra.mxu0 %v8750_v32  ;;  %6274 = vmatpush3.bf16.msra.mxu1 %v6701_v34 }
 0xf1f   :  { %6279 = vmatprep.subr.bf16.mxu0 %v7222_v44 }
 0xf21   :  { %3632 = vmatmul.mubr.bf16.vlgmr.msra.gmra.mrb[40].mxu0 %v3502_v51  ;;  %v6702_v51 = vld [vmem:[%s9463_s2] sm:$0xff]  }
 0xf22   :  { %6295 = vmatprep.mubr.msk.bf16.mxu0 %vm7026_vm0, %v7222_v44  ;;  %6280 = vmatpush3.bf16.msra.mxu0 %v6702_v51  ;;  %v8969_v51 = vld [vmem:[%s9469_s8 + $0x184] ss:$16 sps:$4 sm:$0xff]  }
 0xf23   :  { %6281 = vmatprep.subr.bf16.mxu0 %v7222_v44 }
 0xfd3   :  { %v3430_v22 = vpop.f32.mrb[36].mxu0  ;;  %v3471_v48 = vpop.f32.mrb[36].mxu1 }
 0xfd4   :  { %v3431_v25 = vadd.f32 %v3430_v22, %v7739_v26  ;;  %v3432_v62 = vpop.f32.mrb[37].mxu0  ;;  %v3473_v59 = vpop.f32.mrb[37].mxu1  ;;  %v3472_v46 = vadd.f32 %v3471_v48, %v7747_v35  ;;  %v6703_v22 = vld [vmem:[%s9463_s2 + $0x8] sm:$0xff]   ;;  %v6704_v48 = vld [vmem:[%s9463_s2 + $0x10] sm:$0xff]  }
 0xfd5   :  { %v3434_v63 = vpop.f32.mrb[38].mxu0  ;;  %v3475_v1 = vpop.f32.mrb[38].mxu1  ;;  %v3433_v7 = vadd.f32 %v3432_v62, %v7741_v47  ;;  %v3474_v52 = vadd.f32 %v3473_v59, %v7745_v36  ;;  %6282 = vmatpush3.bf16.msra.mxu0 %v6703_v22  ;;  %v8975_v22 = vld [vmem:[%s9469_s8 + $0x180] ss:$16 sps:$4 sm:$0xff]  }
 0xfd6   :  { %v5773_v2 = vmul.f32 -1.442695, %v3431_v25  ;;  %v3435_v5 = vpop.f32.mrb[39].mxu0  ;;  %v3476_v4 = vpop.f32.mrb[39].mxu1  ;;  %6283 = vmatprep.subr.bf16.mxu0 %v7222_v44 }
 0xfd7   :  { %v5774_v33 = vmul.f32 -1.442695, %v3433_v7  ;;  %v6707_v5 = vld [vmem:[%s9463_s2 + $0x28] sm:$0xff]   ;;  %v6708_v4 = vld [vmem:[%s9463_s2 + $0x30] sm:$0xff]   ;;  %v6709_v7 = vld [vmem:[%s9463_s2 + $0x38] sm:$0xff]  }
 0xfd8   :  { %6876 = vpow2.f32 %v5773_v2  ;;  %v6706_v2 = vld [vmem:[%s9463_s2 + $0x20] sm:$0xff]  }
 0xfd9   :  { %6878 = vpow2.f32 %v5774_v33  ;;  %6284 = vmatpush3.bf16.msra.mxu0 %v6704_v48  ;;  %v8820_v33 = vld [vmem:[%s9469_s8] ss:$16 sps:$4 sm:$0xff]   ;;  %v8981_v48 = vld [vmem:[%s9469_s8 + $0x1a4] ss:$16 sps:$4 sm:$0xff]  }
 0xfda   :  { %6285 = vmatprep.subr.bf16.mxu0 %v7222_v44 }
 0xfe2   :  { %v6877_v9 = vpop.eup %6876 }
 0xfe3   :  { %v3481_v13 = vadd.f32 1.0, %v6877_v9  ;;  %v6879_v38 = vpop.eup %6878  ;;  %v8825_v9 = vld [vmem:[%s9469_s8 + $0x4] ss:$16 sps:$4 sm:$0xff]  }
 0xfe4   :  { %v3487_v24 = vadd.f32 1.0, %v6879_v38  ;;  %v8835_v38 = vld [vmem:[%s9469_s8 + $0x24] ss:$16 sps:$4 sm:$0xff]   ;;  %4251 = vmatprep.subr.bf16.mxu1 %v8825_v9 }
 0xfe5   :  { %6880 = vrcp.f32 %v3481_v13  ;;  %v8830_v13 = vld [vmem:[%s9469_s8 + $0xc] ss:$16 sps:$4 sm:$0xff]  }
 0xfe6   :  { %6882 = vrcp.f32 %v3487_v24  ;;  %9688 = vst [vmem:[#allocation43_spill] sm:$0xff] %v8830_v13  ;;  %v8843_v24 = vld [vmem:[%s9469_s8 + $0x20] ss:$16 sps:$4 sm:$0xff]  }
 0xfef   :  { %v6881_v45 = vpop.eup %6880 }
 0xff0   :  { %v3490_v57 = vmul.f32 %v6881_v45, %v3474_v52  ;;  %v6883_v43 = vpop.eup %6882  ;;  %v8849_v52 = vld [vmem:[%s9469_s8 + $0x44] ss:$16 sps:$4 sm:$0xff]   ;;  %v8855_v45 = vld [vmem:[%s9469_s8 + $0x40] ss:$16 sps:$4 sm:$0xff]  }
 0xff1   :  { %v3493_v41 = vsub.f32 1.0, %v6883_v43  ;;  %v3495_v50 = vmul.f32 %v6883_v43, %v8516_v10  ;;  %v8879_v43 = vld [vmem:[%s9469_s8 + $0x80] ss:$16 sps:$4 sm:$0xff]  }
 0xff2   :  { %v3491_v42 = vadd.f32 %v3490_v57, %v3472_v46  ;;  %v8861_v46 = vld [vmem:[%s9469_s8 + $0x64] ss:$16 sps:$4 sm:$0xff]   ;;  %v8867_v57 = vld [vmem:[%s9469_s8 + $0x60] ss:$16 sps:$4 sm:$0xff]  }
 0xff4   :  { %6884 = vtanh.f32 %v3491_v42  ;;  %v3633_v0 = vpop.f32.mrb[40].mxu0  ;;  %v8873_v42 = vld [vmem:[%s9469_s8 + $0x84] ss:$16 sps:$4 sm:$0xff]  }
 0xff5   :  { %v8778_v6 = vpop.f32.mrb[41].mxu0 }
 0xff6   :  { %v3637_v12 = vpop.f32.mrb[42].mxu0 }
 0xff7   :  { %v3638_v20 = vpop.f32.mrb[43].mxu0  ;;  %v8915_v12 = vld [vmem:[%s9469_s8 + $0xe0] ss:$16 sps:$4 sm:$0xff]  }
 0xff8   :  { %v8921_v20 = vld [vmem:[%s9469_s8 + $0x104] ss:$16 sps:$4 sm:$0xff]  }
 0xffe   :  { %v6885_v40 = vpop.eup %6884 }
 0xfff   :  { %v3494_v39 = vmul.f32 %v6885_v40, %v3493_v41  ;;  %v8885_v41 = vld [vmem:[%s9469_s8 + $0xa4] ss:$16 sps:$4 sm:$0xff]   ;;  %v8891_v40 = vld [vmem:[%s9469_s8 + $0xa0] ss:$16 sps:$4 sm:$0xff]  }
0x1001   :  { %v8769_v37 = vadd.f32 %v3495_v50, %v3494_v39  ;;  %v8897_v39 = vld [vmem:[%s9469_s8 + $0xc4] ss:$16 sps:$4 sm:$0xff]   ;;  %v8903_v50 = vld [vmem:[%s9469_s8 + $0xc0] ss:$16 sps:$4 sm:$0xff]  }
0x1003   :  { %3497 = vst [vmem:[#allocation6 + $0x3] sm:$0x1] %v8769_v37  ;;  %v8774_v60 = vpack.c.bf16 %v8769_v37, %v8769_v37 }
0x1005   :  { %6276 = vmatmul.mubr.bf16.vlgmr.msra.gmra.mrb[40].mxu1 %v8774_v60 }
0x1006   :  { %4283 = vmatprep.mubr.bf16.mxu1 %v8774_v60  ;;  %4252 = vmatpush1.bf16.msra.mxu1 %v8820_v33 }
0x1007   :  { %4253 = vmatprep.subr.bf16.mxu1 %v8835_v38 }
0x100a   :  { %4254 = vmatpush1.bf16.msra.mxu1 %v8843_v24 }
0x100b   :  { %4255 = vmatprep.subr.bf16.mxu1 %v8849_v52 }
0x100e   :  { %4256 = vmatpush1.bf16.msra.mxu1 %v8855_v45 }
0x100f   :  { %4257 = vmatprep.subr.bf16.mxu1 %v8861_v46 }
0x1012   :  { %4258 = vmatpush1.bf16.msra.mxu1 %v8867_v57 }
0x1013   :  { %4259 = vmatprep.subr.bf16.mxu1 %v8873_v42 }
0x1016   :  { %4260 = vmatpush1.bf16.msra.mxu1 %v8879_v43 }
0x1017   :  { %4261 = vmatprep.subr.bf16.mxu1 %v8885_v41 }
0x101a   :  { %4262 = vmatpush1.bf16.msra.mxu1 %v8891_v40 }
0x101b   :  { %4263 = vmatprep.subr.bf16.mxu1 %v8897_v39 }
0x101e   :  { %4264 = vmatpush1.bf16.msra.mxu1 %v8903_v50 }
0x10d8   :  { %v3739_v54 = vpop.f32.mrb[40].mxu1 }
0x10d9   :  { %v3745_v15 = vadd.f32 %v3739_v54, %v3633_v0  ;;  %v6277_v10 = vpop.f32.mrb[41].mxu1  ;;  %v8909_v0 = vld [vmem:[%s9469_s8 + $0xe4] ss:$16 sps:$4 sm:$0xff]   ;;  %v8927_v54 = vld [vmem:[%s9469_s8 + $0x100] ss:$16 sps:$4 sm:$0xff]  }
0x10da   :  { %v3742_v18 = vpop.f32.mrb[42].mxu1  ;;  %4265 = vmatprep.subr.bf16.mxu1 %v8909_v0  ;;  %v8939_v10 = vld [vmem:[%s9469_s8 + $0x120] ss:$16 sps:$4 sm:$0xff]  }
0x10db   :  { %v6278_v31 = vpop.f32.mrb[43].mxu1  ;;  %v3746_v30 = vadd.f32 %v9656_v53, %v3745_v15  ;;  %v6705_v53 = vld [vmem:[%s9463_s2 + $0x18] sm:$0xff]   ;;  %4266 = vmatpush1.bf16.msra.mxu1 %v8915_v12  ;;  %v8933_v15 = vld [vmem:[%s9469_s8 + $0x124] ss:$16 sps:$4 sm:$0xff]  }
0x10dc   :  { %6286 = vmatpush3.bf16.msra.mxu0 %v6705_v53  ;;  %4267 = vmatprep.subr.bf16.mxu1 %v8921_v20  ;;  %v8945_v18 = vld [vmem:[%s9469_s8 + $0x144] ss:$16 sps:$4 sm:$0xff]   ;;  %v8951_v31 = vld [vmem:[%s9469_s8 + $0x140] ss:$16 sps:$4 sm:$0xff]  }
0x10dd   :  { %v3747_v34 = vsel %vm305_vm1, %v3746_v30, -inf  ;;  %6287 = vmatprep.subr.bf16.mxu0 %v7222_v44  ;;  %v8987_v53 = vld [vmem:[%s9469_s8 + $0x1a0] ss:$16 sps:$4 sm:$0xff]  }
0x10de   :  { %3748 = vmax.xlane.f32.xlu0 %v3747_v34  ;;  %v8963_v34 = vld [vmem:[%s9469_s8 + $0x160] ss:$16 sps:$4 sm:$0xff]  }
0x10df   :  { %4268 = vmatpush1.bf16.msra.mxu1 %v8927_v54 }
0x10e0   :  { %6288 = vmatpush3.bf16.msra.mxu0 %v6706_v2  ;;  %4269 = vmatprep.subr.bf16.mxu1 %v8933_v15 }
0x10e1   :  { %6289 = vmatprep.subr.bf16.mxu0 %v7222_v44 }
0x10e3   :  { %4270 = vmatpush1.bf16.msra.mxu1 %v8939_v10 }
0x10e4   :  { %6290 = vmatpush3.bf16.msra.mxu0 %v6707_v5  ;;  %4271 = vmatprep.subr.bf16.mxu1 %v8945_v18  ;;  %v9000_v5 = vld [vmem:[%s9469_s8 + $0x2c] ss:$16 sps:$4 sm:$0xff]  }
0x10e5   :  { %6291 = vmatprep.subr.bf16.mxu0 %v7222_v44  ;;  %9690 = vst [vmem:[#allocation12_spill] sm:$0xff] %v9000_v5 }
0x10e7   :  { %4272 = vmatpush1.bf16.msra.mxu1 %v8951_v31 }
0x10e8   :  { %6292 = vmatpush3.bf16.msra.mxu0 %v6708_v4  ;;  %v9013_v4 = vld [vmem:[%s9469_s8 + $0x4c] ss:$16 sps:$4 sm:$0xff]  }
0x10e9   :  { %6293 = vmatprep.subr.bf16.mxu0 %v7222_v44  ;;  %9692 = vst [vmem:[#allocation14_spill] sm:$0xff] %v9013_v4 }
0x10ec   :  { %6294 = vmatpush3.bf16.msra.mxu0 %v6709_v7  ;;  %v9025_v7 = vld [vmem:[%s9469_s8 + $0x6c] ss:$16 sps:$4 sm:$0xff]  }
0x10ed   :  { %4292 = vmatprep.subr.bf16.mxu0 %v8830_v13  ;;  %9694 = vst [vmem:[#allocation16_spill] sm:$0xff] %v9025_v7 }
0x116b   :  { %v3749_v25 = vpop.xlane.xlu0 %3748 }
0x116c   :  { %v3750_v62 = vsub.f32 %v3746_v30, %v3749_v25  ;;  %v8957_v30 = vld [vmem:[%s9469_s8 + $0x164] ss:$16 sps:$4 sm:$0xff]  }
0x116d   :  { %4273 = vmatprep.subr.bf16.mxu1 %v8957_v30 }
0x116e   :  { %v3751_v59 = vmul.f32 1.442695, %v3750_v62  ;;  %4274 = vmatpush1.bf16.msra.mxu1 %v8963_v34 }
0x116f   :  { %4275 = vmatprep.subr.bf16.mxu1 %v8969_v51 }
0x1170   :  { %6886 = vpow2.f32 %v3751_v59 }
0x1172   :  { %4276 = vmatpush1.bf16.msra.mxu1 %v8975_v22 }
0x1173   :  { %4277 = vmatprep.subr.bf16.mxu1 %v8981_v48 }
0x1176   :  { %4278 = vmatpush1.bf16.msra.mxu1 %v8987_v53 }
0x117a   :  { %v8798_v63 = vpop.eup %6886 }
0x117b   :  { %v3753_v1 = vsel %vm305_vm1, %v8798_v63, 0.0 }
0x117c   :  { %3754 = vadd.xlane.f32.xlu1 %v3753_v1  ;;  %v8995_v1 = vld [vmem:[%s9469_s8 + $0x8] ss:$16 sps:$4 sm:$0xff]  }
0x117d   :  { %9689 = vst [vmem:[#allocation45_spill] sm:$0xff] %v8995_v1 }
0x1209   :  { %v3755_v25 = vpop.xlane.xlu1 %3754 }
0x120a   :  { %6888 = vrcp.f32 %v3755_v25  ;;  %v9031_v25 = vld [vmem:[%s9469_s8 + $0x68] ss:$16 sps:$4 sm:$0xff]  }
0x120b   :  { %9695 = vst [vmem:[#allocation17_spill] sm:$0xff] %v9031_v25 }
0x1214   :  { %v6889_v62 = vpop.eup %6888 }
0x1215   :  { %v3757_v59 = vmul.f32 %v6889_v62, %v8798_v63  ;;  %v9007_v63 = vld [vmem:[%s9469_s8 + $0x28] ss:$16 sps:$4 sm:$0xff]   ;;  %v9037_v62 = vld [vmem:[%s9469_s8 + $0x8c] ss:$16 sps:$4 sm:$0xff]  }
0x1216   :  { %9691 = vst [vmem:[#allocation13_spill] sm:$0xff] %v9007_v63  ;;  %9696 = vst [vmem:[#allocation18_spill] sm:$0xff] %v9037_v62 }
0x1217   :  { %v3758_v2 = vpack.c.bf16 %v3757_v59, %v3757_v59  ;;  %4353 = vst [vmem:[#allocation8 + $0x4] sm:$0x1] %v3757_v59  ;;  %v9043_v59 = vld [vmem:[%s9469_s8 + $0x88] ss:$16 sps:$4 sm:$0xff]  }
0x1218   :  { %9697 = vst [vmem:[#allocation19_spill] sm:$0xff] %v9043_v59 }
0x1219   :  { %6296 = vmatmul.mubr.bf16.vlgmr.msra.gmra.mrb[44].mxu0 %v3758_v2  ;;  %v9049_v2 = vld [vmem:[%s9469_s8 + $0xac] ss:$16 sps:$4 sm:$0xff]  }
0x121a   :  { %4324 = vmatprep.mubr.bf16.mxu0 %v8774_v60  ;;  %4293 = vmatpush1.bf16.msra.mxu0 %v8995_v1  ;;  %v9019_v60 = vld [vmem:[%s9469_s8 + $0x48] ss:$16 sps:$4 sm:$0xff]   ;;  %9698 = vst [vmem:[#allocation20_spill] sm:$0xff] %v9049_v2 }
0x121b   :  { %4294 = vmatprep.subr.bf16.mxu0 %v9000_v5  ;;  %9693 = vst [vmem:[#allocation15_spill] sm:$0xff] %v9019_v60 }
0x121e   :  { %4295 = vmatpush1.bf16.msra.mxu0 %v9007_v63 }
0x121f   :  { %4296 = vmatprep.subr.bf16.mxu0 %v9013_v4  ;;  %v9192_v4 = vld [vmem:[%s9469_s8 + $0x1e0] ss:$16 sps:$4 sm:$0xff]  }
0x1222   :  { %4297 = vmatpush1.bf16.msra.mxu0 %v9019_v60  ;;  %v9187_v60 = vld [vmem:[%s9469_s8 + $0x1ec] ss:$16 sps:$4 sm:$0xff]  }
0x1223   :  { %4298 = vmatprep.subr.bf16.mxu0 %v9025_v7  ;;  %v9055_v7 = vld [vmem:[%s9469_s8 + $0xa8] ss:$16 sps:$4 sm:$0xff]  }
0x1224   :  { %9699 = vst [vmem:[#allocation21_spill] sm:$0xff] %v9055_v7 }
0x1226   :  { %4299 = vmatpush1.bf16.msra.mxu0 %v9031_v25  ;;  %v9061_v25 = vld [vmem:[%s9469_s8 + $0xcc] ss:$16 sps:$4 sm:$0xff]  }
0x1227   :  { %4300 = vmatprep.subr.bf16.mxu0 %v9037_v62  ;;  %9700 = vst [vmem:[#allocation22_spill] sm:$0xff] %v9061_v25  ;;  %v9067_v62 = vld [vmem:[%s9469_s8 + $0xc8] ss:$16 sps:$4 sm:$0xff]  }
0x1228   :  { %9701 = vst [vmem:[#allocation23_spill] sm:$0xff] %v9067_v62 }
0x122a   :  { %4301 = vmatpush1.bf16.msra.mxu0 %v9043_v59  ;;  %v9073_v59 = vld [vmem:[%s9469_s8 + $0xec] ss:$16 sps:$4 sm:$0xff]  }
0x122b   :  { %4302 = vmatprep.subr.bf16.mxu0 %v9049_v2  ;;  %9702 = vst [vmem:[#allocation24_spill] sm:$0xff] %v9073_v59  ;;  %v9079_v2 = vld [vmem:[%s9469_s8 + $0xe8] ss:$16 sps:$4 sm:$0xff]  }
0x122c   :  { %9703 = vst [vmem:[#allocation25_spill] sm:$0xff] %v9079_v2 }
0x122e   :  { %4303 = vmatpush1.bf16.msra.mxu0 %v9055_v7  ;;  %v9085_v7 = vld [vmem:[%s9469_s8 + $0x10c] ss:$16 sps:$4 sm:$0xff]  }
0x122f   :  { %4304 = vmatprep.subr.bf16.mxu0 %v9061_v25  ;;  %9704 = vst [vmem:[#allocation26_spill] sm:$0xff] %v9085_v7  ;;  %v9091_v25 = vld [vmem:[%s9469_s8 + $0x108] ss:$16 sps:$4 sm:$0xff]  }
0x1230   :  { %9705 = vst [vmem:[#allocation27_spill] sm:$0xff] %v9091_v25 }
0x1232   :  { %4305 = vmatpush1.bf16.msra.mxu0 %v9067_v62  ;;  %v9097_v62 = vld [vmem:[%s9469_s8 + $0x12c] ss:$16 sps:$4 sm:$0xff]  }
0x1233   :  { %4306 = vmatprep.subr.bf16.mxu0 %v9073_v59  ;;  %9706 = vst [vmem:[#allocation28_spill] sm:$0xff] %v9097_v62  ;;  %v9103_v59 = vld [vmem:[%s9469_s8 + $0x128] ss:$16 sps:$4 sm:$0xff]  }
0x1234   :  { %9707 = vst [vmem:[#allocation29_spill] sm:$0xff] %v9103_v59 }
0x1236   :  { %4307 = vmatpush1.bf16.msra.mxu0 %v9079_v2  ;;  %v9109_v2 = vld [vmem:[%s9469_s8 + $0x14c] ss:$16 sps:$4 sm:$0xff]  }
0x1237   :  { %4308 = vmatprep.subr.bf16.mxu0 %v9085_v7  ;;  %9708 = vst [vmem:[#allocation30_spill] sm:$0xff] %v9109_v2  ;;  %v9115_v7 = vld [vmem:[%s9469_s8 + $0x148] ss:$16 sps:$4 sm:$0xff]  }
0x1238   :  { %9709 = vst [vmem:[#allocation31_spill] sm:$0xff] %v9115_v7 }
0x123a   :  { %4309 = vmatpush1.bf16.msra.mxu0 %v9091_v25  ;;  %v9121_v25 = vld [vmem:[%s9469_s8 + $0x16c] ss:$16 sps:$4 sm:$0xff]  }
0x123b   :  { %4310 = vmatprep.subr.bf16.mxu0 %v9097_v62  ;;  %9710 = vst [vmem:[#allocation32_spill] sm:$0xff] %v9121_v25  ;;  %v9127_v62 = vld [vmem:[%s9469_s8 + $0x168] ss:$16 sps:$4 sm:$0xff]  }
0x123c   :  { %9711 = vst [vmem:[#allocation33_spill] sm:$0xff] %v9127_v62 }
0x123e   :  { %4311 = vmatpush1.bf16.msra.mxu0 %v9103_v59  ;;  %v9133_v59 = vld [vmem:[%s9469_s8 + $0x18c] ss:$16 sps:$4 sm:$0xff]  }
0x123f   :  { %4312 = vmatprep.subr.bf16.mxu0 %v9109_v2  ;;  %9712 = vst [vmem:[#allocation34_spill] sm:$0xff] %v9133_v59  ;;  %v9139_v2 = vld [vmem:[%s9469_s8 + $0x188] ss:$16 sps:$4 sm:$0xff]  }
0x1240   :  { %9713 = vst [vmem:[#allocation35_spill] sm:$0xff] %v9139_v2 }
0x1242   :  { %4313 = vmatpush1.bf16.msra.mxu0 %v9115_v7  ;;  %v9145_v7 = vld [vmem:[%s9469_s8 + $0x1ac] ss:$16 sps:$4 sm:$0xff]  }
0x1243   :  { %4314 = vmatprep.subr.bf16.mxu0 %v9121_v25  ;;  %9714 = vst [vmem:[#allocation36_spill] sm:$0xff] %v9145_v7  ;;  %v9151_v25 = vld [vmem:[%s9469_s8 + $0x1a8] ss:$16 sps:$4 sm:$0xff]  }
0x1244   :  { %9715 = vst [vmem:[#allocation37_spill] sm:$0xff] %v9151_v25 }
0x1246   :  { %4315 = vmatpush1.bf16.msra.mxu0 %v9127_v62  ;;  %v9163_v62 = vld [vmem:[%s9469_s8 + $0x1cc] ss:$16 sps:$4 sm:$0xff]  }
0x1247   :  { %4316 = vmatprep.subr.bf16.mxu0 %v9133_v59  ;;  %v9158_v59 = vld [vmem:[%s9469_s8 + $0x1c4] ss:$16 sps:$4 sm:$0xff]   ;;  %9717 = vst [vmem:[#allocation39_spill] sm:$0xff] %v9163_v62 }
0x1248   :  { %9716 = vst [vmem:[#allocation38_spill] sm:$0xff] %v9158_v59  ;;  %4279 = vmatprep.subr.bf16.mxu1 %v9158_v59 }
0x124a   :  { %4317 = vmatpush1.bf16.msra.mxu0 %v9139_v2  ;;  %v9168_v2 = vld [vmem:[%s9469_s8 + $0x1c0] ss:$16 sps:$4 sm:$0xff]  }
0x124b   :  { %4318 = vmatprep.subr.bf16.mxu0 %v9145_v7  ;;  %9718 = vst [vmem:[#allocation40_spill] sm:$0xff] %v9168_v2  ;;  %v9173_v7 = vld [vmem:[%s9469_s8 + $0x1c8] ss:$16 sps:$4 sm:$0xff]   ;;  %4280 = vmatpush1.bf16.msra.mxu1 %v9168_v2 }
0x124c   :  { %9719 = vst [vmem:[#allocation41_spill] sm:$0xff] %v9173_v7 }
0x124e   :  { %4319 = vmatpush1.bf16.msra.mxu0 %v9151_v25  ;;  %v9182_v25 = vld [vmem:[%s9469_s8 + $0x1e4] ss:$16 sps:$4 sm:$0xff]  }
0x124f   :  { %4320 = vmatprep.subr.bf16.mxu0 %v9163_v62  ;;  %9720 = vst [vmem:[#allocation42_spill] sm:$0xff] %v9182_v25  ;;  %v9197_v62 = vld [vmem:[%s9469_s8 + $0x1e8] ss:$16 sps:$4 sm:$0xff]   ;;  %4281 = vmatprep.subr.bf16.mxu1 %v9182_v25 }
0x1250   :  { %4282 = vmatpush1.bf16.msra.mxu1 %v9192_v4 }
0x1251   :  { %4454 = vmatprep.subr.bf16.mxu1 %v8634_v27  ;;  %v6808_v27 = vld [vmem:[%s9466_s5 + $0x10] sm:$0xff]  }
0x1252   :  { %4321 = vmatpush1.bf16.msra.mxu0 %v9173_v7 }
0x1253   :  { %4322 = vmatprep.subr.bf16.mxu0 %v9187_v60 }
0x1256   :  { %4323 = vmatpush1.bf16.msra.mxu0 %v9197_v62 }
0x1257   :  { %6299 = vmatprep.subr.bf16.mxu0 %v7222_v44 }
0x12ec   :  { %v3857_v7 = vpop.f32.mrb[44].mxu0 }
0x12ed   :  { %v3863_v63 = vadd.f32 %v3857_v7, %v8778_v6  ;;  %v6297_v5 = vpop.f32.mrb[45].mxu0 }
0x12ee   :  { %v3860_v1 = vpop.f32.mrb[46].mxu0 }
0x12ef   :  { %v3864_v13 = vadd.f32 %v8452_v49, %v3863_v63  ;;  %v6298_v2 = vpop.f32.mrb[47].mxu0  ;;  %v6807_v49 = vld [vmem:[%s9466_s5 + $0x8] sm:$0xff]  }
0x12f1   :  { %v3865_v59 = vmax.f32 %v3864_v13, 0.0 }
0x12f3   :  { %v3866_v25 = vpack.c.bf16 %v3865_v59, %v3865_v59 }
0x12f5   :  { %4284 = vmatmul.mubr.bf16.vlgmr.msra.gmra.mrb[44].mxu1 %v3866_v25  ;;  %4325 = vmatmul.mubr.bf16.vlgmr.msra.gmra.mrb[48].mxu0 %v3866_v25 }
0x12f6   :  { %4455 = vmatpush1.bf16.msra.mxu1 %v8639_v23  ;;  %4486 = vmatprep.mubr.bf16.mxu1 %v9619_v61  ;;  %v6806_v61 = vld [vmem:[%s9466_s5] sm:$0xff]   ;;  %v6809_v23 = vld [vmem:[%s9466_s5 + $0x18] sm:$0xff]  }
0x12f7   :  { %4456 = vmatprep.subr.bf16.mxu1 %v8646_v3  ;;  %6315 = vmatprep.mubr.msk.bf16.mxu0 %vm7026_vm0, %v7222_v44  ;;  %v6810_v3 = vld [vmem:[%s9466_s5 + $0x20] sm:$0xff]  }
0x12f8   :  { %6300 = vmatpush3.bf16.msra.mxu0 %v6806_v61 }
0x12f9   :  { %6301 = vmatprep.subr.bf16.mxu0 %v7222_v44 }
0x12fa   :  { %4457 = vmatpush1.bf16.msra.mxu1 %v8654_v55  ;;  %v6811_v55 = vld [vmem:[%s9466_s5 + $0x28] sm:$0xff]  }
0x12fb   :  { %4458 = vmatprep.subr.bf16.mxu1 %v8662_v8  ;;  %v6812_v8 = vld [vmem:[%s9466_s5 + $0x30] sm:$0xff]  }
0x12fc   :  { %6302 = vmatpush3.bf16.msra.mxu0 %v6807_v49 }
0x12fd   :  { %6303 = vmatprep.subr.bf16.mxu0 %v7222_v44 }
0x12fe   :  { %4459 = vmatpush1.bf16.msra.mxu1 %v8670_v17  ;;  %v4356_v17 = vld [vmem:[%s4355_s4] sm:$0x1] }
0x12ff   :  { %4460 = vmatprep.subr.bf16.mxu1 %v8678_v19  ;;  %v4357_v19 = vpack.c.bf16 %v4356_v17, %v4356_v17 }
0x1300   :  { %6304 = vmatpush3.bf16.msra.mxu0 %v6808_v27 }
0x1301   :  { %6305 = vmatprep.subr.bf16.mxu0 %v7222_v44 }
0x1302   :  { %4461 = vmatpush1.bf16.msra.mxu1 %v8686_v58  ;;  %v6813_v58 = vld [vmem:[%s9466_s5 + $0x38] sm:$0xff]  }
0x1303   :  { %4462 = vmatprep.subr.bf16.mxu1 %v8694_v21 }
0x1304   :  { %6306 = vmatpush3.bf16.msra.mxu0 %v6809_v23 }
0x1305   :  { %6307 = vmatprep.subr.bf16.mxu0 %v7222_v44 }
0x1306   :  { %4463 = vmatpush1.bf16.msra.mxu1 %v8702_v29 }
0x1307   :  { %4464 = vmatprep.subr.bf16.mxu1 %v8715_v11 }
0x1308   :  { %6308 = vmatpush3.bf16.msra.mxu0 %v6810_v3 }
0x1309   :  { %6309 = vmatprep.subr.bf16.mxu0 %v7222_v44 }
0x130a   :  { %4465 = vmatpush1.bf16.msra.mxu1 %v8710_v28 }
0x130b   :  { %4466 = vmatprep.subr.bf16.mxu1 %v8723_v16 }
0x130c   :  { %6310 = vmatpush3.bf16.msra.mxu0 %v6811_v55 }
0x130d   :  { %6311 = vmatprep.subr.bf16.mxu0 %v7222_v44 }
0x130e   :  { %4467 = vmatpush1.bf16.msra.mxu1 %v8734_v56 }
0x130f   :  { %4468 = vmatprep.subr.bf16.mxu1 %v8740_v14 }
0x1310   :  { %6312 = vmatpush3.bf16.msra.mxu0 %v6812_v8 }
0x1311   :  { %6313 = vmatprep.subr.bf16.mxu0 %v7222_v44 }
0x1312   :  { %4469 = vmatpush1.bf16.msra.mxu1 %v8750_v32 }
0x1313   :  { %6319 = vmatprep.subr.bf16.mxu1 %v7222_v44 }
0x1314   :  { %6314 = vmatpush3.bf16.msra.mxu0 %v6813_v58 }
0x1315   :  { %4487 = vmatmul.mubr.bf16.vlgmr.msra.gmra.mrb[48].mxu1 %v4357_v19  ;;  %5106 = vmatprep.subr.bf16.mxu0 %v8825_v9 }
0x1316   :  { %6335 = vmatprep.mubr.msk.bf16.mxu1 %vm7026_vm0, %v7222_v44 }
0x13c8   :  { %v4285_v21 = vpop.f32.mrb[44].mxu1  ;;  %v4326_v29 = vpop.f32.mrb[48].mxu0 }
0x13c9   :  { %v4286_v28 = vadd.f32 %v4285_v21, %v7739_v26  ;;  %v4287_v11 = vpop.f32.mrb[45].mxu1  ;;  %v4328_v16 = vpop.f32.mrb[49].mxu0  ;;  %v4327_v61 = vadd.f32 %v4326_v29, %v7747_v35 }
0x13ca   :  { %v4289_v56 = vpop.f32.mrb[46].mxu1  ;;  %v4330_v14 = vpop.f32.mrb[50].mxu0  ;;  %v4288_v1 = vadd.f32 %v4287_v11, %v7741_v47  ;;  %v4329_v59 = vadd.f32 %v4328_v16, %v7745_v36  ;;  %v9725_v16 = vld [vmem:[#allocation45_spill] sm:$0xff] }
0x13cb   :  { %v5872_v32 = vmul.f32 -1.442695, %v4286_v28  ;;  %v4290_v6 = vpop.f32.mrb[47].mxu1  ;;  %v4331_v13 = vpop.f32.mrb[51].mxu0  ;;  %v9726_v56 = vld [vmem:[#allocation12_spill] sm:$0xff]  ;;  %v9727_v14 = vld [vmem:[#allocation13_spill] sm:$0xff] }
0x13cc   :  { %v5873_v5 = vmul.f32 -1.442695, %v4288_v1  ;;  %v9729_v6 = vld [vmem:[#allocation15_spill] sm:$0xff]  ;;  %v9730_v13 = vld [vmem:[#allocation16_spill] sm:$0xff]  ;;  %v9731_v1 = vld [vmem:[#allocation17_spill] sm:$0xff] }
0x13cd   :  { %6890 = vpow2.f32 %v5872_v32  ;;  %v9728_v32 = vld [vmem:[#allocation14_spill] sm:$0xff] }
0x13ce   :  { %6892 = vpow2.f32 %v5873_v5  ;;  %v9732_v5 = vld [vmem:[#allocation18_spill] sm:$0xff] }
0x13d7   :  { %v6891_v63 = vpop.eup %6890 }
0x13d8   :  { %v4336_v7 = vadd.f32 1.0, %v6891_v63  ;;  %v6893_v9 = vpop.eup %6892  ;;  %v9733_v63 = vld [vmem:[#allocation19_spill] sm:$0xff] }
0x13d9   :  { %v4342_v25 = vadd.f32 1.0, %v6893_v9  ;;  %v9735_v9 = vld [vmem:[#allocation21_spill] sm:$0xff] }
0x13da   :  { %6894 = vrcp.f32 %v4336_v7  ;;  %v9734_v7 = vld [vmem:[#allocation20_spill] sm:$0xff] }
0x13db   :  { %6896 = vrcp.f32 %v4342_v25  ;;  %v9736_v25 = vld [vmem:[#allocation22_spill] sm:$0xff] }
0x13e4   :  { %v6895_v2 = vpop.eup %6894 }
0x13e5   :  { %v4345_v49 = vmul.f32 %v6895_v2, %v4329_v59  ;;  %v6897_v23 = vpop.eup %6896  ;;  %v9737_v59 = vld [vmem:[#allocation23_spill] sm:$0xff]  ;;  %v9738_v2 = vld [vmem:[#allocation24_spill] sm:$0xff] }
0x13e6   :  { %v4348_v3 = vsub.f32 1.0, %v6897_v23  ;;  %v4350_v17 = vmul.f32 %v6897_v23, %v8769_v37  ;;  %v9721_v37 = vld [vmem:[#allocation38_spill] sm:$0xff]  ;;  %v9742_v23 = vld [vmem:[#allocation28_spill] sm:$0xff] }
0x13e7   :  { %v4346_v27 = vadd.f32 %v4345_v49, %v4327_v61  ;;  %v9739_v61 = vld [vmem:[#allocation25_spill] sm:$0xff]  ;;  %v9740_v49 = vld [vmem:[#allocation26_spill] sm:$0xff] }
0x13e9   :  { %6898 = vtanh.f32 %v4346_v27  ;;  %v9741_v27 = vld [vmem:[#allocation27_spill] sm:$0xff] }
0x13f3   :  { %v6899_v55 = vpop.eup %6898 }
0x13f4   :  { %v4349_v8 = vmul.f32 %v6899_v55, %v4348_v3  ;;  %v9743_v3 = vld [vmem:[#allocation29_spill] sm:$0xff]  ;;  %v9744_v55 = vld [vmem:[#allocation30_spill] sm:$0xff] }
0x13f6   :  { %v9268_v19 = vadd.f32 %v4350_v17, %v4349_v8  ;;  %v9745_v8 = vld [vmem:[#allocation31_spill] sm:$0xff]  ;;  %v9746_v17 = vld [vmem:[#allocation32_spill] sm:$0xff] }
0x13f8   :  { %4352 = vst [vmem:[#allocation6 + $0x4] sm:$0x1] %v9268_v19  ;;  %v9273_v58 = vpack.c.bf16 %v9268_v19, %v9268_v19 }
0x13fa   :  { %6316 = vmatmul.mubr.bf16.vlgmr.msra.gmra.mrb[52].mxu0 %v9273_v58 }
0x13fb   :  { %5138 = vmatprep.mubr.bf16.mxu0 %v9273_v58  ;;  %5107 = vmatpush1.bf16.msra.mxu0 %v8820_v33  ;;  %v9722_v33 = vld [vmem:[#allocation40_spill] sm:$0xff] }
0x13fc   :  { %5108 = vmatprep.subr.bf16.mxu0 %v8835_v38  ;;  %v9723_v38 = vld [vmem:[#allocation42_spill] sm:$0xff] }
0x13ff   :  { %5109 = vmatpush1.bf16.msra.mxu0 %v8843_v24  ;;  %v4488_v24 = vpop.f32.mrb[48].mxu1 }
0x1400   :  { %5110 = vmatprep.subr.bf16.mxu0 %v8849_v52  ;;  %v9309_v52 = vpop.f32.mrb[49].mxu1 }
0x1403   :  { %5111 = vmatpush1.bf16.msra.mxu0 %v8855_v45  ;;  %v4492_v45 = vpop.f32.mrb[50].mxu1 }
0x1404   :  { %5112 = vmatprep.subr.bf16.mxu0 %v8861_v46  ;;  %v4493_v46 = vpop.f32.mrb[51].mxu1  ;;  %v9752_v45 = vld [vmem:[#allocation39_spill] sm:$0xff] }
0x1405   :  { %v9753_v46 = vld [vmem:[#allocation41_spill] sm:$0xff] }
0x1407   :  { %5113 = vmatpush1.bf16.msra.mxu0 %v8867_v57 }
0x1408   :  { %5114 = vmatprep.subr.bf16.mxu0 %v8873_v42 }
0x140b   :  { %5115 = vmatpush1.bf16.msra.mxu0 %v8879_v43 }
0x140c   :  { %5116 = vmatprep.subr.bf16.mxu0 %v8885_v41 }
0x140f   :  { %5117 = vmatpush1.bf16.msra.mxu0 %v8891_v40 }
0x1410   :  { %5118 = vmatprep.subr.bf16.mxu0 %v8897_v39  ;;  %v6938_v39 = vld [vmem:[%s9467_s6] sm:$0x1] }
0x1413   :  { %5119 = vmatpush1.bf16.msra.mxu0 %v8903_v50 }
0x1414   :  { %5120 = vmatprep.subr.bf16.mxu0 %v8909_v0 }
0x1417   :  { %5121 = vmatpush1.bf16.msra.mxu0 %v8915_v12  ;;  %v6814_v12 = vld [vmem:[%s9463_s2] sm:$0xff]  }
0x1418   :  { %5122 = vmatprep.subr.bf16.mxu0 %v8921_v20  ;;  %6320 = vmatpush3.bf16.msra.mxu1 %v6814_v12  ;;  %v6815_v20 = vld [vmem:[%s9463_s2 + $0x8] sm:$0xff]  }
0x1419   :  { %6321 = vmatprep.subr.bf16.mxu1 %v7222_v44 }
0x141b   :  { %5123 = vmatpush1.bf16.msra.mxu0 %v8927_v54  ;;  %v6816_v54 = vld [vmem:[%s9463_s2 + $0x10] sm:$0xff]  }
0x141c   :  { %5124 = vmatprep.subr.bf16.mxu0 %v8933_v15  ;;  %6322 = vmatpush3.bf16.msra.mxu1 %v6815_v20  ;;  %v6817_v15 = vld [vmem:[%s9463_s2 + $0x18] sm:$0xff]  }
0x141d   :  { %6323 = vmatprep.subr.bf16.mxu1 %v7222_v44  ;;  %v6825_v20 = vld [vmem:[%s9471_s10 + $0x18] sm:$0xff]  }
0x141f   :  { %5125 = vmatpush1.bf16.msra.mxu0 %v8939_v10 }
0x1420   :  { %5126 = vmatprep.subr.bf16.mxu0 %v8945_v18  ;;  %6324 = vmatpush3.bf16.msra.mxu1 %v6816_v54  ;;  %v6826_v54 = vld [vmem:[%s9471_s10 + $0x20] sm:$0xff]  }
0x1421   :  { %6325 = vmatprep.subr.bf16.mxu1 %v7222_v44 }
0x1423   :  { %5127 = vmatpush1.bf16.msra.mxu0 %v8951_v31 }
0x1424   :  { %5128 = vmatprep.subr.bf16.mxu0 %v8957_v30  ;;  %6326 = vmatpush3.bf16.msra.mxu1 %v6817_v15  ;;  %v6827_v15 = vld [vmem:[%s9471_s10 + $0x28] sm:$0xff]  }
0x1425   :  { %6327 = vmatprep.subr.bf16.mxu1 %v7222_v44 }
0x1427   :  { %5129 = vmatpush1.bf16.msra.mxu0 %v8963_v34 }
0x1428   :  { %5130 = vmatprep.subr.bf16.mxu0 %v8969_v51  ;;  %v6818_v51 = vld [vmem:[%s9463_s2 + $0x20] sm:$0xff]  }
0x1429   :  { %6328 = vmatpush3.bf16.msra.mxu1 %v6818_v51 }
0x142a   :  { %6329 = vmatprep.subr.bf16.mxu1 %v7222_v44 }
0x142b   :  { %5131 = vmatpush1.bf16.msra.mxu0 %v8975_v22  ;;  %v6819_v22 = vld [vmem:[%s9463_s2 + $0x28] sm:$0xff]  }
0x142c   :  { %5132 = vmatprep.subr.bf16.mxu0 %v8981_v48  ;;  %v6820_v48 = vld [vmem:[%s9463_s2 + $0x30] sm:$0xff]  }
0x142d   :  { %6330 = vmatpush3.bf16.msra.mxu1 %v6819_v22 }
0x142e   :  { %6331 = vmatprep.subr.bf16.mxu1 %v7222_v44 }
0x142f   :  { %5133 = vmatpush1.bf16.msra.mxu0 %v8987_v53  ;;  %v6821_v53 = vld [vmem:[%s9463_s2 + $0x38] sm:$0xff]  }
0x1430   :  { %5134 = vmatprep.subr.bf16.mxu0 %v9721_v37  ;;  %v9748_v37 = vld [vmem:[#allocation34_spill] sm:$0xff] }
0x1431   :  { %6332 = vmatpush3.bf16.msra.mxu1 %v6820_v48 }
0x1432   :  { %6333 = vmatprep.subr.bf16.mxu1 %v7222_v44 }
0x1433   :  { %5135 = vmatpush1.bf16.msra.mxu0 %v9722_v33  ;;  %v9749_v33 = vld [vmem:[#allocation35_spill] sm:$0xff] }
0x1434   :  { %5136 = vmatprep.subr.bf16.mxu0 %v9723_v38  ;;  %v9750_v38 = vld [vmem:[#allocation36_spill] sm:$0xff] }
0x1435   :  { %6334 = vmatpush3.bf16.msra.mxu1 %v6821_v53 }
0x1437   :  { %5137 = vmatpush1.bf16.msra.mxu0 %v9192_v4  ;;  %v9724_v4 = vld [vmem:[#allocation43_spill] sm:$0xff] }
0x1438   :  { %6339 = vmatprep.subr.bf16.mxu0 %v7222_v44  ;;  %5147 = vmatprep.subr.bf16.mxu1 %v9724_v4 }
0x14cd   :  { %v4594_v57 = vpop.f32.mrb[52].mxu0 }
0x14ce   :  { %v4600_v42 = vadd.f32 %v4594_v57, %v4488_v24  ;;  %v6317_v43 = vpop.f32.mrb[53].mxu0  ;;  %v9751_v24 = vld [vmem:[#allocation37_spill] sm:$0xff] }
0x14cf   :  { %v4597_v41 = vpop.f32.mrb[54].mxu0 }
0x14d0   :  { %v6318_v40 = vpop.f32.mrb[55].mxu0  ;;  %v4601_v50 = vadd.f32 %v6938_v39, %v4600_v42 }
0x14d1   :  { %v6939_v40 = vld [vmem:[%s9468_s7] sm:$0x1] }
0x14d2   :  { %v4602_v0 = vsel %vm305_vm1, %v4601_v50, -inf }
0x14d3   :  { %4603 = vmax.xlane.f32.xlu0 %v4602_v0 }
0x1560   :  { %v4604_v10 = vpop.xlane.xlu0 %4603 }
0x1561   :  { %v4605_v18 = vsub.f32 %v4601_v50, %v4604_v10  ;;  %v6828_v10 = vld [vmem:[%s9471_s10 + $0x30] sm:$0xff]  }
0x1563   :  { %v4606_v31 = vmul.f32 1.442695, %v4605_v18  ;;  %v6829_v18 = vld [vmem:[%s9471_s10 + $0x38] sm:$0xff]  }
0x1565   :  { %6900 = vpow2.f32 %v4606_v31 }
0x156f   :  { %v6901_v30 = vpop.eup %6900 }
0x1570   :  { %v4608_v34 = vsel %vm305_vm1, %v6901_v30, 0.0 }
0x1571   :  { %4609 = vadd.xlane.f32.xlu1 %v4608_v34 }
0x15fe   :  { %v4610_v21 = vpop.xlane.xlu1 %4609 }
0x15ff   :  { %6902 = vrcp.f32 %v4610_v21 }
0x1609   :  { %v6903_v29 = vpop.eup %6902 }
0x160a   :  { %v4612_v28 = vmul.f32 %v6903_v29, %v6901_v30 }
0x160c   :  { %v4613_v11 = vpack.c.bf16 %v4612_v28, %v4612_v28  ;;  %5208 = vst [vmem:[#allocation8 + $0x5] sm:$0x1] %v4612_v28 }
0x160e   :  { %6336 = vmatmul.mubr.bf16.vlgmr.msra.gmra.mrb[52].mxu1 %v4613_v11 }
0x160f   :  { %5179 = vmatprep.mubr.bf16.mxu1 %v9273_v58  ;;  %5148 = vmatpush1.bf16.msra.mxu1 %v9725_v16  ;;  %v9747_v58 = vld [vmem:[#allocation33_spill] sm:$0xff] }
0x1610   :  { %5149 = vmatprep.subr.bf16.mxu1 %v9726_v56 }
0x1613   :  { %5150 = vmatpush1.bf16.msra.mxu1 %v9727_v14 }
0x1614   :  { %5151 = vmatprep.subr.bf16.mxu1 %v9728_v32 }
0x1617   :  { %5152 = vmatpush1.bf16.msra.mxu1 %v9729_v6 }
0x1618   :  { %5153 = vmatprep.subr.bf16.mxu1 %v9730_v13 }
0x161b   :  { %5154 = vmatpush1.bf16.msra.mxu1 %v9731_v1 }
0x161c   :  { %5155 = vmatprep.subr.bf16.mxu1 %v9732_v5 }
0x161f   :  { %5156 = vmatpush1.bf16.msra.mxu1 %v9733_v63 }
0x1620   :  { %5157 = vmatprep.subr.bf16.mxu1 %v9734_v7 }
0x1623   :  { %5158 = vmatpush1.bf16.msra.mxu1 %v9735_v9 }
0x1624   :  { %5159 = vmatprep.subr.bf16.mxu1 %v9736_v25 }
0x1627   :  { %5160 = vmatpush1.bf16.msra.mxu1 %v9737_v59 }
0x1628   :  { %5161 = vmatprep.subr.bf16.mxu1 %v9738_v2 }
0x162b   :  { %5162 = vmatpush1.bf16.msra.mxu1 %v9739_v61 }
0x162c   :  { %5163 = vmatprep.subr.bf16.mxu1 %v9740_v49 }
0x162f   :  { %5164 = vmatpush1.bf16.msra.mxu1 %v9741_v27 }
0x1630   :  { %5165 = vmatprep.subr.bf16.mxu1 %v9742_v23 }
0x1633   :  { %5166 = vmatpush1.bf16.msra.mxu1 %v9743_v3 }
0x1634   :  { %5167 = vmatprep.subr.bf16.mxu1 %v9744_v55 }
0x1637   :  { %5168 = vmatpush1.bf16.msra.mxu1 %v9745_v8 }
0x1638   :  { %5169 = vmatprep.subr.bf16.mxu1 %v9746_v17 }
0x163b   :  { %5170 = vmatpush1.bf16.msra.mxu1 %v9747_v58 }
0x163c   :  { %5171 = vmatprep.subr.bf16.mxu1 %v9748_v37 }
0x163f   :  { %5172 = vmatpush1.bf16.msra.mxu1 %v9749_v33 }
0x1640   :  { %5173 = vmatprep.subr.bf16.mxu1 %v9750_v38 }
0x1643   :  { %5174 = vmatpush1.bf16.msra.mxu1 %v9751_v24 }
0x1644   :  { %5175 = vmatprep.subr.bf16.mxu1 %v9752_v45 }
0x1647   :  { %5176 = vmatpush1.bf16.msra.mxu1 %v9753_v46 }
0x1648   :  { %5177 = vmatprep.subr.bf16.mxu1 %v9187_v60  ;;  %v6822_v60 = vld [vmem:[%s9471_s10] sm:$0xff]  }
0x164b   :  { %5178 = vmatpush1.bf16.msra.mxu1 %v9197_v62  ;;  %v6823_v62 = vld [vmem:[%s9471_s10 + $0x8] sm:$0xff]  }
0x16e1   :  { %v4712_v57 = vpop.f32.mrb[52].mxu1 }
0x16e2   :  { %v4718_v42 = vadd.f32 %v4712_v57, %v9309_v52  ;;  %v6337_v43 = vpop.f32.mrb[53].mxu1  ;;  %v6824_v52 = vld [vmem:[%s9471_s10 + $0x10] sm:$0xff]  }
0x16e3   :  { %v4715_v41 = vpop.f32.mrb[54].mxu1 }
0x16e4   :  { %v4719_v39 = vadd.f32 %v6939_v40, %v4718_v42  ;;  %v6338_v50 = vpop.f32.mrb[55].mxu1 }
0x16e6   :  { %v4720_v0 = vmax.f32 %v4719_v39, 0.0 }
0x16e8   :  { %v4721_v12 = vpack.c.bf16 %v4720_v0, %v4720_v0 }
0x16ea   :  { %5139 = vmatmul.mubr.bf16.vlgmr.msra.gmra.mrb[56].mxu0 %v4721_v12  ;;  %5180 = vmatmul.mubr.bf16.vlgmr.msra.gmra.mrb[56].mxu1 %v4721_v12 }
0x16eb   :  { %6355 = vmatprep.mubr.msk.bf16.mxu0 %vm7026_vm0, %v7222_v44  ;;  %6340 = vmatpush3.bf16.msra.mxu0 %v6822_v60 }
0x16ec   :  { %6341 = vmatprep.subr.bf16.mxu0 %v7222_v44 }
0x16ef   :  { %6342 = vmatpush3.bf16.msra.mxu0 %v6823_v62 }
0x16f0   :  { %6343 = vmatprep.subr.bf16.mxu0 %v7222_v44 }
0x16f3   :  { %6344 = vmatpush3.bf16.msra.mxu0 %v6824_v52 }
0x16f4   :  { %6345 = vmatprep.subr.bf16.mxu0 %v7222_v44 }
0x16f7   :  { %6346 = vmatpush3.bf16.msra.mxu0 %v6825_v20 }
0x16f8   :  { %6347 = vmatprep.subr.bf16.mxu0 %v7222_v44 }
0x16fb   :  { %6348 = vmatpush3.bf16.msra.mxu0 %v6826_v54 }
0x16fc   :  { %6349 = vmatprep.subr.bf16.mxu0 %v7222_v44 }
0x16ff   :  { %6350 = vmatpush3.bf16.msra.mxu0 %v6827_v15 }
0x1700   :  { %6351 = vmatprep.subr.bf16.mxu0 %v7222_v44 }
0x1703   :  { %6352 = vmatpush3.bf16.msra.mxu0 %v6828_v10 }
0x1704   :  { %6353 = vmatprep.subr.bf16.mxu0 %v7222_v44 }
0x1707   :  { %6354 = vmatpush3.bf16.msra.mxu0 %v6829_v18 }
0x17bd   :  { %v5140_v31 = vpop.f32.mrb[56].mxu0  ;;  %v5181_v30 = vpop.f32.mrb[56].mxu1 }
0x17be   :  { %v5141_v34 = vadd.f32 %v5140_v31, %v7739_v26  ;;  %v5142_v51 = vpop.f32.mrb[57].mxu0  ;;  %v5183_v22 = vpop.f32.mrb[57].mxu1  ;;  %v5182_v6 = vadd.f32 %v5181_v30, %v7747_v35 }
0x17bf   :  { %v5144_v48 = vpop.f32.mrb[58].mxu0  ;;  %v5185_v53 = vpop.f32.mrb[58].mxu1  ;;  %v5143_v28 = vadd.f32 %v5142_v51, %v7741_v47  ;;  %v5184_v32 = vadd.f32 %v5183_v22, %v7745_v36  ;;  %v5973_v36 = vld [vmem:[%s9472_s11] ss:$0 sm:$0xff] }
0x17c0   :  { %v5971_v4 = vmul.f32 -1.442695, %v5141_v34  ;;  %v5145_v21 = vpop.f32.mrb[59].mxu0  ;;  %v5186_v29 = vpop.f32.mrb[59].mxu1 }
0x17c1   :  { %v5972_v11 = vmul.f32 -1.442695, %v5143_v28 }
0x17c2   :  { %6904 = vpow2.f32 %v5971_v4 }
0x17c3   :  { %6906 = vpow2.f32 %v5972_v11 }
0x17cc   :  { %v6905_v16 = vpop.eup %6904 }
0x17cd   :  { %v5191_v56 = vadd.f32 1.0, %v6905_v16  ;;  %v6907_v44 = vpop.eup %6906 }
0x17ce   :  { %v5197_v14 = vadd.f32 1.0, %v6907_v44 }
0x17cf   :  { %6908 = vrcp.f32 %v5191_v56 }
0x17d0   :  { %6910 = vrcp.f32 %v5197_v14 }
0x17d9   :  { %v6909_v26 = vpop.eup %6908 }
0x17da   :  { %v5200_v13 = vmul.f32 %v6909_v26, %v5184_v32  ;;  %v6911_v5 = vpop.eup %6910 }
0x17db   :  { %v5203_v63 = vsub.f32 1.0, %v6911_v5  ;;  %v5205_v7 = vmul.f32 %v6911_v5, %v9268_v19 }
0x17dc   :  { %v5201_v1 = vadd.f32 %v5200_v13, %v5182_v6 }
0x17de   :  { %6912 = vtanh.f32 %v5201_v1 }
0x17e8   :  { %v6913_v47 = vpop.eup %6912 }
0x17e9   :  { %v5204_v9 = vmul.f32 %v6913_v47, %v5203_v63 }
0x17eb   :  { %v5206_v25 = vadd.f32 %v5205_v7, %v5204_v9 }
0x17ed   :  { %5207 = vst [vmem:[#allocation6 + $0x5] sm:$0x1] %v5206_v25 }
0x17f4   :  { %v5209_v59 = vld [vmem:[#allocation6] sm:$0xff] }
0x17f5   :  { %v5210_v2 = vpack.c.bf16 %v5209_v59, %v5209_v59 }
0x17f7   :  { %6356 = vmatmul.mubr.bf16.vlgmr.msra.gmra.mrb[60].mxu0 %v5210_v2 }
0x18ca   :  { %v5316_v35 = vpop.f32.mrb[60].mxu0 }
0x18cb   :  { %v5317_v61 = vadd.f32 %v5973_v36, %v5316_v35  ;;  %v6357_v49 = vpop.f32.mrb[61].mxu0 }
0x18cc   :  { %v5319_v27 = vpop.f32.mrb[62].mxu0 }
0x18cd   :  { %5322 = vmax.xlane.f32.xlu0 %v5317_v61  ;;  %v6358_v23 = vpop.f32.mrb[63].mxu0 }
0x195a   :  { %v5323_v3 = vpop.xlane.xlu0 %5322 }
0x195b   :  { %v5324_v55 = vsub.f32 %v5317_v61, %v5323_v3 }
0x195d   :  { %v5325_v8 = vmul.f32 1.442695, %v5324_v55 }
0x195f   :  { %6914 = vpow2.f32 %v5325_v8 }
0x1969   :  { %v6915_v19 = vpop.eup %6914 }
0x196a   :  { %5327 = vadd.xlane.f32.xlu1 %v6915_v19 }
0x196b   :  { %6963 = shalt.err (!%p6960_p9)
}
0x196c   :  { %s6964_s16 = scalar_lea.hbm %s9474_s13, 128 }
0x196d   :  { %p6965_p10 = scmp.ne.s32.totalorder %s9474_s13, %s6964_s16  ;;  %p6968_p11 = scmp.lt.u32.totalorder %s6964_s16, %s9474_s13 }
0x196f   :  { %p6970_p12 = pnand %p6968_p11, %p6965_p10 }
0x1971   :  { %6973 = shalt.err (!%p6970_p12)
}
0x1972   :  { %5352 = dma.vmem_to_hbm [thread:$0]  %s5350_s29, 128, %s9474_s13, [#allocation7]  }
0x1973   :  { %s7029_s4 = smov [#allocation8]  }
0x1974   :  { %s5359_s3 = sshll.u32 %s7029_s4, 4  ;;  %s5360_s3 = int_to_ptr.vmem [resolvable:$true] %s5359_s3 }
0x1975   :  { %s6974_s7 = scalar_lea.vmem %s5360_s3, 128  ;;  %p6979_p0 = scmp.lt.s32.totalorder %s5360_s3, %s5360_s3 }
0x1976   :  { %p6975_p13 = scmp.ne.s32.totalorder %s5360_s3, %s6974_s7  ;;  %p6980_p1 = scmp.lt.s32.totalorder %s6974_s7, %s6974_s7 }
0x1978   :  { %p6981_p2 = por %p6980_p1, %p6979_p0 }
0x197a   :  { %p6982_p3 = pnand %p6981_p2, %p6975_p13 }
0x197c   :  { %6985 = shalt.err (!%p6982_p3)
}
0x197d   :  { %s6986_s5 = scalar_lea.hbm %s9475_s14, 128 }
0x197e   :  { %p6987_p4 = scmp.ne.s32.totalorder %s9475_s14, %s6986_s5  ;;  %p6990_p5 = scmp.lt.u32.totalorder %s6986_s5, %s9475_s14 }
0x1980   :  { %p6992_p6 = pnand %p6990_p5, %p6987_p4 }
0x1982   :  { %6995 = shalt.err (!%p6992_p6)
}
0x1983   :  { %5362 = dma.vmem_to_hbm [thread:$0]  %s5360_s3, 128, %s9475_s14, [#allocation7]  }
0x1984   :  { %s7030_s24 = smov [#allocation4]  }
0x1985   :  { %s5339_s6 = sshll.u32 %s7030_s24, 4  ;;  %s5340_s6 = int_to_ptr.vmem [resolvable:$true] %s5339_s6 }
0x1986   :  { %s6996_s25 = scalar_lea.vmem %s5340_s6, 128  ;;  %p7001_p8 = scmp.lt.s32.totalorder %s5340_s6, %s5340_s6 }
0x1987   :  { %p6997_p7 = scmp.ne.s32.totalorder %s5340_s6, %s6996_s25  ;;  %p7002_p9 = scmp.lt.s32.totalorder %s6996_s25, %s6996_s25 }
0x1989   :  { %p7003_p10 = por %p7002_p9, %p7001_p8 }
0x198b   :  { %p7004_p11 = pnand %p7003_p10, %p6997_p7 }
0x19f7   :  { %v5328_v17 = vpop.xlane.xlu1 %5327 }
0x19f8   :  { %6916 = vlog2.f32 %v5328_v17 }
0x1a02   :  { %v6917_v58 = vpop.eup %6916 }
0x1a03   :  { %v5330_v37 = vmul.f32 0.6931472, %v6917_v58 }
0x1a05   :  { %v5331_v33 = vsub.f32 %v5324_v55, %v5330_v37 }
0x1a07   :  { %5332 = vst [vmem:[#allocation4] sm:$0xff] %v5331_v33 }
0x1a08   :  { %7007 = shalt.err (!%p7004_p11)
}
0x1a09   :  { %s7008_s14 = scalar_lea.hbm %s9473_s12, 128 }
0x1a0a   :  { %p7009_p12 = scmp.ne.s32.totalorder %s9473_s12, %s7008_s14  ;;  %p7012_p13 = scmp.lt.u32.totalorder %s7008_s14, %s9473_s12 }
0x1a0c   :  { %p7014_p0 = pnand %p7012_p13, %p7009_p12 }
0x1a0e   :  { %7017 = shalt.err (!%p7014_p0)
}
0x1a0f   :  { %5342 = dma.vmem_to_hbm [thread:$0]  %s5340_s6, 128, %s9473_s12, [#allocation5]  }
0x1a10   :  { %7020 = dma.done.wait [#allocation5], 128  }
0x1a11   :  { %7021 = vsyncadd [#allocation5], 4294967168 }
0x1a12   :  { %7022 = dma.done.wait [#allocation7], 256  }
0x1a13   :  { %7023 = vsyncadd [#allocation7], 4294967040 }
0x1a14   :  { %5372 = vsyncpa [#allocation5], 1 }
0x1a15   :  { %5373 = vsyncpa [#allocation7], 1 }

</bundles_post_ra>
